<compile_context>
chip_gen: v7x
topology: tpu7x:2x2x1
jax: 0.10.0
libtpu: 0.0.40
codegen_flags: <defaults>
</compile_context>

<pallas_src>
import functools
import math

import jax
import jax.numpy as jnp
from jax.experimental import pallas as pl
from jax.experimental.pallas import tpu as pltpu

# Row indices of the packed (9, D) bias / LayerNorm vector input.
_BQ, _BK, _BV, _BO, _LN1W, _LN1B, _LN2W, _LN2B, _B2 = range(9)


def encoder_layer_kernel(
    xq_ref,                      # (1, TS, D) f32   query / residual rows for this step
    xkv_ref,                     # (1, S,  D) bf16  full sequence for K / V
    wq_ref, wk_ref, wv_ref,      # (D, D)  bf16     pre-transposed; wq pre-scaled by 1/sqrt(dh)
    wo_ref,                      # (D, D)  bf16     out_proj.weight, pre-transposed
    w1_ref,                      # (D, DFF) bf16    linear1.weight, pre-transposed
    w2_ref,                      # (DFF, D) bf16    linear2.weight, pre-transposed
    vec_ref,                     # (9, D)  f32      packed biases + LayerNorm params
    b1_ref,                      # (1, DFF) f32
    o_ref,                       # (1, TS, D)
    k_cache,                     # (H, S, dh) bf16  scratch: cached K (head-split)
    v_cache,                     # (H, S, dh) bf16  scratch: cached V (head-split)
    *,
    nhead: int,
    eps: float,
):
    xq = xq_ref[0]                       # (TS, D) f32
    TS, D = xq.shape
    dh = D // nhead

    def vrow(i):                         # (1, D) f32 view of a packed vector
        return vec_ref[i:i + 1, :]

    # --- K / V projections: computed once per batch element (seq axis is the
    #     sequential "arbitrary" grid axis), cached in VMEM scratch. ---------
    @pl.when(pl.program_id(1) == 0)
    def _():
        xkv = xkv_ref[0]                 # (S, D) bf16
        S = xkv.shape[0]
        k = jnp.dot(xkv, wk_ref[...], preferred_element_type=jnp.float32) + vrow(_BK)
        v = jnp.dot(xkv, wv_ref[...], preferred_element_type=jnp.float32) + vrow(_BV)
        k_cache[...] = jnp.transpose(k.reshape(S, nhead, dh), (1, 0, 2)).astype(jnp.bfloat16)
        v_cache[...] = jnp.transpose(v.reshape(S, nhead, dh), (1, 0, 2)).astype(jnp.bfloat16)

    # --- Q projection (1/sqrt(dh) folded into wq / bq on the host) ----------
    q = jnp.dot(xq.astype(jnp.bfloat16), wq_ref[...],
                preferred_element_type=jnp.float32) + vrow(_BQ)
    q3 = jnp.transpose(q.reshape(TS, nhead, dh), (1, 0, 2)).astype(jnp.bfloat16)  # (H,TS,dh)

    k3 = k_cache[...]                    # (H, S, dh) bf16
    v3 = v_cache[...]                    # (H, S, dh) bf16

    # --- attention with deferred softmax normalization ----------------------
    s = jnp.einsum("hqd,hkd->hqk", q3, k3, preferred_element_type=jnp.float32)
    s = s - jnp.max(s, axis=-1, keepdims=True)
    p = jnp.exp(s)                                                   # EUP, entries <= 1
    inv = pl.reciprocal(jnp.sum(p, axis=-1, keepdims=True), approx=True)  # (H,TS,1)
    ctx = jnp.einsum("hqk,hkd->hqd", p.astype(jnp.bfloat16), v3,
                     preferred_element_type=jnp.float32)             # (H,TS,dh)
    ctx = ctx * inv                                                  # normalize small tensor
    ctx = jnp.transpose(ctx, (1, 0, 2)).reshape(TS, D).astype(jnp.bfloat16)

    attn = jnp.dot(ctx, wo_ref[...], preferred_element_type=jnp.float32) + vrow(_BO)

    # --- residual + LayerNorm1 (post-norm), stats in f32 --------------------
    y = xq + attn
    mu = jnp.mean(y, axis=-1, keepdims=True)
    var = jnp.mean((y - mu) ** 2, axis=-1, keepdims=True)
    y = (y - mu) * jax.lax.rsqrt(var + eps) * vrow(_LN1W) + vrow(_LN1B)

    # --- feedforward: linear1 -> relu -> linear2 -----------------------------
    h1 = jnp.dot(y.astype(jnp.bfloat16), w1_ref[...],
                 preferred_element_type=jnp.float32) + b1_ref[...]
    h1 = jnp.maximum(h1, 0.0)
    ff = jnp.dot(h1.astype(jnp.bfloat16), w2_ref[...],
                 preferred_element_type=jnp.float32) + vrow(_B2)

    # --- residual + LayerNorm2 ----------------------------------------------
    z = y + ff
    mu2 = jnp.mean(z, axis=-1, keepdims=True)
    var2 = jnp.mean((z - mu2) ** 2, axis=-1, keepdims=True)
    z = (z - mu2) * jax.lax.rsqrt(var2 + eps) * vrow(_LN2W) + vrow(_LN2B)

    o_ref[0] = z.astype(o_ref.dtype)


def _pick_seq_tile(S: int, nhead: int, *, score_budget_bytes: int = 8 << 20) -> int:
    """Largest seq tile dividing S whose (H, TS, S) f32 score block fits the budget."""
    candidates = [t for t in (1024, 512, 256, 128, 64, 32, 16, 8) if S % t == 0]
    fitting = [t for t in candidates if nhead * t * S * 4 <= score_budget_bytes]
    if fitting:
        return fitting[0]          # largest fitting divisor
    if candidates:
        return candidates[-1]      # smallest divisor (best effort for huge S)
    return S                       # tiny / awkward S: one step over the whole sequence


def transformer_encoder_layer(src, params, *, nhead, eps=1e-5, vmem_limit_bytes=None):
    """src: (seq, batch, d_model) float32 (PyTorch batch_first=False layout).

    vmem_limit_bytes: leave None for the compiler default; at realistic sizes
    use ~48-56 MiB on v7x (64 MiB/TC) and up to ~100-110 MiB on v5e/v6e.
    """
    S, B, D = src.shape
    DFF = params["w1"].shape[0]
    assert D % nhead == 0, "d_model must be divisible by nhead"
    dh = D // nhead

    TS = _pick_seq_tile(S, nhead)
    n_s = S // TS

    # Kernel-internal layout is (B, S, D); K/V input pre-cast to bf16 (it is
    # cast inside the kernel anyway) to halve the largest recurring DMA.
    x = jnp.transpose(src, (1, 0, 2))
    x_kv = x.astype(jnp.bfloat16)

    # Pre-transpose weights (kernel never does `.T`), cast to bf16, and fold
    # the 1/sqrt(dh) attention scale into wq / bq.
    scale = 1.0 / math.sqrt(dh)
    in_w = params["in_proj_w"]            # (3D, D)
    in_b = params["in_proj_b"]            # (3D,)
    wq = (in_w[0:D] * scale).T.astype(jnp.bfloat16)
    wk = in_w[D:2 * D].T.astype(jnp.bfloat16)
    wv = in_w[2 * D:3 * D].T.astype(jnp.bfloat16)
    wo = params["out_proj_w"].T.astype(jnp.bfloat16)     # (D, D)
    w1 = params["w1"].T.astype(jnp.bfloat16)             # (D, DFF)
    w2 = params["w2"].T.astype(jnp.bfloat16)             # (DFF, D)
    vecs = jnp.stack([
        in_b[0:D] * scale,            # _BQ  (pre-scaled)
        in_b[D:2 * D],                # _BK
        in_b[2 * D:3 * D],            # _BV
        params["out_proj_b"],         # _BO
        params["ln1_w"],              # _LN1W
        params["ln1_b"],              # _LN1B
        params["ln2_w"],              # _LN2W
        params["ln2_b"],              # _LN2B
        params["b2"],                 # _B2
    ]).astype(jnp.float32)                                # (9, D)
    b1 = params["b1"].reshape(1, DFF).astype(jnp.float32)

    kernel = functools.partial(encoder_layer_kernel, nhead=nhead, eps=eps)

    def build(single_buffer_weights: bool):
        pmode = pl.Buffered(1) if single_buffer_weights else None

        def const(shape):
            # Constant-index blocks: identical every grid step -> single buffer.
            if pmode is None:
                return pl.BlockSpec(shape, lambda b, s: (0, 0))
            return pl.BlockSpec(shape, lambda b, s: (0, 0), pipeline_mode=pmode)

        return pl.pallas_call(
            kernel,
            out_shape=jax.ShapeDtypeStruct((B, S, D), src.dtype),
            grid=(B, n_s),
            in_specs=[
                pl.BlockSpec((1, TS, D), lambda b, s: (b, s, 0)),   # query / residual rows (f32)
                pl.BlockSpec((1, S, D), lambda b, s: (b, 0, 0)),    # full sequence for K/V (bf16)
                const((D, D)), const((D, D)), const((D, D)),        # wq, wk, wv
                const((D, D)),                                      # wo
                const((D, DFF)), const((DFF, D)),                   # w1, w2
                const((9, D)), const((1, DFF)),                     # packed vecs, b1
            ],
            out_specs=pl.BlockSpec((1, TS, D), lambda b, s: (b, s, 0)),
            scratch_shapes=[
                pltpu.VMEM((nhead, S, dh), jnp.bfloat16),            # K cache
                pltpu.VMEM((nhead, S, dh), jnp.bfloat16),            # V cache
            ],
            compiler_params=pltpu.CompilerParams(
                # Seq axis MUST be "arbitrary": the K/V scratch cache relies on
                # sequential iteration (filled at program_id(1)==0, reused after).
                dimension_semantics=("parallel", "arbitrary"),
                vmem_limit_bytes=vmem_limit_bytes,
            ),
        )

    args = (x, x_kv, wq, wk, wv, wo, w1, w2, vecs, b1)
    try:
        out = build(True)(*args)
    except Exception:
        # Compatibility fallback: if this JAX build rejects pl.Buffered on a
        # pallas_call BlockSpec, rerun with default double buffering.
        out = build(False)(*args)

    return jnp.transpose(out, (1, 0, 2))   # back to (S, B, D)


def reference_encoder_layer(src, params, *, nhead, eps=1e-5):
    """Pure-JAX f32 reference matching PyTorch post-norm TransformerEncoderLayer."""
    S, B, D = src.shape
    dh = D // nhead
    in_w, in_b = params["in_proj_w"], params["in_proj_b"]
    q = src @ in_w[0:D].T + in_b[0:D]
    k = src @ in_w[D:2 * D].T + in_b[D:2 * D]
    v = src @ in_w[2 * D:3 * D].T + in_b[2 * D:3 * D]

    def split(t):          # (S, B, D) -> (B, H, S, dh)
        return jnp.transpose(t.reshape(S, B, nhead, dh), (1, 2, 0, 3))

    s = jnp.einsum("bhqd,bhkd->bhqk", split(q), split(k)) / math.sqrt(dh)
    p = jax.nn.softmax(s, axis=-1)
    ctx = jnp.einsum("bhqk,bhkd->bhqd", p, split(v))
    ctx = jnp.transpose(ctx, (2, 0, 1, 3)).reshape(S, B, D)
    attn = ctx @ params["out_proj_w"].T + params["out_proj_b"]

    def ln(t, w, b):
        mu = jnp.mean(t, -1, keepdims=True)
        var = jnp.mean((t - mu) ** 2, -1, keepdims=True)
        return (t - mu) * jax.lax.rsqrt(var + eps) * w + b

    y = ln(src + attn, params["ln1_w"], params["ln1_b"])
    h = jnp.maximum(y @ params["w1"].T + params["b1"], 0.0)
    ff = h @ params["w2"].T + params["b2"]
    return ln(y + ff, params["ln2_w"], params["ln2_b"])


def init_params(key, d_model, nhead, dim_feedforward):
    ks = jax.random.split(key, 8)
    scale = 0.02
    return {
        "in_proj_w": scale * jax.random.normal(ks[0], (3 * d_model, d_model), jnp.float32),
        "in_proj_b": scale * jax.random.normal(ks[1], (3 * d_model,), jnp.float32),
        "out_proj_w": scale * jax.random.normal(ks[2], (d_model, d_model), jnp.float32),
        "out_proj_b": scale * jax.random.normal(ks[3], (d_model,), jnp.float32),
        "ln1_w": jnp.ones((d_model,), jnp.float32),
        "ln1_b": jnp.zeros((d_model,), jnp.float32),
        "ln2_w": jnp.ones((d_model,), jnp.float32),
        "ln2_b": jnp.zeros((d_model,), jnp.float32),
        "w1": scale * jax.random.normal(ks[4], (dim_feedforward, d_model), jnp.float32),
        "b1": scale * jax.random.normal(ks[5], (dim_feedforward,), jnp.float32),
        "w2": scale * jax.random.normal(ks[6], (d_model, dim_feedforward), jnp.float32),
        "b2": scale * jax.random.normal(ks[7], (d_model,), jnp.float32),
    }


if __name__ == "__main__":
    SEQ, BATCH, D_MODEL, NHEAD, DFF = 8, 2, 32, 4, 64

    key = jax.random.PRNGKey(0)
    k_x, k_p = jax.random.split(key)
    src = jax.random.normal(k_x, (SEQ, BATCH, D_MODEL), jnp.float32)
    params = init_params(k_p, D_MODEL, NHEAD, DFF)

    out = transformer_encoder_layer(src, params, nhead=NHEAD, eps=1e-5)
    out = jax.block_until_ready(out)
    assert out.shape == (SEQ, BATCH, D_MODEL)
    assert bool(jnp.all(jnp.isfinite(out)))

    # Loose tolerance: bf16 weights/activations + approx reciprocal in softmax.
    ref = reference_encoder_layer(src, params, nhead=NHEAD, eps=1e-5)
    max_err = float(jnp.max(jnp.abs(out - ref)))
    assert max_err < 1e-1, f"max abs error vs f32 reference: {max_err}"
    print("KERNEL_OK")
</pallas_src>

<mosaic_0001>
module attributes {stable_mosaic.version = 11 : i64} {
  func.func @encoder_layer_kernel(%arg0: i32, %arg1: i32, %arg2: memref<1x8x32xf32, #tpu.memory_space<vmem>>, %arg3: memref<1x8x32xbf16, #tpu.memory_space<vmem>>, %arg4: memref<32x32xbf16, #tpu.memory_space<vmem>>, %arg5: memref<32x32xbf16, #tpu.memory_space<vmem>>, %arg6: memref<32x32xbf16, #tpu.memory_space<vmem>>, %arg7: memref<32x32xbf16, #tpu.memory_space<vmem>>, %arg8: memref<32x64xbf16, #tpu.memory_space<vmem>>, %arg9: memref<64x32xbf16, #tpu.memory_space<vmem>>, %arg10: memref<9x32xf32, #tpu.memory_space<vmem>>, %arg11: memref<1x64xf32, #tpu.memory_space<vmem>>, %arg12: memref<1x8x32xf32, #tpu.memory_space<vmem>>, %arg13: memref<4x8x8xbf16, #tpu.memory_space<vmem>>, %arg14: memref<4x8x8xbf16, #tpu.memory_space<vmem>>) attributes {dimension_semantics = [#tpu.dimension_semantics<parallel>, #tpu.dimension_semantics<arbitrary>], iteration_bounds = array<i64: 2, 1>, scalar_prefetch = 0 : i64, scratch_operands = 2 : i64, tpu.core_type = #tpu.core_type<tc>, window_params = [{transform_indices = @transform_0, window_bounds = array<i64: 1, 8, 32>}, {transform_indices = @transform_1, window_bounds = array<i64: 1, 8, 32>}, {pipeline_mode = #tpu.pipeline_mode<synchronous>, transform_indices = @transform_2, window_bounds = array<i64: 32, 32>}, {pipeline_mode = #tpu.pipeline_mode<synchronous>, transform_indices = @transform_3, window_bounds = array<i64: 32, 32>}, {pipeline_mode = #tpu.pipeline_mode<synchronous>, transform_indices = @transform_4, window_bounds = array<i64: 32, 32>}, {pipeline_mode = #tpu.pipeline_mode<synchronous>, transform_indices = @transform_5, window_bounds = array<i64: 32, 32>}, {pipeline_mode = #tpu.pipeline_mode<synchronous>, transform_indices = @transform_6, window_bounds = array<i64: 32, 64>}, {pipeline_mode = #tpu.pipeline_mode<synchronous>, transform_indices = @transform_7, window_bounds = array<i64: 64, 32>}, {pipeline_mode = #tpu.pipeline_mode<synchronous>, transform_indices = @transform_8, window_bounds = array<i64: 9, 32>}, {pipeline_mode = #tpu.pipeline_mode<synchronous>, transform_indices = @transform_9, window_bounds = array<i64: 1, 64>}, {transform_indices = @transform_10, window_bounds = array<i64: 1, 8, 32>}]} {
    %c0 = arith.constant 0 : index
    %c0_0 = arith.constant 0 : index
    %c0_1 = arith.constant 0 : index
    %0 = vector.load %arg2[%c0, %c0_0, %c0_1] : memref<1x8x32xf32, #tpu.memory_space<vmem>>, vector<1x8x32xf32>
    %1 = vector.shape_cast %0 : vector<1x8x32xf32> to vector<8x32xf32>
    %c0_i32 = arith.constant 0 : i32
    %2 = arith.cmpi eq, %arg1, %c0_i32 : i32
    %3 = arith.extui %2 : i1 to i32
    %c0_i32_2 = arith.constant 0 : i32
    %4 = arith.cmpi ne, %3, %c0_i32_2 : i32
    scf.if %4 {
      %c0_48 = arith.constant 0 : index
      %c0_49 = arith.constant 0 : index
      %c0_50 = arith.constant 0 : index
      %104 = vector.load %arg3[%c0_48, %c0_49, %c0_50] : memref<1x8x32xbf16, #tpu.memory_space<vmem>>, vector<1x8x32xbf16>
      %105 = vector.shape_cast %104 : vector<1x8x32xbf16> to vector<8x32xbf16>
      %c0_51 = arith.constant 0 : index
      %c0_52 = arith.constant 0 : index
      %106 = vector.load %arg5[%c0_51, %c0_52] : memref<32x32xbf16, #tpu.memory_space<vmem>>, vector<32x32xbf16>
      %cst_53 = arith.constant dense<0.000000e+00> : vector<8x32xf32>
      %107 = tpu.matmul %105, %106, %cst_53 {dimension_numbers = #tpu.dot_dimension_numbers<[1], [0], [0], [1], [0, 0, 1, 1], [], []>} : vector<8x32xbf16>, vector<32x32xbf16>, vector<8x32xf32> -> vector<8x32xf32>
      %c1 = arith.constant 1 : index
      %c0_54 = arith.constant 0 : index
      %108 = vector.load %arg10[%c1, %c0_54] : memref<9x32xf32, #tpu.memory_space<vmem>>, vector<1x32xf32>
      %109 = vector.broadcast %108 : vector<1x32xf32> to vector<8x32xf32>
      %110 = arith.addf %107, %109 : vector<8x32xf32>
      %c0_55 = arith.constant 0 : index
      %c0_56 = arith.constant 0 : index
      %111 = vector.load %arg6[%c0_55, %c0_56] : memref<32x32xbf16, #tpu.memory_space<vmem>>, vector<32x32xbf16>
      %cst_57 = arith.constant dense<0.000000e+00> : vector<8x32xf32>
      %112 = tpu.matmul %105, %111, %cst_57 {dimension_numbers = #tpu.dot_dimension_numbers<[1], [0], [0], [1], [0, 0, 1, 1], [], []>} : vector<8x32xbf16>, vector<32x32xbf16>, vector<8x32xf32> -> vector<8x32xf32>
      %c2 = arith.constant 2 : index
      %c0_58 = arith.constant 0 : index
      %113 = vector.load %arg10[%c2, %c0_58] : memref<9x32xf32, #tpu.memory_space<vmem>>, vector<1x32xf32>
      %114 = vector.broadcast %113 : vector<1x32xf32> to vector<8x32xf32>
      %115 = arith.addf %112, %114 : vector<8x32xf32>
      %116 = vector.shape_cast %110 : vector<8x32xf32> to vector<8x4x8xf32>
      %117 = tpu.transpose %116, [1, 0, 2] : vector<8x4x8xf32> -> vector<4x8x8xf32>
      %118 = arith.truncf %117 : vector<4x8x8xf32> to vector<4x8x8xbf16>
      %c0_59 = arith.constant 0 : index
      %c0_60 = arith.constant 0 : index
      %c0_61 = arith.constant 0 : index
      %119 = vector.load %arg13[%c0_59, %c0_60, %c0_61] : memref<4x8x8xbf16, #tpu.memory_space<vmem>>, vector<4x8x8xbf16>
      tpu.vector_store %arg13[%c0_59, %c0_60, %c0_61], %118 {strides = array<i32>} : memref<4x8x8xbf16, #tpu.memory_space<vmem>>, vector<4x8x8xbf16>,
      %120 = vector.shape_cast %115 : vector<8x32xf32> to vector<8x4x8xf32>
      %121 = tpu.transpose %120, [1, 0, 2] : vector<8x4x8xf32> -> vector<4x8x8xf32>
      %122 = arith.truncf %121 : vector<4x8x8xf32> to vector<4x8x8xbf16>
      %c0_62 = arith.constant 0 : index
      %c0_63 = arith.constant 0 : index
      %c0_64 = arith.constant 0 : index
      %123 = vector.load %arg14[%c0_62, %c0_63, %c0_64] : memref<4x8x8xbf16, #tpu.memory_space<vmem>>, vector<4x8x8xbf16>
      tpu.vector_store %arg14[%c0_62, %c0_63, %c0_64], %122 {strides = array<i32>} : memref<4x8x8xbf16, #tpu.memory_space<vmem>>, vector<4x8x8xbf16>,
    } else {
    }
    %5 = arith.truncf %1 : vector<8x32xf32> to vector<8x32xbf16>
    %c0_3 = arith.constant 0 : index
    %c0_4 = arith.constant 0 : index
    %6 = vector.load %arg4[%c0_3, %c0_4] : memref<32x32xbf16, #tpu.memory_space<vmem>>, vector<32x32xbf16>
    %cst = arith.constant dense<0.000000e+00> : vector<8x32xf32>
    %7 = tpu.matmul %5, %6, %cst {dimension_numbers = #tpu.dot_dimension_numbers<[1], [0], [0], [1], [0, 0, 1, 1], [], []>} : vector<8x32xbf16>, vector<32x32xbf16>, vector<8x32xf32> -> vector<8x32xf32>
    %c0_5 = arith.constant 0 : index
    %c0_6 = arith.constant 0 : index
    %8 = vector.load %arg10[%c0_5, %c0_6] : memref<9x32xf32, #tpu.memory_space<vmem>>, vector<1x32xf32>
    %9 = vector.broadcast %8 : vector<1x32xf32> to vector<8x32xf32>
    %10 = arith.addf %7, %9 : vector<8x32xf32>
    %11 = vector.shape_cast %10 : vector<8x32xf32> to vector<8x4x8xf32>
    %12 = tpu.transpose %11, [1, 0, 2] : vector<8x4x8xf32> -> vector<4x8x8xf32>
    %13 = arith.truncf %12 : vector<4x8x8xf32> to vector<4x8x8xbf16>
    %c0_7 = arith.constant 0 : index
    %c0_8 = arith.constant 0 : index
    %c0_9 = arith.constant 0 : index
    %14 = vector.load %arg13[%c0_7, %c0_8, %c0_9] : memref<4x8x8xbf16, #tpu.memory_space<vmem>>, vector<4x8x8xbf16>
    %c0_10 = arith.constant 0 : index
    %c0_11 = arith.constant 0 : index
    %c0_12 = arith.constant 0 : index
    %15 = vector.load %arg14[%c0_10, %c0_11, %c0_12] : memref<4x8x8xbf16, #tpu.memory_space<vmem>>, vector<4x8x8xbf16>
    "tpu.trace_start"() <{level = 10 : i32, message = "hqd,hkd->hqk"}> : () -> ()
    %cst_13 = arith.constant dense<0.000000e+00> : vector<4x8x8xf32>
    %16 = tpu.matmul %13, %14, %cst_13 {dimension_numbers = #tpu.dot_dimension_numbers<[2], [2], [1], [1], [0, 0, 0, 1, 1, 1], [0], [0]>} : vector<4x8x8xbf16>, vector<4x8x8xbf16>, vector<4x8x8xf32> -> vector<4x8x8xf32>
    "tpu.trace_stop"() : () -> ()
    %cst_14 = arith.constant dense<0xFF800000> : vector<4x8xf32>
    %17 = vector.multi_reduction <maximumf>, %16, %cst_14 [2] : vector<4x8x8xf32> to vector<4x8xf32>
    %18 = vector.shape_cast %17 : vector<4x8xf32> to vector<4x8x1xf32>
    %19 = vector.broadcast %18 : vector<4x8x1xf32> to vector<4x8x8xf32>
    %20 = arith.subf %16, %19 : vector<4x8x8xf32>
    %21 = math.exp %20 : vector<4x8x8xf32>
    %cst_15 = arith.constant dense<0.000000e+00> : vector<4x8xf32>
    %22 = vector.multi_reduction <add>, %21, %cst_15 [2] : vector<4x8x8xf32> to vector<4x8xf32>
    %23 = vector.shape_cast %22 : vector<4x8xf32> to vector<4x8x1xf32>
    %24 = tpu.reciprocal %23 {approx = true} : vector<4x8x1xf32> -> vector<4x8x1xf32>
    %25 = arith.truncf %21 : vector<4x8x8xf32> to vector<4x8x8xbf16>
    "tpu.trace_start"() <{level = 10 : i32, message = "hqk,hkd->hqd"}> : () -> ()
    %cst_16 = arith.constant dense<0.000000e+00> : vector<4x8x8xf32>
    %26 = tpu.matmul %25, %15, %cst_16 {dimension_numbers = #tpu.dot_dimension_numbers<[2], [1], [1], [2], [0, 0, 0, 1, 1, 2], [0], [0]>} : vector<4x8x8xbf16>, vector<4x8x8xbf16>, vector<4x8x8xf32> -> vector<4x8x8xf32>
    "tpu.trace_stop"() : () -> ()
    %27 = vector.broadcast %24 : vector<4x8x1xf32> to vector<4x8x8xf32>
    %28 = arith.mulf %26, %27 : vector<4x8x8xf32>
    %29 = tpu.transpose %28, [1, 0, 2] : vector<4x8x8xf32> -> vector<8x4x8xf32>
    %30 = vector.shape_cast %29 : vector<8x4x8xf32> to vector<8x32xf32>
    %31 = arith.truncf %30 : vector<8x32xf32> to vector<8x32xbf16>
    %c0_17 = arith.constant 0 : index
    %c0_18 = arith.constant 0 : index
    %32 = vector.load %arg7[%c0_17, %c0_18] : memref<32x32xbf16, #tpu.memory_space<vmem>>, vector<32x32xbf16>
    %cst_19 = arith.constant dense<0.000000e+00> : vector<8x32xf32>
    %33 = tpu.matmul %31, %32, %cst_19 {dimension_numbers = #tpu.dot_dimension_numbers<[1], [0], [0], [1], [0, 0, 1, 1], [], []>} : vector<8x32xbf16>, vector<32x32xbf16>, vector<8x32xf32> -> vector<8x32xf32>
    %c3 = arith.constant 3 : index
    %c0_20 = arith.constant 0 : index
    %34 = vector.load %arg10[%c3, %c0_20] : memref<9x32xf32, #tpu.memory_space<vmem>>, vector<1x32xf32>
    %35 = vector.broadcast %34 : vector<1x32xf32> to vector<8x32xf32>
    %36 = arith.addf %33, %35 : vector<8x32xf32>
    %37 = arith.addf %1, %36 : vector<8x32xf32>
    %cst_21 = arith.constant dense<0.000000e+00> : vector<8xf32>
    %38 = vector.multi_reduction <add>, %37, %cst_21 [1] : vector<8x32xf32> to vector<8xf32>
    %39 = vector.shape_cast %38 : vector<8xf32> to vector<8x1xf32>
    %cst_22 = arith.constant 3.200000e+01 : f32
    %40 = vector.broadcast %cst_22 : f32 to vector<8x1xf32>
    %41 = arith.divf %39, %40 : vector<8x1xf32>
    %42 = vector.broadcast %41 : vector<8x1xf32> to vector<8x32xf32>
    %43 = arith.subf %37, %42 : vector<8x32xf32>
    %44 = arith.mulf %43, %43 : vector<8x32xf32>
    %cst_23 = arith.constant dense<0.000000e+00> : vector<8xf32>
    %45 = vector.multi_reduction <add>, %44, %cst_23 [1] : vector<8x32xf32> to vector<8xf32>
    %46 = vector.shape_cast %45 : vector<8xf32> to vector<8x1xf32>
    %cst_24 = arith.constant 3.200000e+01 : f32
    %47 = vector.broadcast %cst_24 : f32 to vector<8x1xf32>
    %48 = arith.divf %46, %47 : vector<8x1xf32>
    %49 = vector.broadcast %41 : vector<8x1xf32> to vector<8x32xf32>
    %50 = arith.subf %37, %49 : vector<8x32xf32>
    %cst_25 = arith.constant 9.99999974E-6 : f32
    %51 = vector.broadcast %cst_25 : f32 to vector<8x1xf32>
    %52 = arith.addf %48, %51 : vector<8x1xf32>
    %53 = math.rsqrt %52 : vector<8x1xf32>
    %54 = vector.broadcast %53 : vector<8x1xf32> to vector<8x32xf32>
    %55 = arith.mulf %50, %54 : vector<8x32xf32>
    %c4 = arith.constant 4 : index
    %c0_26 = arith.constant 0 : index
    %56 = vector.load %arg10[%c4, %c0_26] : memref<9x32xf32, #tpu.memory_space<vmem>>, vector<1x32xf32>
    %57 = vector.broadcast %56 : vector<1x32xf32> to vector<8x32xf32>
    %58 = arith.mulf %55, %57 : vector<8x32xf32>
    %c5 = arith.constant 5 : index
    %c0_27 = arith.constant 0 : index
    %59 = vector.load %arg10[%c5, %c0_27] : memref<9x32xf32, #tpu.memory_space<vmem>>, vector<1x32xf32>
    %60 = vector.broadcast %59 : vector<1x32xf32> to vector<8x32xf32>
    %61 = arith.addf %58, %60 : vector<8x32xf32>
    %62 = arith.truncf %61 : vector<8x32xf32> to vector<8x32xbf16>
    %c0_28 = arith.constant 0 : index
    %c0_29 = arith.constant 0 : index
    %63 = vector.load %arg8[%c0_28, %c0_29] : memref<32x64xbf16, #tpu.memory_space<vmem>>, vector<32x64xbf16>
    %cst_30 = arith.constant dense<0.000000e+00> : vector<8x64xf32>
    %64 = tpu.matmul %62, %63, %cst_30 {dimension_numbers = #tpu.dot_dimension_numbers<[1], [0], [0], [1], [0, 0, 1, 1], [], []>} : vector<8x32xbf16>, vector<32x64xbf16>, vector<8x64xf32> -> vector<8x64xf32>
    %c0_31 = arith.constant 0 : index
    %c0_32 = arith.constant 0 : index
    %65 = vector.load %arg11[%c0_31, %c0_32] : memref<1x64xf32, #tpu.memory_space<vmem>>, vector<1x64xf32>
    %66 = vector.broadcast %65 : vector<1x64xf32> to vector<8x64xf32>
    %67 = arith.addf %64, %66 : vector<8x64xf32>
    %cst_33 = arith.constant 0.000000e+00 : f32
    %68 = vector.broadcast %cst_33 : f32 to vector<8x64xf32>
    %69 = arith.maximumf %67, %68 : vector<8x64xf32>
    %70 = arith.truncf %69 : vector<8x64xf32> to vector<8x64xbf16>
    %c0_34 = arith.constant 0 : index
    %c0_35 = arith.constant 0 : index
    %71 = vector.load %arg9[%c0_34, %c0_35] : memref<64x32xbf16, #tpu.memory_space<vmem>>, vector<64x32xbf16>
    %cst_36 = arith.constant dense<0.000000e+00> : vector<8x32xf32>
    %72 = tpu.matmul %70, %71, %cst_36 {dimension_numbers = #tpu.dot_dimension_numbers<[1], [0], [0], [1], [0, 0, 1, 1], [], []>} : vector<8x64xbf16>, vector<64x32xbf16>, vector<8x32xf32> -> vector<8x32xf32>
    %c8 = arith.constant 8 : index
    %c0_37 = arith.constant 0 : index
    %73 = vector.load %arg10[%c8, %c0_37] : memref<9x32xf32, #tpu.memory_space<vmem>>, vector<1x32xf32>
    %74 = vector.broadcast %73 : vector<1x32xf32> to vector<8x32xf32>
    %75 = arith.addf %72, %74 : vector<8x32xf32>
    %76 = arith.addf %61, %75 : vector<8x32xf32>
    %cst_38 = arith.constant dense<0.000000e+00> : vector<8xf32>
    %77 = vector.multi_reduction <add>, %76, %cst_38 [1] : vector<8x32xf32> to vector<8xf32>
    %78 = vector.shape_cast %77 : vector<8xf32> to vector<8x1xf32>
    %cst_39 = arith.constant 3.200000e+01 : f32
    %79 = vector.broadcast %cst_39 : f32 to vector<8x1xf32>
    %80 = arith.divf %78, %79 : vector<8x1xf32>
    %81 = vector.broadcast %80 : vector<8x1xf32> to vector<8x32xf32>
    %82 = arith.subf %76, %81 : vector<8x32xf32>
    %83 = arith.mulf %82, %82 : vector<8x32xf32>
    %cst_40 = arith.constant dense<0.000000e+00> : vector<8xf32>
    %84 = vector.multi_reduction <add>, %83, %cst_40 [1] : vector<8x32xf32> to vector<8xf32>
    %85 = vector.shape_cast %84 : vector<8xf32> to vector<8x1xf32>
    %cst_41 = arith.constant 3.200000e+01 : f32
    %86 = vector.broadcast %cst_41 : f32 to vector<8x1xf32>
    %87 = arith.divf %85, %86 : vector<8x1xf32>
    %88 = vector.broadcast %80 : vector<8x1xf32> to vector<8x32xf32>
    %89 = arith.subf %76, %88 : vector<8x32xf32>
    %cst_42 = arith.constant 9.99999974E-6 : f32
    %90 = vector.broadcast %cst_42 : f32 to vector<8x1xf32>
    %91 = arith.addf %87, %90 : vector<8x1xf32>
    %92 = math.rsqrt %91 : vector<8x1xf32>
    %93 = vector.broadcast %92 : vector<8x1xf32> to vector<8x32xf32>
    %94 = arith.mulf %89, %93 : vector<8x32xf32>
    %c6 = arith.constant 6 : index
    %c0_43 = arith.constant 0 : index
    %95 = vector.load %arg10[%c6, %c0_43] : memref<9x32xf32, #tpu.memory_space<vmem>>, vector<1x32xf32>
    %96 = vector.broadcast %95 : vector<1x32xf32> to vector<8x32xf32>
    %97 = arith.mulf %94, %96 : vector<8x32xf32>
    %c7 = arith.constant 7 : index
    %c0_44 = arith.constant 0 : index
    %98 = vector.load %arg10[%c7, %c0_44] : memref<9x32xf32, #tpu.memory_space<vmem>>, vector<1x32xf32>
    %99 = vector.broadcast %98 : vector<1x32xf32> to vector<8x32xf32>
    %100 = arith.addf %97, %99 : vector<8x32xf32>
    %c0_45 = arith.constant 0 : index
    %c0_46 = arith.constant 0 : index
    %c0_47 = arith.constant 0 : index
    %101 = vector.load %arg12[%c0_45, %c0_46, %c0_47] : memref<1x8x32xf32, #tpu.memory_space<vmem>>, vector<1x8x32xf32>
    %102 = vector.shape_cast %101 : vector<1x8x32xf32> to vector<8x32xf32>
    %103 = vector.shape_cast %100 : vector<8x32xf32> to vector<1x8x32xf32>
    tpu.vector_store %arg12[%c0_45, %c0_46, %c0_47], %103 {strides = array<i32>} : memref<1x8x32xf32, #tpu.memory_space<vmem>>, vector<1x8x32xf32>,
    return
  }
  func.func @transform_0(%arg0: i32, %arg1: i32) -> (i32, i32, i32) {
    %c0_i32 = arith.constant 0 : i32
    %c0_i32_0 = arith.constant 0 : i32
    return %arg0, %arg1, %c0_i32 : i32, i32, i32
  }
  func.func @transform_1(%arg0: i32, %arg1: i32) -> (i32, i32, i32) {
    %c0_i32 = arith.constant 0 : i32
    %c0_i32_0 = arith.constant 0 : i32
    %c0_i32_1 = arith.constant 0 : i32
    return %arg0, %c0_i32, %c0_i32_0 : i32, i32, i32
  }
  func.func @transform_2(%arg0: i32, %arg1: i32) -> (i32, i32) {
    %c0_i32 = arith.constant 0 : i32
    %c0_i32_0 = arith.constant 0 : i32
    %c0_i32_1 = arith.constant 0 : i32
    return %c0_i32, %c0_i32_0 : i32, i32
  }
  func.func @transform_3(%arg0: i32, %arg1: i32) -> (i32, i32) {
    %c0_i32 = arith.constant 0 : i32
    %c0_i32_0 = arith.constant 0 : i32
    %c0_i32_1 = arith.constant 0 : i32
    return %c0_i32, %c0_i32_0 : i32, i32
  }
  func.func @transform_4(%arg0: i32, %arg1: i32) -> (i32, i32) {
    %c0_i32 = arith.constant 0 : i32
    %c0_i32_0 = arith.constant 0 : i32
    %c0_i32_1 = arith.constant 0 : i32
    return %c0_i32, %c0_i32_0 : i32, i32
  }
  func.func @transform_5(%arg0: i32, %arg1: i32) -> (i32, i32) {
    %c0_i32 = arith.constant 0 : i32
    %c0_i32_0 = arith.constant 0 : i32
    %c0_i32_1 = arith.constant 0 : i32
    return %c0_i32, %c0_i32_0 : i32, i32
  }
  func.func @transform_6(%arg0: i32, %arg1: i32) -> (i32, i32) {
    %c0_i32 = arith.constant 0 : i32
    %c0_i32_0 = arith.constant 0 : i32
    %c0_i32_1 = arith.constant 0 : i32
    return %c0_i32, %c0_i32_0 : i32, i32
  }
  func.func @transform_7(%arg0: i32, %arg1: i32) -> (i32, i32) {
    %c0_i32 = arith.constant 0 : i32
    %c0_i32_0 = arith.constant 0 : i32
    %c0_i32_1 = arith.constant 0 : i32
    return %c0_i32, %c0_i32_0 : i32, i32
  }
  func.func @transform_8(%arg0: i32, %arg1: i32) -> (i32, i32) {
    %c0_i32 = arith.constant 0 : i32
    %c0_i32_0 = arith.constant 0 : i32
    %c0_i32_1 = arith.constant 0 : i32
    return %c0_i32, %c0_i32_0 : i32, i32
  }
  func.func @transform_9(%arg0: i32, %arg1: i32) -> (i32, i32) {
    %c0_i32 = arith.constant 0 : i32
    %c0_i32_0 = arith.constant 0 : i32
    %c0_i32_1 = arith.constant 0 : i32
    return %c0_i32, %c0_i32_0 : i32, i32
  }
  func.func @transform_10(%arg0: i32, %arg1: i32) -> (i32, i32, i32) {
    %c0_i32 = arith.constant 0 : i32
    %c0_i32_0 = arith.constant 0 : i32
    return %arg0, %arg1, %c0_i32 : i32, i32, i32
  }
}

module attributes {stable_mosaic.version = 11 : i64} {
  func.func @encoder_layer_kernel(%arg0: i32, %arg1: i32, %arg2: memref<1x8x32xf32, #tpu.memory_space<vmem>>, %arg3: memref<1x8x32xbf16, #tpu.memory_space<vmem>>, %arg4: memref<32x32xbf16, #tpu.memory_space<vmem>>, %arg5: memref<32x32xbf16, #tpu.memory_space<vmem>>, %arg6: memref<32x32xbf16, #tpu.memory_space<vmem>>, %arg7: memref<32x32xbf16, #tpu.memory_space<vmem>>, %arg8: memref<32x64xbf16, #tpu.memory_space<vmem>>, %arg9: memref<64x32xbf16, #tpu.memory_space<vmem>>, %arg10: memref<9x32xf32, #tpu.memory_space<vmem>>, %arg11: memref<1x64xf32, #tpu.memory_space<vmem>>, %arg12: memref<1x8x32xf32, #tpu.memory_space<vmem>>, %arg13: memref<4x8x8xbf16, #tpu.memory_space<vmem>>, %arg14: memref<4x8x8xbf16, #tpu.memory_space<vmem>>) attributes {dimension_semantics = [#tpu.dimension_semantics<parallel>, #tpu.dimension_semantics<arbitrary>], iteration_bounds = array<i64: 2, 1>, scalar_prefetch = 0 : i64, scratch_operands = 2 : i64, tpu.core_type = #tpu.core_type<tc>, window_params = [{transform_indices = @transform_0, window_bounds = array<i64: 1, 8, 32>}, {transform_indices = @transform_1, window_bounds = array<i64: 1, 8, 32>}, {pipeline_mode = #tpu.pipeline_mode<synchronous>, transform_indices = @transform_2, window_bounds = array<i64: 32, 32>}, {pipeline_mode = #tpu.pipeline_mode<synchronous>, transform_indices = @transform_3, window_bounds = array<i64: 32, 32>}, {pipeline_mode = #tpu.pipeline_mode<synchronous>, transform_indices = @transform_4, window_bounds = array<i64: 32, 32>}, {pipeline_mode = #tpu.pipeline_mode<synchronous>, transform_indices = @transform_5, window_bounds = array<i64: 32, 32>}, {pipeline_mode = #tpu.pipeline_mode<synchronous>, transform_indices = @transform_6, window_bounds = array<i64: 32, 64>}, {pipeline_mode = #tpu.pipeline_mode<synchronous>, transform_indices = @transform_7, window_bounds = array<i64: 64, 32>}, {pipeline_mode = #tpu.pipeline_mode<synchronous>, transform_indices = @transform_8, window_bounds = array<i64: 9, 32>}, {pipeline_mode = #tpu.pipeline_mode<synchronous>, transform_indices = @transform_9, window_bounds = array<i64: 1, 64>}, {transform_indices = @transform_10, window_bounds = array<i64: 1, 8, 32>}]} {
    %c0 = arith.constant 0 : index
    %c0_0 = arith.constant 0 : index
    %c0_1 = arith.constant 0 : index
    %0 = vector.load %arg2[%c0, %c0_0, %c0_1] : memref<1x8x32xf32, #tpu.memory_space<vmem>>, vector<1x8x32xf32>
    %1 = vector.shape_cast %0 : vector<1x8x32xf32> to vector<8x32xf32>
    %c0_i32 = arith.constant 0 : i32
    %2 = arith.cmpi eq, %arg1, %c0_i32 : i32
    %3 = arith.extui %2 : i1 to i32
    %c0_i32_2 = arith.constant 0 : i32
    %4 = arith.cmpi ne, %3, %c0_i32_2 : i32
    scf.if %4 {
      %c0_48 = arith.constant 0 : index
      %c0_49 = arith.constant 0 : index
      %c0_50 = arith.constant 0 : index
      %104 = vector.load %arg3[%c0_48, %c0_49, %c0_50] : memref<1x8x32xbf16, #tpu.memory_space<vmem>>, vector<1x8x32xbf16>
      %105 = vector.shape_cast %104 : vector<1x8x32xbf16> to vector<8x32xbf16>
      %c0_51 = arith.constant 0 : index
      %c0_52 = arith.constant 0 : index
      %106 = vector.load %arg5[%c0_51, %c0_52] : memref<32x32xbf16, #tpu.memory_space<vmem>>, vector<32x32xbf16>
      %cst_53 = arith.constant dense<0.000000e+00> : vector<8x32xf32>
      %107 = tpu.matmul %105, %106, %cst_53 {dimension_numbers = #tpu.dot_dimension_numbers<[1], [0], [0], [1], [0, 0, 1, 1], [], []>} : vector<8x32xbf16>, vector<32x32xbf16>, vector<8x32xf32> -> vector<8x32xf32>
      %c1 = arith.constant 1 : index
      %c0_54 = arith.constant 0 : index
      %108 = vector.load %arg10[%c1, %c0_54] : memref<9x32xf32, #tpu.memory_space<vmem>>, vector<1x32xf32>
      %109 = vector.broadcast %108 : vector<1x32xf32> to vector<8x32xf32>
      %110 = arith.addf %107, %109 : vector<8x32xf32>
      %c0_55 = arith.constant 0 : index
      %c0_56 = arith.constant 0 : index
      %111 = vector.load %arg6[%c0_55, %c0_56] : memref<32x32xbf16, #tpu.memory_space<vmem>>, vector<32x32xbf16>
      %cst_57 = arith.constant dense<0.000000e+00> : vector<8x32xf32>
      %112 = tpu.matmul %105, %111, %cst_57 {dimension_numbers = #tpu.dot_dimension_numbers<[1], [0], [0], [1], [0, 0, 1, 1], [], []>} : vector<8x32xbf16>, vector<32x32xbf16>, vector<8x32xf32> -> vector<8x32xf32>
      %c2 = arith.constant 2 : index
      %c0_58 = arith.constant 0 : index
      %113 = vector.load %arg10[%c2, %c0_58] : memref<9x32xf32, #tpu.memory_space<vmem>>, vector<1x32xf32>
      %114 = vector.broadcast %113 : vector<1x32xf32> to vector<8x32xf32>
      %115 = arith.addf %112, %114 : vector<8x32xf32>
      %116 = vector.shape_cast %110 : vector<8x32xf32> to vector<8x4x8xf32>
      %117 = tpu.transpose %116, [1, 0, 2] : vector<8x4x8xf32> -> vector<4x8x8xf32>
      %118 = arith.truncf %117 : vector<4x8x8xf32> to vector<4x8x8xbf16>
      %c0_59 = arith.constant 0 : index
      %c0_60 = arith.constant 0 : index
      %c0_61 = arith.constant 0 : index
      %119 = vector.load %arg13[%c0_59, %c0_60, %c0_61] : memref<4x8x8xbf16, #tpu.memory_space<vmem>>, vector<4x8x8xbf16>
      tpu.vector_store %arg13[%c0_59, %c0_60, %c0_61], %118 {strides = array<i32>} : memref<4x8x8xbf16, #tpu.memory_space<vmem>>, vector<4x8x8xbf16>,
      %120 = vector.shape_cast %115 : vector<8x32xf32> to vector<8x4x8xf32>
      %121 = tpu.transpose %120, [1, 0, 2] : vector<8x4x8xf32> -> vector<4x8x8xf32>
      %122 = arith.truncf %121 : vector<4x8x8xf32> to vector<4x8x8xbf16>
      %c0_62 = arith.constant 0 : index
      %c0_63 = arith.constant 0 : index
      %c0_64 = arith.constant 0 : index
      %123 = vector.load %arg14[%c0_62, %c0_63, %c0_64] : memref<4x8x8xbf16, #tpu.memory_space<vmem>>, vector<4x8x8xbf16>
      tpu.vector_store %arg14[%c0_62, %c0_63, %c0_64], %122 {strides = array<i32>} : memref<4x8x8xbf16, #tpu.memory_space<vmem>>, vector<4x8x8xbf16>,
    } else {
    }
    %5 = arith.truncf %1 : vector<8x32xf32> to vector<8x32xbf16>
    %c0_3 = arith.constant 0 : index
    %c0_4 = arith.constant 0 : index
    %6 = vector.load %arg4[%c0_3, %c0_4] : memref<32x32xbf16, #tpu.memory_space<vmem>>, vector<32x32xbf16>
    %cst = arith.constant dense<0.000000e+00> : vector<8x32xf32>
    %7 = tpu.matmul %5, %6, %cst {dimension_numbers = #tpu.dot_dimension_numbers<[1], [0], [0], [1], [0, 0, 1, 1], [], []>} : vector<8x32xbf16>, vector<32x32xbf16>, vector<8x32xf32> -> vector<8x32xf32>
    %c0_5 = arith.constant 0 : index
    %c0_6 = arith.constant 0 : index
    %8 = vector.load %arg10[%c0_5, %c0_6] : memref<9x32xf32, #tpu.memory_space<vmem>>, vector<1x32xf32>
    %9 = vector.broadcast %8 : vector<1x32xf32> to vector<8x32xf32>
    %10 = arith.addf %7, %9 : vector<8x32xf32>
    %11 = vector.shape_cast %10 : vector<8x32xf32> to vector<8x4x8xf32>
    %12 = tpu.transpose %11, [1, 0, 2] : vector<8x4x8xf32> -> vector<4x8x8xf32>
    %13 = arith.truncf %12 : vector<4x8x8xf32> to vector<4x8x8xbf16>
    %c0_7 = arith.constant 0 : index
    %c0_8 = arith.constant 0 : index
    %c0_9 = arith.constant 0 : index
    %14 = vector.load %arg13[%c0_7, %c0_8, %c0_9] : memref<4x8x8xbf16, #tpu.memory_space<vmem>>, vector<4x8x8xbf16>
    %c0_10 = arith.constant 0 : index
    %c0_11 = arith.constant 0 : index
    %c0_12 = arith.constant 0 : index
    %15 = vector.load %arg14[%c0_10, %c0_11, %c0_12] : memref<4x8x8xbf16, #tpu.memory_space<vmem>>, vector<4x8x8xbf16>
    "tpu.trace_start"() <{level = 10 : i32, message = "hqd,hkd->hqk"}> : () -> ()
    %cst_13 = arith.constant dense<0.000000e+00> : vector<4x8x8xf32>
    %16 = tpu.matmul %13, %14, %cst_13 {dimension_numbers = #tpu.dot_dimension_numbers<[2], [2], [1], [1], [0, 0, 0, 1, 1, 1], [0], [0]>} : vector<4x8x8xbf16>, vector<4x8x8xbf16>, vector<4x8x8xf32> -> vector<4x8x8xf32>
    "tpu.trace_stop"() : () -> ()
    %cst_14 = arith.constant dense<0xFF800000> : vector<4x8xf32>
    %17 = vector.multi_reduction <maximumf>, %16, %cst_14 [2] : vector<4x8x8xf32> to vector<4x8xf32>
    %18 = vector.shape_cast %17 : vector<4x8xf32> to vector<4x8x1xf32>
    %19 = vector.broadcast %18 : vector<4x8x1xf32> to vector<4x8x8xf32>
    %20 = arith.subf %16, %19 : vector<4x8x8xf32>
    %21 = math.exp %20 : vector<4x8x8xf32>
    %cst_15 = arith.constant dense<0.000000e+00> : vector<4x8xf32>
    %22 = vector.multi_reduction <add>, %21, %cst_15 [2] : vector<4x8x8xf32> to vector<4x8xf32>
    %23 = vector.shape_cast %22 : vector<4x8xf32> to vector<4x8x1xf32>
    %24 = tpu.reciprocal %23 {approx = true} : vector<4x8x1xf32> -> vector<4x8x1xf32>
    %25 = arith.truncf %21 : vector<4x8x8xf32> to vector<4x8x8xbf16>
    "tpu.trace_start"() <{level = 10 : i32, message = "hqk,hkd->hqd"}> : () -> ()
    %cst_16 = arith.constant dense<0.000000e+00> : vector<4x8x8xf32>
    %26 = tpu.matmul %25, %15, %cst_16 {dimension_numbers = #tpu.dot_dimension_numbers<[2], [1], [1], [2], [0, 0, 0, 1, 1, 2], [0], [0]>} : vector<4x8x8xbf16>, vector<4x8x8xbf16>, vector<4x8x8xf32> -> vector<4x8x8xf32>
    "tpu.trace_stop"() : () -> ()
    %27 = vector.broadcast %24 : vector<4x8x1xf32> to vector<4x8x8xf32>
    %28 = arith.mulf %26, %27 : vector<4x8x8xf32>
    %29 = tpu.transpose %28, [1, 0, 2] : vector<4x8x8xf32> -> vector<8x4x8xf32>
    %30 = vector.shape_cast %29 : vector<8x4x8xf32> to vector<8x32xf32>
    %31 = arith.truncf %30 : vector<8x32xf32> to vector<8x32xbf16>
    %c0_17 = arith.constant 0 : index
    %c0_18 = arith.constant 0 : index
    %32 = vector.load %arg7[%c0_17, %c0_18] : memref<32x32xbf16, #tpu.memory_space<vmem>>, vector<32x32xbf16>
    %cst_19 = arith.constant dense<0.000000e+00> : vector<8x32xf32>
    %33 = tpu.matmul %31, %32, %cst_19 {dimension_numbers = #tpu.dot_dimension_numbers<[1], [0], [0], [1], [0, 0, 1, 1], [], []>} : vector<8x32xbf16>, vector<32x32xbf16>, vector<8x32xf32> -> vector<8x32xf32>
    %c3 = arith.constant 3 : index
    %c0_20 = arith.constant 0 : index
    %34 = vector.load %arg10[%c3, %c0_20] : memref<9x32xf32, #tpu.memory_space<vmem>>, vector<1x32xf32>
    %35 = vector.broadcast %34 : vector<1x32xf32> to vector<8x32xf32>
    %36 = arith.addf %33, %35 : vector<8x32xf32>
    %37 = arith.addf %1, %36 : vector<8x32xf32>
    %cst_21 = arith.constant dense<0.000000e+00> : vector<8xf32>
    %38 = vector.multi_reduction <add>, %37, %cst_21 [1] : vector<8x32xf32> to vector<8xf32>
    %39 = vector.shape_cast %38 : vector<8xf32> to vector<8x1xf32>
    %cst_22 = arith.constant 3.200000e+01 : f32
    %40 = vector.broadcast %cst_22 : f32 to vector<8x1xf32>
    %41 = arith.divf %39, %40 : vector<8x1xf32>
    %42 = vector.broadcast %41 : vector<8x1xf32> to vector<8x32xf32>
    %43 = arith.subf %37, %42 : vector<8x32xf32>
    %44 = arith.mulf %43, %43 : vector<8x32xf32>
    %cst_23 = arith.constant dense<0.000000e+00> : vector<8xf32>
    %45 = vector.multi_reduction <add>, %44, %cst_23 [1] : vector<8x32xf32> to vector<8xf32>
    %46 = vector.shape_cast %45 : vector<8xf32> to vector<8x1xf32>
    %cst_24 = arith.constant 3.200000e+01 : f32
    %47 = vector.broadcast %cst_24 : f32 to vector<8x1xf32>
    %48 = arith.divf %46, %47 : vector<8x1xf32>
    %49 = vector.broadcast %41 : vector<8x1xf32> to vector<8x32xf32>
    %50 = arith.subf %37, %49 : vector<8x32xf32>
    %cst_25 = arith.constant 9.99999974E-6 : f32
    %51 = vector.broadcast %cst_25 : f32 to vector<8x1xf32>
    %52 = arith.addf %48, %51 : vector<8x1xf32>
    %53 = math.rsqrt %52 : vector<8x1xf32>
    %54 = vector.broadcast %53 : vector<8x1xf32> to vector<8x32xf32>
    %55 = arith.mulf %50, %54 : vector<8x32xf32>
    %c4 = arith.constant 4 : index
    %c0_26 = arith.constant 0 : index
    %56 = vector.load %arg10[%c4, %c0_26] : memref<9x32xf32, #tpu.memory_space<vmem>>, vector<1x32xf32>
    %57 = vector.broadcast %56 : vector<1x32xf32> to vector<8x32xf32>
    %58 = arith.mulf %55, %57 : vector<8x32xf32>
    %c5 = arith.constant 5 : index
    %c0_27 = arith.constant 0 : index
    %59 = vector.load %arg10[%c5, %c0_27] : memref<9x32xf32, #tpu.memory_space<vmem>>, vector<1x32xf32>
    %60 = vector.broadcast %59 : vector<1x32xf32> to vector<8x32xf32>
    %61 = arith.addf %58, %60 : vector<8x32xf32>
    %62 = arith.truncf %61 : vector<8x32xf32> to vector<8x32xbf16>
    %c0_28 = arith.constant 0 : index
    %c0_29 = arith.constant 0 : index
    %63 = vector.load %arg8[%c0_28, %c0_29] : memref<32x64xbf16, #tpu.memory_space<vmem>>, vector<32x64xbf16>
    %cst_30 = arith.constant dense<0.000000e+00> : vector<8x64xf32>
    %64 = tpu.matmul %62, %63, %cst_30 {dimension_numbers = #tpu.dot_dimension_numbers<[1], [0], [0], [1], [0, 0, 1, 1], [], []>} : vector<8x32xbf16>, vector<32x64xbf16>, vector<8x64xf32> -> vector<8x64xf32>
    %c0_31 = arith.constant 0 : index
    %c0_32 = arith.constant 0 : index
    %65 = vector.load %arg11[%c0_31, %c0_32] : memref<1x64xf32, #tpu.memory_space<vmem>>, vector<1x64xf32>
    %66 = vector.broadcast %65 : vector<1x64xf32> to vector<8x64xf32>
    %67 = arith.addf %64, %66 : vector<8x64xf32>
    %cst_33 = arith.constant 0.000000e+00 : f32
    %68 = vector.broadcast %cst_33 : f32 to vector<8x64xf32>
    %69 = arith.maximumf %67, %68 : vector<8x64xf32>
    %70 = arith.truncf %69 : vector<8x64xf32> to vector<8x64xbf16>
    %c0_34 = arith.constant 0 : index
    %c0_35 = arith.constant 0 : index
    %71 = vector.load %arg9[%c0_34, %c0_35] : memref<64x32xbf16, #tpu.memory_space<vmem>>, vector<64x32xbf16>
    %cst_36 = arith.constant dense<0.000000e+00> : vector<8x32xf32>
    %72 = tpu.matmul %70, %71, %cst_36 {dimension_numbers = #tpu.dot_dimension_numbers<[1], [0], [0], [1], [0, 0, 1, 1], [], []>} : vector<8x64xbf16>, vector<64x32xbf16>, vector<8x32xf32> -> vector<8x32xf32>
    %c8 = arith.constant 8 : index
    %c0_37 = arith.constant 0 : index
    %73 = vector.load %arg10[%c8, %c0_37] : memref<9x32xf32, #tpu.memory_space<vmem>>, vector<1x32xf32>
    %74 = vector.broadcast %73 : vector<1x32xf32> to vector<8x32xf32>
    %75 = arith.addf %72, %74 : vector<8x32xf32>
    %76 = arith.addf %61, %75 : vector<8x32xf32>
    %cst_38 = arith.constant dense<0.000000e+00> : vector<8xf32>
    %77 = vector.multi_reduction <add>, %76, %cst_38 [1] : vector<8x32xf32> to vector<8xf32>
    %78 = vector.shape_cast %77 : vector<8xf32> to vector<8x1xf32>
    %cst_39 = arith.constant 3.200000e+01 : f32
    %79 = vector.broadcast %cst_39 : f32 to vector<8x1xf32>
    %80 = arith.divf %78, %79 : vector<8x1xf32>
    %81 = vector.broadcast %80 : vector<8x1xf32> to vector<8x32xf32>
    %82 = arith.subf %76, %81 : vector<8x32xf32>
    %83 = arith.mulf %82, %82 : vector<8x32xf32>
    %cst_40 = arith.constant dense<0.000000e+00> : vector<8xf32>
    %84 = vector.multi_reduction <add>, %83, %cst_40 [1] : vector<8x32xf32> to vector<8xf32>
    %85 = vector.shape_cast %84 : vector<8xf32> to vector<8x1xf32>
    %cst_41 = arith.constant 3.200000e+01 : f32
    %86 = vector.broadcast %cst_41 : f32 to vector<8x1xf32>
    %87 = arith.divf %85, %86 : vector<8x1xf32>
    %88 = vector.broadcast %80 : vector<8x1xf32> to vector<8x32xf32>
    %89 = arith.subf %76, %88 : vector<8x32xf32>
    %cst_42 = arith.constant 9.99999974E-6 : f32
    %90 = vector.broadcast %cst_42 : f32 to vector<8x1xf32>
    %91 = arith.addf %87, %90 : vector<8x1xf32>
    %92 = math.rsqrt %91 : vector<8x1xf32>
    %93 = vector.broadcast %92 : vector<8x1xf32> to vector<8x32xf32>
    %94 = arith.mulf %89, %93 : vector<8x32xf32>
    %c6 = arith.constant 6 : index
    %c0_43 = arith.constant 0 : index
    %95 = vector.load %arg10[%c6, %c0_43] : memref<9x32xf32, #tpu.memory_space<vmem>>, vector<1x32xf32>
    %96 = vector.broadcast %95 : vector<1x32xf32> to vector<8x32xf32>
    %97 = arith.mulf %94, %96 : vector<8x32xf32>
    %c7 = arith.constant 7 : index
    %c0_44 = arith.constant 0 : index
    %98 = vector.load %arg10[%c7, %c0_44] : memref<9x32xf32, #tpu.memory_space<vmem>>, vector<1x32xf32>
    %99 = vector.broadcast %98 : vector<1x32xf32> to vector<8x32xf32>
    %100 = arith.addf %97, %99 : vector<8x32xf32>
    %c0_45 = arith.constant 0 : index
    %c0_46 = arith.constant 0 : index
    %c0_47 = arith.constant 0 : index
    %101 = vector.load %arg12[%c0_45, %c0_46, %c0_47] : memref<1x8x32xf32, #tpu.memory_space<vmem>>, vector<1x8x32xf32>
    %102 = vector.shape_cast %101 : vector<1x8x32xf32> to vector<8x32xf32>
    %103 = vector.shape_cast %100 : vector<8x32xf32> to vector<1x8x32xf32>
    tpu.vector_store %arg12[%c0_45, %c0_46, %c0_47], %103 {strides = array<i32>} : memref<1x8x32xf32, #tpu.memory_space<vmem>>, vector<1x8x32xf32>,
    return
  }
  func.func @transform_0(%arg0: i32, %arg1: i32) -> (i32, i32, i32) {
    %c0_i32 = arith.constant 0 : i32
    %c0_i32_0 = arith.constant 0 : i32
    return %arg0, %arg1, %c0_i32 : i32, i32, i32
  }
  func.func @transform_1(%arg0: i32, %arg1: i32) -> (i32, i32, i32) {
    %c0_i32 = arith.constant 0 : i32
    %c0_i32_0 = arith.constant 0 : i32
    %c0_i32_1 = arith.constant 0 : i32
    return %arg0, %c0_i32, %c0_i32_0 : i32, i32, i32
  }
  func.func @transform_2(%arg0: i32, %arg1: i32) -> (i32, i32) {
    %c0_i32 = arith.constant 0 : i32
    %c0_i32_0 = arith.constant 0 : i32
    %c0_i32_1 = arith.constant 0 : i32
    return %c0_i32, %c0_i32_0 : i32, i32
  }
  func.func @transform_3(%arg0: i32, %arg1: i32) -> (i32, i32) {
    %c0_i32 = arith.constant 0 : i32
    %c0_i32_0 = arith.constant 0 : i32
    %c0_i32_1 = arith.constant 0 : i32
    return %c0_i32, %c0_i32_0 : i32, i32
  }
  func.func @transform_4(%arg0: i32, %arg1: i32) -> (i32, i32) {
    %c0_i32 = arith.constant 0 : i32
    %c0_i32_0 = arith.constant 0 : i32
    %c0_i32_1 = arith.constant 0 : i32
    return %c0_i32, %c0_i32_0 : i32, i32
  }
  func.func @transform_5(%arg0: i32, %arg1: i32) -> (i32, i32) {
    %c0_i32 = arith.constant 0 : i32
    %c0_i32_0 = arith.constant 0 : i32
    %c0_i32_1 = arith.constant 0 : i32
    return %c0_i32, %c0_i32_0 : i32, i32
  }
  func.func @transform_6(%arg0: i32, %arg1: i32) -> (i32, i32) {
    %c0_i32 = arith.constant 0 : i32
    %c0_i32_0 = arith.constant 0 : i32
    %c0_i32_1 = arith.constant 0 : i32
    return %c0_i32, %c0_i32_0 : i32, i32
  }
  func.func @transform_7(%arg0: i32, %arg1: i32) -> (i32, i32) {
    %c0_i32 = arith.constant 0 : i32
    %c0_i32_0 = arith.constant 0 : i32
    %c0_i32_1 = arith.constant 0 : i32
    return %c0_i32, %c0_i32_0 : i32, i32
  }
  func.func @transform_8(%arg0: i32, %arg1: i32) -> (i32, i32) {
    %c0_i32 = arith.constant 0 : i32
    %c0_i32_0 = arith.constant 0 : i32
    %c0_i32_1 = arith.constant 0 : i32
    return %c0_i32, %c0_i32_0 : i32, i32
  }
  func.func @transform_9(%arg0: i32, %arg1: i32) -> (i32, i32) {
    %c0_i32 = arith.constant 0 : i32
    %c0_i32_0 = arith.constant 0 : i32
    %c0_i32_1 = arith.constant 0 : i32
    return %c0_i32, %c0_i32_0 : i32, i32
  }
  func.func @transform_10(%arg0: i32, %arg1: i32) -> (i32, i32, i32) {
    %c0_i32 = arith.constant 0 : i32
    %c0_i32_0 = arith.constant 0 : i32
    return %arg0, %arg1, %c0_i32 : i32, i32, i32
  }
}

</mosaic_0001>

<bundles_post_ra>
// kernel: tpu_custom_call.1
= control target key start
LH: loop header
LB: loop body
LE: loop exit
PB: predicated region body
PF: predicated region fallthrough
CT: control target
= control target key end

     0   :  { %s3309_s0 = inlined_call_operand.vmem [shape: f32[2,8,32], index: 0, kind: input, shape index: {}]   ;;  %s3310_s1 = inlined_call_operand.hbm [shape: bf16[2,8,32], index: 1, kind: input, shape index: {}]   ;;  %s3311_s2 = inlined_call_operand.vmem [shape: bf16[32,32], index: 2, kind: input, shape index: {}]   ;;  %s3312_s3 = inlined_call_operand.vmem [shape: bf16[32,32], index: 3, kind: input, shape index: {}]   ;;  %s3313_s4 = inlined_call_operand.hbm [shape: bf16[32,32], index: 4, kind: input, shape index: {}]   ;;  %s3314_s5 = inlined_call_operand.hbm [shape: bf16[32,32], index: 5, kind: input, shape index: {}]   ;;  %s3315_s6 = inlined_call_operand.hbm [shape: bf16[32,64], index: 6, kind: input, shape index: {}]   ;;  %s3316_s7 = inlined_call_operand.vmem [shape: bf16[64,32], index: 7, kind: input, shape index: {}]   ;;  %s3317_s8 = inlined_call_operand.hbm [shape: f32[9,32], index: 8, kind: input, shape index: {}]   ;;  %s3318_s9 = inlined_call_operand.vmem [shape: f32[1,64], index: 9, kind: input, shape index: {}]   ;;  %s3319_s10 = inlined_call_operand.hbm [shape: f32[2,8,32], index: 10, kind: output, shape index: {}]  }
   0x1   :  { %3327 = sst [smem:[#allocation18_spill]] %s3309_s0 }
   0x2   :  { %3328 = sst [smem:[#allocation19_spill]] %s3313_s4 }
   0x3   :  { %3329 = sst [smem:[#allocation20_spill]] %s3316_s7 }
   0x4   :  { %3330 = sst [smem:[#allocation21_spill]] %s3318_s9 }
   0x5   :  { %3331 = sst [smem:[#allocation22_spill]] %s3319_s10 }
   0x6   :  { %15 = vsyncpa [#allocation5], 0 }
   0x7   :  { %17 = vsyncpa [#allocation5 + $0x1], 0 }
   0x8   :  { %18 = vsyncpa [#allocation8], 0 }
   0x9   :  { %19 = vsyncpa [#allocation11], 0 }
   0xa   :  { %20 = vsyncpa [#allocation6], 0 }
   0xb   :  { %22 = vsyncpa [#allocation6 + $0x1], 0  ;;  %s2792_s13 = smov 0   ;;  %s2794_s14 = smov 0  }
   0xc   :  { %s2796_s15 = smov 0   ;;  %s2798_s16 = smov 0  }
   0xd   :  { %s2800_s17 = smov 0   ;;  %s2802_s18 = smov 0  }
   0xe LB: > { %s3320_s19 = sadd.s32 4294967295, %s2715_s18   ;;  %p2130_p0 = scmp.ge.s32.totalorder %s2715_s18, 1  ;;  %s2715_s18 = sphi %s2802_s18, %s28_s18   ;;  %s2711_s17 = sphi %s2800_s17, %s3357_s17   ;;  %s2707_s16 = sphi %s2798_s16, %s3356_s16   ;;  %s2703_s15 = sphi %s2796_s15, %s3355_s15   ;;  %s2699_s14 = sphi %s2794_s14, %s3354_s14   ;;  %s2695_s13 = sphi %s2792_s13, %s3353_s13  }
   0xf   : > { %p2826_p1 = scmp.eq.s32.totalorder %s3320_s19, 0  ;;  %p295_p2 = scmp.lt.s32.totalorder %s2715_s18, 3 }
  0x10   : > { %s2717_s22 = smov [#allocation7]   ;;  %s2718_s25 = smov [#allocation10]  }
  0x11   : > { %s3332_s20 = scalar_select %p2826_p1, 1, 0 }
  0x12   : > { %p2831_p3 = pnand %p2130_p0, %p295_p2  ;;  %s313_s23 = sshll.u32 %s2717_s22, 4  ;;  %s2835_s23 = int_to_ptr.vmem [resolvable:$true] %s313_s23 }
  0x13   : > { %s339_s26 = sshll.u32 %s2718_s25, 4  ;;  %s2719_s27 = smov [#allocation9]   ;;  %s2846_s26 = int_to_ptr.vmem [resolvable:$true] %s339_s26 }
  0x14   : > { %s3333_s21 = scalar_select %p2831_p3, 1, 0 }
  0x15   : > { %p2352_p4 = pneg %p2831_p3  ;;  %s2848_s28 = sshll.u32 %s2719_s27, 4  ;;  %s327_s28 = int_to_ptr.vmem [resolvable:$true] %s2848_s28 }
  0x16   : > { %s3335_s4 = sld [smem:[#allocation19_spill]] }
  0x17   : > { %p2842_p6 = pnand %p2352_p4, %p2826_p1 }
  0x19   : > { %p2858_p8 = pneg %p2842_p6 }
  0x1c   : > { %s2483_s11 = scalar_lea.hbm %s3335_s4, 256 }
  0x1d   : > { %p2484_p7 = scmp.ne.s32.totalorder %s3335_s4, %s2483_s11  ;;  %p2490_p11 = scmp.lt.u32.totalorder %s2483_s11, %s3335_s4 }
  0x1f   : > { %p2486_p9 = pnand %p2858_p8, %p2484_p7 }
  0x21   : > { %p2487_p10 = pneg %p2486_p9 }
  0x23   : > { %p2492_p12 = pnand %p2490_p11, %p2487_p10 }
  0x25   : > { %2495 = shalt.err (!%p2492_p12)
}
  0x26   : > { %s2496_s29 = scalar_lea.vmem %s2835_s23, 256  ;;  %p2504_p4 = scmp.lt.s32.totalorder %s2835_s23, %s2835_s23 }
  0x27   : > { %p2497_p13 = scmp.ne.s32.totalorder %s2835_s23, %s2496_s29  ;;  %p2505_p5 = scmp.lt.s32.totalorder %s2496_s29, %s2496_s29 }
  0x29   : > { %p2499_p0 = pnand %p2497_p13, %p2858_p8  ;;  %p2506_p7 = por %p2505_p5, %p2504_p4 }
  0x2b   : > { %p2500_p2 = pneg %p2499_p0 }
  0x2d   : > { %p2507_p9 = pnand %p2506_p7, %p2500_p2 }
  0x2f   : > { %2510 = shalt.err (!%p2507_p9)
}
  0x30   : > { %s2720_s30 = smov 64   ;;  %s2721_s11 = smov 4  }
  0x31   : > { %2355 = dma.hbm_to_vmem [thread:$0]  (!%p2842_p6), %s3335_s4, 256, %s2835_s23, [#allocation8], %s2720_s30, %s2720_s30, %s2721_s11  }
  0x32   : > { %s2511_s29 = scalar_lea.hbm %s3315_s6, 256 }
  0x33   : > { %p2512_p5 = scmp.ne.s32.totalorder %s3315_s6, %s2511_s29  ;;  %p2518_p12 = scmp.lt.u32.totalorder %s2511_s29, %s3315_s6 }
  0x35   : > { %p2514_p10 = pnand %p2512_p5, %p2858_p8 }
  0x37   : > { %p2515_p11 = pneg %p2514_p10 }
  0x39   : > { %p2520_p13 = pnand %p2518_p12, %p2515_p11 }
  0x3b   : > { %2523 = shalt.err (!%p2520_p13)
}
  0x3c   : > { %s2524_s23 = scalar_lea.vmem %s2846_s26, 256  ;;  %p2532_p7 = scmp.lt.s32.totalorder %s2846_s26, %s2846_s26 }
  0x3d   : > { %p2525_p0 = scmp.ne.s32.totalorder %s2846_s26, %s2524_s23  ;;  %p2533_p9 = scmp.lt.s32.totalorder %s2524_s23, %s2524_s23 }
  0x3f   : > { %p2527_p2 = pnand %p2525_p0, %p2858_p8  ;;  %p2534_p5 = por %p2533_p9, %p2532_p7 }
  0x41   : > { %p2528_p4 = pneg %p2527_p2 }
  0x43   : > { %p2535_p10 = pnand %p2534_p5, %p2528_p4 }
  0x45   : > { %2538 = shalt.err (!%p2535_p10)
}
  0x46   : > { %2361 = dma.hbm_to_vmem [thread:$0]  (!%p2842_p6), %s3315_s6, 256, %s2846_s26, [#allocation11], %s2720_s30, %s2720_s30, %s2721_s11  }
  0x47   : > { %s2539_s12 = scalar_lea.hbm %s3314_s5, 256 }
  0x48   : > { %p2540_p11 = scmp.ne.s32.totalorder %s3314_s5, %s2539_s12  ;;  %p2546_p0 = scmp.lt.u32.totalorder %s2539_s12, %s3314_s5 }
  0x4a   : > { %p2542_p12 = pnand %p2540_p11, %p2858_p8 }
  0x4c   : > { %p2543_p13 = pneg %p2542_p12 }
  0x4e   : > { %p2548_p2 = pnand %p2546_p0, %p2543_p13 }
  0x50   : > { %2551 = shalt.err (!%p2548_p2)
}
  0x51   : > { %s2552_s23 = scalar_lea.vmem %s327_s28, 256  ;;  %p2560_p5 = scmp.lt.s32.totalorder %s327_s28, %s327_s28 }
  0x52   : > { %p2553_p4 = scmp.ne.s32.totalorder %s327_s28, %s2552_s23  ;;  %p2561_p10 = scmp.lt.s32.totalorder %s2552_s23, %s2552_s23 }
  0x54   : > { %p2555_p7 = pnand %p2553_p4, %p2858_p8  ;;  %p2562_p3 = por %p2561_p10, %p2560_p5 }
  0x56   : > { %p2556_p9 = pneg %p2555_p7 }
  0x58   : > { %p2563_p1 = pnand %p2562_p3, %p2556_p9 }
  0x5a   : > { %2566 = shalt.err (!%p2563_p1)
}
  0x5b   : > { %2358 = dma.hbm_to_vmem [thread:$0]  (!%p2842_p6), %s3314_s5, 256, %s327_s28, [#allocation8], %s2720_s30, %s2720_s30, %s2721_s11  }
  0x5c   : > { %s2722_s7 = smov [#allocation12]   ;;  %s2567_s22 = scalar_lea.hbm %s3317_s8, 256 }
  0x5d   : > { %s355_s9 = sshll.u32 %s2722_s7, 4  ;;  %p2568_p1 = scmp.ne.s32.totalorder %s3317_s8, %s2567_s22  ;;  %s356_s9 = int_to_ptr.vmem [resolvable:$true] %s355_s9 }
  0x5e   : > { %p2574_p12 = scmp.lt.u32.totalorder %s2567_s22, %s3317_s8 }
  0x5f   : > { %p2570_p3 = pnand %p2568_p1, %p2858_p8 }
  0x61   : > { %p2571_p11 = pneg %p2570_p3 }
  0x63   : > { %p2576_p13 = pnand %p2574_p12, %p2571_p11 }
  0x65   : > { %2579 = shalt.err (!%p2576_p13)
}
  0x66   : > { %s2580_s28 = scalar_lea.vmem %s356_s9, 256  ;;  %p2588_p7 = scmp.lt.s32.totalorder %s356_s9, %s356_s9 }
  0x67   : > { %p2581_p0 = scmp.ne.s32.totalorder %s356_s9, %s2580_s28  ;;  %p2589_p9 = scmp.lt.s32.totalorder %s2580_s28, %s2580_s28 }
  0x69   : > { %p2583_p2 = pnand %p2581_p0, %p2858_p8  ;;  %p2590_p5 = por %p2589_p9, %p2588_p7 }
  0x6b   : > { %p2584_p4 = pneg %p2583_p2 }
  0x6d   : > { %p2591_p10 = pnand %p2590_p5, %p2584_p4 }
  0x6f   : > { %2594 = shalt.err (!%p2591_p10)
}
  0x70   : > { %s2723_s30 = smov 128   ;;  %s2724_s19 = smov 8  }
  0x71   : > { %2364 = dma.hbm_to_vmem [thread:$0]  (!%p2842_p6), %s3317_s8, 256, %s356_s9, [#allocation11], %s2723_s30, %s2723_s30, %s2724_s19  }
  0x72   : > { %s2129_s0 = sadd.s32 4294967294, %s2715_s18   ;;  %s40_s7 = sadd.s32 1, %s2711_s17 }
  0x73   : > { %p42_p8 = scmp.ge.s32.totalorder %s40_s7, 2  ;;  %s75_s10 = sadd.s32 1, %s2703_s15 }
  0x74   : > { %p82_p1 = scmp.ne.s32.totalorder %s2703_s15, %s2699_s14  ;;  %p83_p3 = scmp.eq.s32.totalorder %s2715_s18, 0 }
  0x75   : > { %s3359_s7 = smov (%p42_p8, %s40_s7), 0  ;;  %p88_p12 = scmp.ne.s32.totalorder %s2699_s14, %s2695_s13 }
  0x76   : > { %p2956_p11 = por %p83_p3, %p82_p1  ;;  %s72_s24 = ssub.s32 %s2711_s17, %s3359_s7 }
  0x77   : > { %s3338_s9 = sadd.s32 4294967295, %s2715_s18   ;;  %p73_p13 = scmp.eq.s32.totalorder %s72_s24, 0 }
  0x78   : > { %p282_p6 = scmp.eq.s32.totalorder %s3338_s9, 1  ;;  %p3339_p0 = scmp.ne.s32.totalorder %s3332_s20, 0 }
  0x79   : > { %p288_p7 = scmp.eq.s32.totalorder %s2129_s0, 1  ;;  %p2377_p5 = scmp.lt.s32.totalorder %s2715_s18, 2 }
  0x7a   : > { %p2968_p2 = por %p3339_p0, %p88_p12  ;;  %p2972_p4 = por %p282_p6, %p82_p1 }
  0x7b   : > { %s2977_s27 = scalar_select %p73_p13, %s2703_s15, %s75_s10  }
  0x7c   : > { %s3341_s25 = scalar_select %p2972_p4, 1, 0 }
  0x7d   : > { %p2979_p9 = por %p288_p7, %p88_p12  ;;  %s382_s23 = sand.u32 1, %s2703_s15  }
  0x7e   : > { %s2137_s28 = sshll.u32 %s2711_s17, 6  ;;  %s2136_s30 = sshll.u32 %s382_s23, 2 }
  0x7f   : > { %s3342_s29 = scalar_select %p2979_p9, 1, 0 }
  0x80   : > { %s2989_s26 = scalar_lea.hbm %s3310_s1, %s2137_s28  ;;  %s386_s0 = scalar_lea.vmem [#allocation4], %s2136_s30 }
  0x81   : > { %s393_s10 = sshll.u32 %s386_s0, 4  ;;  %p2993_p10 = pnand %p2377_p5, %p2956_p11  ;;  %s2997_s10 = int_to_ptr.vmem [resolvable:$true] %s393_s10 }
  0x82   : > { %s383_s9 = scalar_lea.sflag [#allocation5], %s382_s23  ;;  %s2595_s4 = scalar_lea.hbm %s2989_s26, 64 }
  0x83   : > { %p2596_p8 = scmp.ne.s32.totalorder %s2989_s26, %s2595_s4  ;;  %p2597_p1 = pneg %p2993_p10 }
  0x84   : > { %s2600_s12 = scalar_lea.hbm %s3310_s1, 128  ;;  %p2601_p11 = scmp.lt.u32.totalorder %s2989_s26, %s3310_s1 }
  0x85   : > { %p2598_p3 = pnand %p2597_p1, %p2596_p8  ;;  %p2602_p6 = scmp.lt.u32.totalorder %s2600_s12, %s2595_s4 }
  0x86   : > { %p2604_p0 = scmp.lt.u32.totalorder %s2595_s4, %s2989_s26 }
  0x87   : > { %p2599_p12 = pneg %p2598_p3  ;;  %p2603_p13 = por %p2602_p6, %p2601_p11 }
  0x89   : > { %p2605_p7 = por %p2604_p0, %p2603_p13 }
  0x8b   : > { %p2606_p5 = pnand %p2605_p7, %p2599_p12 }
  0x8d   : > { %2609 = shalt.err (!%p2606_p5)
}
  0x8e   : > { %s2610_s23 = scalar_lea.vmem %s2997_s10, 64  ;;  %s2725_s0 = smov [#allocation4]  }
  0x8f   : > { %p2611_p8 = scmp.ne.s32.totalorder %s2997_s10, %s2610_s23  ;;  %s2615_s28 = sshll.u32 %s2725_s0, 4  ;;  %s2616_s28 = int_to_ptr.vmem [resolvable:$false] %s2615_s28 }
  0x90   : > { %s2617_s30 = scalar_lea.vmem %s2616_s28, 128  ;;  %p2618_p4 = scmp.lt.s32.totalorder %s2997_s10, %s2616_s28 }
  0x91   : > { %p2613_p3 = pnand %p2611_p8, %p2597_p1  ;;  %p2619_p11 = scmp.lt.s32.totalorder %s2617_s30, %s2610_s23 }
  0x93   : > { %p2614_p9 = pneg %p2613_p3  ;;  %p2620_p6 = por %p2619_p11, %p2618_p4 }
  0x95   : > { %p2621_p13 = pnand %p2620_p6, %p2614_p9 }
  0x97   : > { %2624 = shalt.err (!%p2621_p13)
}
  0x98   : > { %2368 = dma.hbm_to_vmem [thread:$0]  (!%p2993_p10), %s2989_s26, 64, %s2997_s10, %s383_s9  }
  0x99   : > { %p3344_p12 = scmp.ne.s32.totalorder %s3333_s21, 0 }
  0x9a   : > { %s3027_s4 = sand.u32 (!%p3344_p12), 1, %s2699_s14  }
  0x9b   : > { %402 = sbr.rel (%p3344_p12) target bundleno = 2574 (0xa0e), region = 60  ;;  %s2139_s12 = sshll.u32 (!%p3344_p12), %s3027_s4, 2 }
  0x9c   : > { %s405_s19 = scalar_lea.sflag (!%p3344_p12), [#allocation5], %s3027_s4  ;;  %s408_s11 = scalar_lea.vmem (!%p3344_p12), [#allocation4], %s2139_s12 }
  0xa2   : > { %2678 = dma.done.wait (%p2968_p2), %s405_s19, 64  }
  0xa3   : > { %2680 = vsyncadd (%p2968_p2), %s405_s19, 4294967232  ;;  %p3345_p4 = scmp.ne.s32.totalorder %s3332_s20, 0 }
  0xa5   : > { %2682 = dma.done.wait (%p3345_p4), [#allocation8], 512  }
  0xa6   : > { %2684 = vsyncadd (%p3345_p4), [#allocation8], 4294966784 }
  0xa7   : > { %2686 = dma.done.wait (%p3345_p4), [#allocation11], 512  }
  0xa8   : > { %2688 = vsyncadd (%p3345_p4), [#allocation11], 4294966784  ;;  %v2726_v0 = vmov 0.0   ;;  %vm2727_vm0 = vmmov 0   ;;  %p468_p2 = scmp.lt.s32.totalorder %s2707_s16, 1  ;;  %v2449_v1 = vld [vmem:[%s3312_s3] sm:$0xff]   ;;  %v623_v30 = vlaneseq }
  0xa9   : > { %2232 = vmatprep.subr.bf16.mxu0 %v2726_v0  ;;  %2236 = vmatprep.mubr.msk.bf16.mxu0 %vm2727_vm0, %v2726_v0  ;;  %v2450_v2 = vld [vmem:[%s3312_s3 + $0x8] sm:$0xff]   ;;  %v481_v3 = vld [vmem:[%s408_s11] sm:$0xf]  ;;  %vm503_vm1 = vcmask 261120   ;;  %s3346_s30 = sld [smem:[#allocation18_spill]]  ;;  %v2454_v9 = vld [vmem:[#allocation7 + $0x8] sm:$0xff]  }
  0xaa   : > { %2240 = vmatprep.subr.bf16.mxu1 %v2726_v0  ;;  %2244 = vmatprep.mubr.msk.bf16.mxu1 %vm2727_vm0, %v2726_v0  ;;  %s469_s21 = scalar_select %p468_p2, %s2707_s16, 1  ;;  %v2451_v4 = vld [vmem:[%s3311_s2] sm:$0xff]   ;;  %v2453_v5 = vld [vmem:[#allocation7] sm:$0xff]   ;;  %v2146_v10 = vld [vmem:[#allocation12 + $0x1] ss:$0 sm:$0xff]  ;;  %v624_v34 = vshrl.u32 %v623_v30, 7 }
  0xab   : > { %2233 = vmatpush3.bf16.msra.mxu0 %v2449_v1  ;;  %2241 = vmatpush3.bf16.msra.mxu1 %v2453_v5  ;;  %v2452_v6 = vld [vmem:[%s3311_s2 + $0x8] sm:$0xff]   ;;  %s2728_s11 = smov 104   ;;  %v2158_v16 = vld [vmem:[#allocation12] ss:$0 sm:$0xff]  ;;  %s2730_s26 = smov 112   ;;  %vm758_vm2 = vcmask 60416  }
  0xac   : > { %s2145_s24 = sshll.u32 %s469_s21, 3  ;;  %2234 = vmatprep.subr.bf16.mxu0 %v2726_v0  ;;  %2242 = vmatprep.subr.bf16.mxu1 %v2726_v0  ;;  %s2729_s21 = smov 120   ;;  %v2150_v22 = vld [vmem:[#allocation12 + $0x2] ss:$0 sm:$0xff]  ;;  %v2731_v28 = vmov 1983009808  }
  0xad   : > { %v621_v29 = vunpack.c.l.s4 %v2731_v28  ;;  %v2732_v31 = vmov 1934713408   ;;  %vm1141_vm3 = vcmask 64512   ;;  %vm1373_vm4 = vcmask 1043456   ;;  %s2733_s20 = smov 16   ;;  %s2734_s10 = smov 8  }
  0xae   : > { %v653_v32 = vunpack.c.l.s4 %v2732_v31  ;;  %vm1708_vm5 = vcmask 130048   ;;  %vm1710_vm6 = vcmask 195584   ;;  %s3347_s0 = sld [smem:[#allocation20_spill]]  ;;  %vm1910_vm7 = vcmask 523264   ;;  %s1982_s22 = scalar_lea.sflag [#allocation6], %s3027_s4 }
  0xaf   : > { %s474_s12 = scalar_lea.vmem %s3346_s30, %s2145_s24  ;;  %2235 = vmatpush3.bf16.msra.mxu0 %v2450_v2  ;;  %2243 = vmatpush3.bf16.msra.mxu1 %v2454_v9  ;;  %v622_v33 = vunpack.c.0.s8 %v621_v29  ;;  %s2735_s24 = smov 24  }
  0xb0   : > { %2248 = vmatprep.subr.bf16.mxu0 %v2726_v0  ;;  %v3068_v7 = vld [vmem:[%s474_s12] sm:$0xff]  ;;  %2256 = vmatprep.subr.bf16.mxu1 %v2726_v0  ;;  %v654_v37 = vunpack.c.0.s8 %v653_v32  ;;  %s3349_s12 = sld [smem:[#allocation22_spill]]  ;;  %p3350_p10 = scmp.ne.s32.totalorder %s3341_s25, 0 }
  0xb1   : > { %v917_v8 = vpack.c.bf16 %v3068_v7, %v3068_v7  ;;  %v3095_v38 = vsub.s32 %v622_v33, %v624_v34 }
  0xb2   : > { %2237 = vmatmul.mubr.msk.bf16.vlgmr.msra.gmra.mrb[0].mxu0 %vm503_vm1, %v481_v3  ;;  %2245 = vmatmul.mubr.msk.bf16.vlgmr.msra.gmra.mrb[0].mxu1 %vm503_vm1, %v481_v3  ;;  %v3097_v44 = vsub.s32 %v654_v37, %v624_v34 }
  0xb3   : > { %2249 = vmatpush3.bf16.msra.mxu0 %v2451_v4  ;;  %2252 = vmatprep.mubr.msk.bf16.mxu0 %vm2727_vm0, %v2726_v0 }
  0xb4   : > { %2250 = vmatprep.subr.bf16.mxu0 %v2726_v0  ;;  %2258 = vmatprep.mubr.msk.bf16.mxu1 %vm2727_vm0, %v2726_v0 }
  0xb7   : > { %2251 = vmatpush3.bf16.msra.mxu0 %v2452_v6 }
  0xb8   : > { %2262 = vmatprep.subr.bf16.mxu0 %v2726_v0 }
  0xba   : > { %2253 = vmatmul.mubr.msk.bf16.vlgmr.msra.gmra.mrb[4].mxu0 %vm503_vm1, %v917_v8 }
  0xbb   : > { %2264 = vmatprep.mubr.msk.bf16.mxu0 %vm2727_vm0, %v2726_v0 }
 0x185   : > { %v541_v11 = vpop.f32.mrb[0].mxu0  ;;  %v602_v23 = vpop.f32.mrb[0].mxu1 }
 0x186   : > { %v542_v12 = vadd.f32 %v2146_v10, %v541_v11  ;;  %v2238_v13 = vpop.f32.mrb[1].mxu0  ;;  %v3090_v24 = vadd.f32 %v2150_v22, %v602_v23  ;;  %v2246_v25 = vpop.f32.mrb[1].mxu1 }
 0x187   : > { %v544_v14 = vpop.f32.mrb[2].mxu0  ;;  %v605_v26 = vpop.f32.mrb[2].mxu1 }
 0x188   : > { %615 = vrot.lane.b32.xlu1 %v542_v12, %s2728_s11  ;;  %609 = vrot.lane.b32.xlu0 %v542_v12, %s2729_s21  ;;  %v2239_v15 = vpop.f32.mrb[3].mxu0  ;;  %v2247_v27 = vpop.f32.mrb[3].mxu1 }
 0x18c   : > { %612 = vrot.lane.b32.xlu0 %v542_v12, %s2730_s26 }
 0x18d   : > { %v977_v17 = vpop.f32.mrb[4].mxu0 }
 0x18e   : > { %v3085_v18 = vadd.f32 %v2158_v16, %v977_v17  ;;  %v2254_v19 = vpop.f32.mrb[5].mxu0 }
 0x18f   : > { %v980_v20 = vpop.f32.mrb[6].mxu0 }
 0x190   : > { %987 = vrot.lane.b32.xlu0 %v3085_v18, %s2730_s26  ;;  %984 = vrot.lane.b32.xlu1 %v3085_v18, %s2729_s21  ;;  %v2255_v21 = vpop.f32.mrb[7].mxu0 }
 0x194   : > { %990 = vrot.lane.b32.xlu1 %v3085_v18, %s2728_s11  ;;  %764 = vrot.lane.b32.xlu0 %v3090_v24, %s2729_s21 }
 0x198   : > { %767 = vrot.lane.b32.xlu1 %v3090_v24, %s2730_s26  ;;  %770 = vrot.lane.b32.xlu0 %v3090_v24, %s2728_s11 }
 0x1fa   : > { %v616_v35 = vpop.permute.xlu1 %615  ;;  %v610_v36 = vpop.permute.xlu0 %609 }
 0x1fb   : > { %v634_v39 = vcombine.low %v610_v36, %v616_v35  ;;  %v635_v40 = vcombine.high %v610_v36, %v616_v35 }
 0x1fd   : > { %v642_v45 = vrot.slane %v634_v39, %v3095_v38  ;;  %v649_v46 = vrot.slane %v635_v40, %v3095_v38 }
 0x1fe   : > { %v613_v41 = vpop.permute.xlu0 %612 }
 0x1ff   : > { %v618_v42 = vcombine.low %v542_v12, %v613_v41  ;;  %v619_v43 = vcombine.high %v542_v12, %v613_v41 }
 0x201   : > { %v626_v47 = vrot.slane %v618_v42, %v3095_v38  ;;  %v633_v48 = vrot.slane %v619_v43, %v3095_v38 }
 0x202   : > { %v985_v49 = vpop.permute.xlu1 %984  ;;  %v988_v54 = vpop.permute.xlu0 %987 }
 0x203   : > { %v650_v50 = vcombine.low %v626_v47, %v642_v45  ;;  %v651_v51 = vcombine.high %v626_v47, %v642_v45  ;;  %v666_v52 = vcombine.low %v633_v48, %v649_v46  ;;  %v667_v53 = vcombine.high %v633_v48, %v649_v46 }
 0x204   : > { %v993_v59 = vcombine.low %v3085_v18, %v988_v54  ;;  %v994_v60 = vcombine.high %v3085_v18, %v988_v54 }
 0x205   : > { %v658_v55 = vrot.slane %v650_v50, %v3097_v44  ;;  %v665_v56 = vrot.slane %v651_v51, %v3097_v44  ;;  %v674_v57 = vrot.slane %v666_v52, %v3097_v44  ;;  %v681_v58 = vrot.slane %v667_v53, %v3097_v44 }
 0x206   : > { %v991_v61 = vpop.permute.xlu1 %990  ;;  %v1001_v10 = vrot.slane %v993_v59, %v3095_v38  ;;  %v1008_v11 = vrot.slane %v994_v60, %v3095_v38 }
 0x207   : > { %v686_v62 = vcombine.low %v658_v55, %v665_v56  ;;  %v2154_v63 = vcombine.high %v658_v55, %v665_v56  ;;  %v702_v1 = vcombine.low %v674_v57, %v681_v58  ;;  %v2155_v2 = vcombine.high %v674_v57, %v681_v58 }
 0x208   : > { %v1009_v3 = vcombine.low %v985_v49, %v991_v61  ;;  %v1010_v4 = vcombine.high %v985_v49, %v991_v61 }
 0x209   : > { %v693_v5 = vrot.slane %v686_v62, %v3095_v38  ;;  %v701_v6 = vrot.slane %v2154_v63, %v3095_v38  ;;  %v709_v8 = vrot.slane %v702_v1, %v3095_v38  ;;  %v717_v9 = vrot.slane %v2155_v2, %v3095_v38 }
 0x20a   : > { %v1017_v12 = vrot.slane %v1009_v3, %v3095_v38  ;;  %v1024_v13 = vrot.slane %v1010_v4, %v3095_v38 }
 0x20b   : > { %v718_v14 = vcombine.low %v693_v5, %v701_v6  ;;  %v719_v15 = vcombine.high %v693_v5, %v701_v6  ;;  %v734_v16 = vcombine.low %v709_v8, %v717_v9  ;;  %v735_v17 = vcombine.high %v709_v8, %v717_v9 }
 0x20c   : > { %v1025_v18 = vcombine.low %v1001_v10, %v1017_v12  ;;  %v1026_v19 = vcombine.high %v1001_v10, %v1017_v12  ;;  %v1041_v20 = vcombine.low %v1008_v11, %v1024_v13  ;;  %v1042_v21 = vcombine.high %v1008_v11, %v1024_v13  ;;  %v765_v11 = vpop.permute.xlu0 %764  ;;  %v768_v12 = vpop.permute.xlu1 %767 }
 0x20d   : > { %v726_v22 = vrot.slane %v718_v14, %v3097_v44  ;;  %v733_v23 = vrot.slane %v719_v15, %v3097_v44  ;;  %v742_v25 = vrot.slane %v734_v16, %v3097_v44  ;;  %v749_v26 = vrot.slane %v735_v17, %v3097_v44 }
 0x20e   : > { %v1033_v27 = vrot.slane %v1025_v18, %v3097_v44  ;;  %v1040_v28 = vrot.slane %v1026_v19, %v3097_v44  ;;  %v1049_v29 = vrot.slane %v1041_v20, %v3097_v44  ;;  %v1056_v30 = vrot.slane %v1042_v21, %v3097_v44 }
 0x20f   : > { %v750_v31 = vcombine.low %v726_v22, %v742_v25  ;;  %v751_v32 = vcombine.high %v726_v22, %v742_v25  ;;  %v752_v33 = vcombine.low %v733_v23, %v749_v26  ;;  %v753_v34 = vcombine.high %v733_v23, %v749_v26 }
 0x210   : > { %v1061_v35 = vcombine.low %v1033_v27, %v1040_v28  ;;  %v2162_v36 = vcombine.high %v1033_v27, %v1040_v28  ;;  %v1077_v37 = vcombine.low %v1049_v29, %v1056_v30  ;;  %v2163_v39 = vcombine.high %v1049_v29, %v1056_v30  ;;  %v771_v15 = vpop.permute.xlu0 %770 }
 0x211   : > { %v754_v40 = vpack.c.bf16 %v750_v31, %v750_v31  ;;  %v755_v41 = vpack.c.bf16 %v751_v32, %v751_v32  ;;  %v756_v42 = vpack.c.bf16 %v752_v33, %v752_v33  ;;  %v757_v43 = vpack.c.bf16 %v753_v34, %v753_v34 }
 0x212   : > { %v1068_v45 = vrot.slane %v1061_v35, %v3095_v38  ;;  %v1076_v46 = vrot.slane %v2162_v36, %v3095_v38  ;;  %v1084_v47 = vrot.slane %v1077_v37, %v3095_v38  ;;  %v1092_v48 = vrot.slane %v2163_v39, %v3095_v38 }
 0x213   : > { %759 = vst.msk [vmem:[#allocation2] sm:$0xf] %vm758_vm2, %v754_v40  ;;  %760 = vst.msk [vmem:[#allocation2 + $0x4] sm:$0xf] %vm758_vm2, %v755_v41  ;;  %v773_v13 = vcombine.low %v3090_v24, %v768_v12  ;;  %v774_v14 = vcombine.high %v3090_v24, %v768_v12  ;;  %v789_v16 = vcombine.low %v765_v11, %v771_v15 }
 0x214   : > { %761 = vst.msk [vmem:[#allocation2 + $0x8] sm:$0xf] %vm758_vm2, %v756_v42  ;;  %762 = vst.msk [vmem:[#allocation2 + $0xc] sm:$0xf] %vm758_vm2, %v757_v43  ;;  %v1093_v49 = vcombine.low %v1068_v45, %v1076_v46  ;;  %v1109_v50 = vcombine.low %v1084_v47, %v1092_v48  ;;  %v1094_v57 = vcombine.high %v1068_v45, %v1076_v46 }
 0x215   : > { %v1110_v58 = vcombine.high %v1084_v47, %v1092_v48  ;;  %v790_v17 = vcombine.high %v765_v11, %v771_v15  ;;  %v781_v18 = vrot.slane %v773_v13, %v3095_v38  ;;  %v788_v19 = vrot.slane %v774_v14, %v3095_v38 }
 0x216   : > { %v1101_v51 = vrot.slane %v1093_v49, %v3097_v44  ;;  %v1117_v52 = vrot.slane %v1109_v50, %v3097_v44  ;;  %v1108_v2 = vrot.slane %v1094_v57, %v3097_v44  ;;  %v797_v20 = vrot.slane %v789_v16, %v3095_v38 }
 0x217   : > { %v1124_v3 = vrot.slane %v1110_v58, %v3097_v44  ;;  %v804_v21 = vrot.slane %v790_v17, %v3095_v38 }
 0x218   : > { %v1125_v59 = vcombine.low %v1101_v51, %v1117_v52  ;;  %v1126_v60 = vcombine.high %v1101_v51, %v1117_v52  ;;  %v805_v22 = vcombine.low %v781_v18, %v797_v20  ;;  %v806_v23 = vcombine.high %v781_v18, %v797_v20 }
 0x219   : > { %v1127_v6 = vcombine.low %v1108_v2, %v1124_v3  ;;  %v1128_v8 = vcombine.high %v1108_v2, %v1124_v3  ;;  %v821_v25 = vcombine.low %v788_v19, %v804_v21  ;;  %v822_v26 = vcombine.high %v788_v19, %v804_v21 }
 0x21a   : > { %v1133_v53 = vld [vmem:[#allocation2] sm:$0xf]  ;;  %v1134_v54 = vld [vmem:[#allocation2 + $0x4] sm:$0xf]  ;;  %v1129_v63 = vpack.c.bf16 %v1125_v59, %v1125_v59  ;;  %v1130_v1 = vpack.c.bf16 %v1126_v60, %v1126_v60  ;;  %v813_v27 = vrot.slane %v805_v22, %v3097_v44  ;;  %v820_v28 = vrot.slane %v806_v23, %v3097_v44 }
 0x21b   : > { %v1146_v55 = vsel %vm1141_vm3, %v1133_v53, 0  ;;  %v1192_v56 = vsel %vm1141_vm3, %v1134_v54, 0  ;;  %v1135_v61 = vld [vmem:[#allocation2 + $0x8] sm:$0xf]  ;;  %v1136_v62 = vld [vmem:[#allocation2 + $0xc] sm:$0xf]  ;;  %v1131_v9 = vpack.c.bf16 %v1127_v6, %v1127_v6  ;;  %v1132_v10 = vpack.c.bf16 %v1128_v8, %v1128_v8 }
 0x21c   : > { %2257 = vmatpush3.bf16.xpose.msra.mxu1 %v1146_v55  ;;  %2263 = vmatpush3.bf16.xpose.msra.mxu0 %v1192_v56  ;;  %v1238_v4 = vsel %vm1141_vm3, %v1135_v61, 0  ;;  %v1284_v5 = vsel %vm1141_vm3, %v1136_v62, 0  ;;  %v829_v24 = vrot.slane %v821_v25, %v3097_v44  ;;  %v836_v29 = vrot.slane %v822_v26, %v3097_v44 }
 0x21d   : > { %2268 = vmatprep.subr.bf16.mxu1 %v2726_v0  ;;  %2274 = vmatprep.subr.bf16.mxu0 %v2726_v0  ;;  %v841_v30 = vcombine.low %v813_v27, %v820_v28  ;;  %v2156_v31 = vcombine.high %v813_v27, %v820_v28 }
 0x21e   : > { %v857_v32 = vcombine.low %v829_v24, %v836_v29  ;;  %v2157_v33 = vcombine.high %v829_v24, %v836_v29 }
 0x21f   : > { %v848_v34 = vrot.slane %v841_v30, %v3095_v38  ;;  %v856_v35 = vrot.slane %v2156_v31, %v3095_v38 }
 0x220   : > { %v864_v36 = vrot.slane %v857_v32, %v3095_v38  ;;  %v872_v37 = vrot.slane %v2157_v33, %v3095_v38 }
 0x221   : > { %v873_v39 = vcombine.low %v848_v34, %v856_v35  ;;  %v874_v40 = vcombine.high %v848_v34, %v856_v35 }
 0x222   : > { %v889_v41 = vcombine.low %v864_v36, %v872_v37  ;;  %v890_v42 = vcombine.high %v864_v36, %v872_v37 }
 0x223   : > { %2259 = vmatmul.mubr.msk.bf16.vlgmr.msra.gmra.mrb[4].mxu1 %vm1141_vm3, %v1129_v63  ;;  %2265 = vmatmul.mubr.msk.bf16.vlgmr.msra.gmra.mrb[8].mxu0 %vm1141_vm3, %v1130_v1  ;;  %v881_v43 = vrot.slane %v873_v39, %v3097_v44  ;;  %v888_v45 = vrot.slane %v874_v40, %v3097_v44 }
 0x224   : > { %2269 = vmatpush3.bf16.xpose.msra.mxu1 %v1238_v4  ;;  %2275 = vmatpush3.bf16.xpose.msra.mxu0 %v1284_v5  ;;  %v897_v46 = vrot.slane %v889_v41, %v3097_v44  ;;  %v904_v47 = vrot.slane %v890_v42, %v3097_v44 }
 0x225   : > { %2270 = vmatprep.mubr.msk.bf16.mxu1 %vm2727_vm0, %v2726_v0  ;;  %2276 = vmatprep.mubr.msk.bf16.mxu0 %vm2727_vm0, %v2726_v0 }
 0x226   : > { %2280 = vmatprep.subr.bf16.mxu1 %v2726_v0  ;;  %2286 = vmatprep.subr.bf16.mxu0 %v2726_v0  ;;  %v905_v48 = vcombine.low %v881_v43, %v897_v46  ;;  %v906_v49 = vcombine.high %v881_v43, %v897_v46  ;;  %v907_v50 = vcombine.low %v888_v45, %v904_v47 }
 0x227   : > { %v908_v51 = vcombine.high %v888_v45, %v904_v47 }
 0x228   : > { %v909_v52 = vpack.c.bf16 %v905_v48, %v905_v48  ;;  %v910_v53 = vpack.c.bf16 %v906_v49, %v906_v49  ;;  %v911_v54 = vpack.c.bf16 %v907_v50, %v907_v50 }
 0x229   : > { %v912_v55 = vpack.c.bf16 %v908_v51, %v908_v51 }
 0x22a   : > { %913 = vst.msk [vmem:[#allocation3] sm:$0xf] %vm758_vm2, %v909_v52  ;;  %914 = vst.msk [vmem:[#allocation3 + $0x4] sm:$0xf] %vm758_vm2, %v910_v53 }
 0x22b   : > { %2271 = vmatmul.mubr.msk.bf16.vlgmr.msra.gmra.mrb[8].mxu1 %vm1141_vm3, %v1131_v9  ;;  %2277 = vmatmul.mubr.msk.bf16.vlgmr.msra.gmra.mrb[12].mxu0 %vm1141_vm3, %v1132_v10  ;;  %915 = vst.msk [vmem:[#allocation3 + $0x8] sm:$0xf] %vm758_vm2, %v911_v54  ;;  %916 = vst.msk [vmem:[#allocation3 + $0xc] sm:$0xf] %vm758_vm2, %v912_v55 }
 0x22c   : > { %2282 = vmatprep.mubr.msk.bf16.mxu1 %vm2727_vm0, %v2726_v0  ;;  %2288 = vmatprep.mubr.msk.bf16.mxu0 %vm2727_vm0, %v2726_v0 }
 0x231   : > { %v1137_v56 = vld [vmem:[#allocation3] sm:$0xf]  ;;  %v1138_v57 = vld [vmem:[#allocation3 + $0x4] sm:$0xf] }
 0x232   : > { %v1375_v58 = vsel %vm1373_vm4, %v1137_v56, 0  ;;  %v1421_v59 = vsel %vm1373_vm4, %v1138_v57, 0  ;;  %v1139_v31 = vld [vmem:[#allocation3 + $0x8] sm:$0xf]  ;;  %v1140_v35 = vld [vmem:[#allocation3 + $0xc] sm:$0xf] }
 0x233   : > { %2281 = vmatpush3.bf16.msra.mxu1 %v1375_v58  ;;  %2287 = vmatpush3.bf16.msra.mxu0 %v1421_v59  ;;  %v1467_v39 = vsel %vm1373_vm4, %v1139_v31, 0  ;;  %v1513_v40 = vsel %vm1373_vm4, %v1140_v35, 0  ;;  %v2456_v35 = vld [vmem:[#allocation9 + $0x8] sm:$0xff]  }
 0x234   : > { %2292 = vmatprep.subr.bf16.mxu1 %v2726_v0  ;;  %2298 = vmatprep.subr.bf16.mxu0 %v2726_v0 }
 0x2f6   : > { %v1182_v60 = vpop.f32.mrb[4].mxu1  ;;  %v1228_v61 = vpop.f32.mrb[8].mxu0 }
 0x2f7   : > { %v2260_v62 = vpop.f32.mrb[5].mxu1  ;;  %v2266_v63 = vpop.f32.mrb[9].mxu0  ;;  %v1326_v1 = vsel %vm1141_vm3, %v1182_v60, -inf  ;;  %v1329_v2 = vsel %vm1141_vm3, %v1228_v61, -inf }
 0x2f8   : > { %1327 = vmax.xlane.f32.xlu1 %v1326_v1  ;;  %v1185_v3 = vpop.f32.mrb[6].mxu1  ;;  %1330 = vmax.xlane.f32.xlu0 %v1329_v2  ;;  %v1231_v4 = vpop.f32.mrb[10].mxu0 }
 0x2f9   : > { %v2261_v5 = vpop.f32.mrb[7].mxu1  ;;  %v2267_v6 = vpop.f32.mrb[11].mxu0 }
 0x2fe   : > { %v1274_v8 = vpop.f32.mrb[8].mxu1  ;;  %v1320_v9 = vpop.f32.mrb[12].mxu0 }
 0x2ff   : > { %v2272_v10 = vpop.f32.mrb[9].mxu1  ;;  %v2278_v11 = vpop.f32.mrb[13].mxu0  ;;  %v1332_v12 = vsel %vm1141_vm3, %v1274_v8, -inf  ;;  %v1335_v13 = vsel %vm1141_vm3, %v1320_v9, -inf }
 0x300   : > { %v1277_v14 = vpop.f32.mrb[10].mxu1  ;;  %1333 = vmax.xlane.f32.xlu0 %v1332_v12  ;;  %1336 = vmax.xlane.f32.xlu1 %v1335_v13  ;;  %v1323_v15 = vpop.f32.mrb[14].mxu0 }
 0x301   : > { %v2273_v16 = vpop.f32.mrb[11].mxu1  ;;  %v2279_v17 = vpop.f32.mrb[15].mxu0 }
 0x385   : > { %v1328_v18 = vpop.xlane.xlu1 %1327  ;;  %v1331_v19 = vpop.xlane.xlu0 %1330 }
 0x386   : > { %v1338_v20 = vsub.f32 %v1182_v60, %v1328_v18  ;;  %v1339_v21 = vsub.f32 %v1228_v61, %v1331_v19 }
 0x388   : > { %v1342_v22 = vmul.f32 1.442695, %v1338_v20  ;;  %v1344_v23 = vmul.f32 1.442695, %v1339_v21 }
 0x38a   : > { %2463 = vpow2.f32 %v1342_v22 }
 0x38b   : > { %2465 = vpow2.f32 %v1344_v23 }
 0x38d   : > { %v1334_v25 = vpop.xlane.xlu0 %1333  ;;  %v1337_v26 = vpop.xlane.xlu1 %1336 }
 0x38e   : > { %v1340_v27 = vsub.f32 %v1274_v8, %v1334_v25  ;;  %v1341_v28 = vsub.f32 %v1320_v9, %v1337_v26 }
 0x390   : > { %v1346_v24 = vmul.f32 1.442695, %v1340_v27  ;;  %v1348_v29 = vmul.f32 1.442695, %v1341_v28  ;;  %v2455_v27 = vld [vmem:[#allocation9] sm:$0xff]  }
 0x392   : > { %2467 = vpow2.f32 %v1346_v24 }
 0x393   : > { %2469 = vpow2.f32 %v1348_v29 }
 0x394   : > { %v2464_v30 = vpop.eup %2463 }
 0x395   : > { %v2466_v32 = vpop.eup %2465  ;;  %v1350_v33 = vsel %vm1141_vm3, %v2464_v30, 0.0  ;;  %v1366_v34 = vpack.c.bf16 %v2464_v30, %v2464_v30 }
 0x396   : > { %1351 = vadd.xlane.f32.xlu0 %v1350_v33  ;;  %v1353_v36 = vsel %vm1141_vm3, %v2466_v32, 0.0  ;;  %v1367_v37 = vpack.c.bf16 %v2466_v32, %v2466_v32 }
 0x397   : > { %1354 = vadd.xlane.f32.xlu1 %v1353_v36  ;;  %2283 = vmatmul.mubr.msk.bf16.vlgmr.msra.gmra.mrb[12].mxu1 %vm1141_vm3, %v1366_v34 }
 0x398   : > { %2289 = vmatmul.mubr.msk.bf16.vlgmr.msra.gmra.mrb[16].mxu0 %vm1141_vm3, %v1367_v37  ;;  %2293 = vmatpush3.bf16.msra.mxu1 %v1467_v39 }
 0x399   : > { %2299 = vmatpush3.bf16.msra.mxu0 %v1513_v40  ;;  %2294 = vmatprep.mubr.msk.bf16.mxu1 %vm2727_vm0, %v2726_v0 }
 0x39a   : > { %2300 = vmatprep.mubr.msk.bf16.mxu0 %vm2727_vm0, %v2726_v0  ;;  %2304 = vmatprep.subr.bf16.mxu1 %v2726_v0 }
 0x39b   : > { %2312 = vmatprep.subr.bf16.mxu0 %v2726_v0 }
 0x39c   : > { %v2468_v41 = vpop.eup %2467 }
 0x39d   : > { %v2470_v42 = vpop.eup %2469  ;;  %v1356_v43 = vsel %vm1141_vm3, %v2468_v41, 0.0  ;;  %v1368_v45 = vpack.c.bf16 %v2468_v41, %v2468_v41 }
 0x39e   : > { %1357 = vadd.xlane.f32.xlu0 %v1356_v43  ;;  %v1359_v46 = vsel %vm1141_vm3, %v2470_v42, 0.0  ;;  %v1369_v47 = vpack.c.bf16 %v2470_v42, %v2470_v42 }
 0x39f   : > { %1360 = vadd.xlane.f32.xlu1 %v1359_v46  ;;  %2295 = vmatmul.mubr.msk.bf16.vlgmr.msra.gmra.mrb[16].mxu1 %vm1141_vm3, %v1368_v45 }
 0x3a0   : > { %2301 = vmatmul.mubr.msk.bf16.vlgmr.msra.gmra.mrb[20].mxu0 %vm1141_vm3, %v1369_v47  ;;  %2308 = vmatprep.mubr.msk.bf16.mxu1 %vm2727_vm0, %v2726_v0 }
 0x3a1   : > { %2316 = vmatprep.mubr.msk.bf16.mxu0 %vm2727_vm0, %v2726_v0  ;;  %2305 = vmatpush3.bf16.msra.mxu1 %v2455_v27 }
 0x3a2   : > { %2306 = vmatprep.subr.bf16.mxu1 %v2726_v0 }
 0x3a5   : > { %2307 = vmatpush3.bf16.msra.mxu1 %v2456_v35 }
 0x3a6   : > { %2320 = vmatprep.subr.bf16.mxu1 %v2726_v0 }
 0x423   : > { %v1352_v48 = vpop.xlane.xlu0 %1351 }
 0x424   : > { %v1355_v49 = vpop.xlane.xlu1 %1354  ;;  %2471 = vrcp.f32 %v1352_v48 }
 0x425   : > { %2473 = vrcp.f32 %v1355_v49 }
 0x42b   : > { %v1358_v50 = vpop.xlane.xlu0 %1357 }
 0x42c   : > { %v1361_v51 = vpop.xlane.xlu1 %1360  ;;  %2475 = vrcp.f32 %v1358_v50 }
 0x42d   : > { %2477 = vrcp.f32 %v1361_v51 }
 0x42e   : > { %v2472_v60 = vpop.eup %2471 }
 0x42f   : > { %v2474_v61 = vpop.eup %2473 }
 0x436   : > { %v2476_v62 = vpop.eup %2475 }
 0x437   : > { %v2478_v1 = vpop.eup %2477 }
 0x46a   : > { %v1411_v52 = vpop.f32.mrb[12].mxu1 }
 0x46b   : > { %v1457_v53 = vpop.f32.mrb[16].mxu0  ;;  %v2284_v54 = vpop.f32.mrb[13].mxu1  ;;  %v1555_v2 = vmul.f32 %v2472_v60, %v1411_v52 }
 0x46c   : > { %v2290_v55 = vpop.f32.mrb[17].mxu0  ;;  %v1414_v56 = vpop.f32.mrb[14].mxu1  ;;  %v1556_v6 = vmul.f32 %v2474_v61, %v1457_v53 }
 0x46d   : > { %v1460_v57 = vpop.f32.mrb[18].mxu0  ;;  %v2285_v58 = vpop.f32.mrb[15].mxu1 }
 0x46e   : > { %v2291_v59 = vpop.f32.mrb[19].mxu0 }
 0x46f   : > { %v2174_v59 = vld [vmem:[#allocation12 + $0x3] ss:$0 sm:$0xff] }
 0x472   : > { %v1503_v63 = vpop.f32.mrb[16].mxu1 }
 0x473   : > { %v1557_v3 = vmul.f32 %v2476_v62, %v1503_v63  ;;  %v1549_v4 = vpop.f32.mrb[20].mxu0  ;;  %v2296_v5 = vpop.f32.mrb[17].mxu1 }
 0x474   : > { %v1558_v8 = vmul.f32 %v2478_v1, %v1549_v4  ;;  %v2302_v9 = vpop.f32.mrb[21].mxu0  ;;  %v1506_v10 = vpop.f32.mrb[18].mxu1 }
 0x475   : > { %v1559_v11 = vcombine.low %v1555_v2, %v1557_v3  ;;  %v1560_v12 = vcombine.high %v1555_v2, %v1557_v3  ;;  %v1552_v13 = vpop.f32.mrb[22].mxu0  ;;  %v2297_v14 = vpop.f32.mrb[19].mxu1  ;;  %v2457_v10 = vld [vmem:[#allocation10] sm:$0xff]  }
 0x476   : > { %v1575_v15 = vcombine.low %v1556_v6, %v1558_v8  ;;  %v1576_v16 = vcombine.high %v1556_v6, %v1558_v8  ;;  %v2303_v17 = vpop.f32.mrb[23].mxu0  ;;  %2313 = vmatpush3.bf16.msra.mxu0 %v2457_v10 }
 0x477   : > { %v1567_v18 = vrot.slane %v1559_v11, %v3095_v38  ;;  %v1574_v19 = vrot.slane %v1560_v12, %v3095_v38  ;;  %v2458_v11 = vld [vmem:[#allocation10 + $0x8] sm:$0xff]   ;;  %2314 = vmatprep.subr.bf16.mxu0 %v2726_v0  ;;  %v2460_v12 = vld [vmem:[%s3347_s0 + $0x8] sm:$0xff]   ;;  %v2178_v17 = vld [vmem:[#allocation12 + $0x4] ss:$0 sm:$0xff] }
 0x478   : > { %v1583_v20 = vrot.slane %v1575_v15, %v3095_v38  ;;  %v1590_v21 = vrot.slane %v1576_v16, %v3095_v38 }
 0x47a   : > { %v1591_v22 = vcombine.low %v1567_v18, %v1583_v20  ;;  %v1592_v23 = vcombine.high %v1567_v18, %v1583_v20  ;;  %v1607_v25 = vcombine.low %v1574_v19, %v1590_v21  ;;  %v1608_v26 = vcombine.high %v1574_v19, %v1590_v21  ;;  %2315 = vmatpush3.bf16.msra.mxu0 %v2458_v11  ;;  %v2179_v19 = vld [vmem:[#allocation12 + $0x5] ss:$0 sm:$0xff] }
 0x47c   : > { %v1599_v28 = vrot.slane %v1591_v22, %v3097_v44  ;;  %v1606_v24 = vrot.slane %v1592_v23, %v3097_v44  ;;  %v1615_v29 = vrot.slane %v1607_v25, %v3097_v44  ;;  %v1622_v30 = vrot.slane %v1608_v26, %v3097_v44  ;;  %v2461_v23 = vld [vmem:[%s3347_s0 + $0x10] sm:$0xff]   ;;  %v2462_v25 = vld [vmem:[%s3347_s0 + $0x18] sm:$0xff]  }
 0x47e   : > { %v1627_v31 = vcombine.low %v1599_v28, %v1606_v24  ;;  %v2172_v32 = vcombine.high %v1599_v28, %v1606_v24  ;;  %v1643_v33 = vcombine.low %v1615_v29, %v1622_v30  ;;  %v2173_v34 = vcombine.high %v1615_v29, %v1622_v30 }
 0x480   : > { %v1634_v36 = vrot.slane %v1627_v31, %v3095_v38  ;;  %v1642_v37 = vrot.slane %v2172_v32, %v3095_v38  ;;  %v1650_v39 = vrot.slane %v1643_v33, %v3095_v38  ;;  %v1658_v40 = vrot.slane %v2173_v34, %v3095_v38  ;;  %v2184_v33 = vld [vmem:[#allocation12 + $0x8] ss:$0 sm:$0xff] }
 0x482   : > { %v1660_v41 = vcombine.high %v1634_v36, %v1642_v37  ;;  %v1676_v42 = vcombine.high %v1650_v39, %v1658_v40  ;;  %v1659_v43 = vcombine.low %v1634_v36, %v1642_v37  ;;  %v1675_v45 = vcombine.low %v1650_v39, %v1658_v40 }
 0x484   : > { %v1674_v46 = vrot.slane %v1660_v41, %v3097_v44  ;;  %v1690_v47 = vrot.slane %v1676_v42, %v3097_v44  ;;  %v1667_v48 = vrot.slane %v1659_v43, %v3097_v44  ;;  %v1683_v49 = vrot.slane %v1675_v45, %v3097_v44 }
 0x486   : > { %v1693_v50 = vcombine.low %v1674_v46, %v1690_v47  ;;  %v1692_v51 = vcombine.high %v1667_v48, %v1683_v49  ;;  %v1694_v52 = vcombine.high %v1674_v46, %v1690_v47  ;;  %v1691_v53 = vcombine.low %v1667_v48, %v1683_v49 }
 0x488   : > { %1700 = vrot.lane.b32.xlu1 %v1693_v50, %s2733_s20  ;;  %1696 = vrot.lane.b32.xlu0 %v1692_v51, %s2734_s10  ;;  %s3348_s20 = sld [smem:[#allocation21_spill]]  ;;  %s2144_s10 = sshll.u32 %s3027_s4, 3  ;;  %v2190_v51 = vld [vmem:[#allocation12 + $0x6] ss:$0 sm:$0xff] }
 0x489   : > { %s467_s9 = scalar_lea.vmem [#allocation13], %s2144_s10 }
 0x48a   : > { %s1996_s23 = sshll.u32 %s467_s9, 4  ;;  %s3261_s23 = int_to_ptr.vmem [resolvable:$true] %s1996_s23 }
 0x48b   : > { %s2625_s11 = scalar_lea.vmem %s3261_s23, 128 }
 0x48c   : > { %1704 = vrot.lane.b32.xlu1 %v1694_v52, %s2735_s24  ;;  %s2193_s24 = sshll.u32 %s2707_s16, 7  ;;  %p2626_p9 = scmp.ne.s32.totalorder %s3261_s23, %s2625_s11 }
 0x48d   : > { %s3259_s19 = scalar_lea.hbm %s3349_s12, %s2193_s24  ;;  %s2736_s16 = smov [#allocation13]  }
 0x48e   : > { %v2180_v26 = vld [vmem:[%s3348_s20] ss:$0 sm:$0xff]  ;;  %p2627_p1 = pnand %p2626_p9, %p3350_p10  ;;  %s2629_s21 = sshll.u32 %s2736_s16, 4  ;;  %s2630_s21 = int_to_ptr.vmem [resolvable:$false] %s2629_s21 }
 0x48f   : > { %s2631_s26 = scalar_lea.vmem %s2630_s21, 256  ;;  %p2632_p7 = scmp.lt.s32.totalorder %s3261_s23, %s2630_s21 }
 0x490   : > { %p2628_p0 = pneg %p2627_p1  ;;  %p2633_p5 = scmp.lt.s32.totalorder %s2631_s26, %s2625_s11 }
 0x492   : > { %p2634_p8 = por %p2633_p5, %p2632_p7 }
 0x494   : > { %p2635_p3 = pnand %p2634_p8, %p2628_p0 }
 0x4fa   : > { %v1701_v38 = vpop.permute.xlu1 %1700  ;;  %v1697_v54 = vpop.permute.xlu0 %1696 }
 0x4fb   : > { %v1707_v55 = vsel %vm1141_vm3, %v1691_v53, %v1697_v54  ;;  %v2191_v53 = vld [vmem:[#allocation12 + $0x7] ss:$0 sm:$0xff] }
 0x4fc   : > { %v1709_v57 = vsel %vm1708_vm5, %v1707_v55, %v1701_v38 }
 0x4fe   : > { %v1705_v56 = vpop.permute.xlu1 %1704 }
 0x4ff   : > { %v1711_v58 = vsel %vm1710_vm6, %v1709_v57, %v1705_v56 }
 0x500   : > { %v1712_v44 = vpack.c.bf16 %v1711_v58, %v1711_v58 }
 0x502   : > { %2309 = vmatmul.mubr.msk.bf16.vlgmr.msra.gmra.mrb[20].mxu1 %vm503_vm1, %v1712_v44 }
 0x503   : > { %2328 = vmatprep.mubr.msk.bf16.mxu1 %vm2727_vm0, %v2726_v0 }
 0x5d5   : > { %v1771_v60 = vpop.f32.mrb[20].mxu1 }
 0x5d6   : > { %v1772_v61 = vadd.f32 %v2174_v59, %v1771_v60  ;;  %v2310_v62 = vpop.f32.mrb[21].mxu1 }
 0x5d7   : > { %v1774_v63 = vpop.f32.mrb[22].mxu1 }
 0x5d8   : > { %v2311_v1 = vpop.f32.mrb[23].mxu1  ;;  %v1777_v2 = vadd.f32 %v1772_v61, %v3068_v7  ;;  %v2459_v7 = vld [vmem:[%s3347_s0] sm:$0xff]  }
 0x5d9   : > { %2321 = vmatpush3.bf16.msra.mxu1 %v2459_v7 }
 0x5da   : > { %v1778_v3 = vsel %vm503_vm1, %v1777_v2, 0.0  ;;  %2322 = vmatprep.subr.bf16.mxu1 %v2726_v0 }
 0x5db   : > { %1779 = vadd.xlane.f32.xlu0 %v1778_v3 }
 0x5dd   : > { %2323 = vmatpush3.bf16.msra.mxu1 %v2460_v12 }
 0x5de   : > { %2324 = vmatprep.subr.bf16.mxu1 %v2726_v0 }
 0x5e1   : > { %2325 = vmatpush3.bf16.msra.mxu1 %v2461_v23 }
 0x5e2   : > { %2326 = vmatprep.subr.bf16.mxu1 %v2726_v0 }
 0x5e5   : > { %2327 = vmatpush3.bf16.msra.mxu1 %v2462_v25 }
 0x668   : > { %v1780_v4 = vpop.xlane.xlu0 %1779 }
 0x669   : > { %v1782_v5 = vmul.f32 0.03125, %v1780_v4 }
 0x66b   : > { %v1783_v6 = vsub.f32 %v1777_v2, %v1782_v5 }
 0x66d   : > { %v1784_v8 = vmul.f32 %v1783_v6, %v1783_v6 }
 0x66f   : > { %v1785_v9 = vsel %vm503_vm1, %v1784_v8, 0.0 }
 0x670   : > { %1786 = vadd.xlane.f32.xlu1 %v1785_v9 }
 0x6fd   : > { %v1787_v13 = vpop.xlane.xlu1 %1786 }
 0x6fe   : > { %v1788_v14 = vmul.f32 0.03125, %v1787_v13 }
 0x700   : > { %v1789_v15 = vadd.f32 1e-05, %v1788_v14 }
 0x702   : > { %2479 = vrsqrt.f32 %v1789_v15 }
 0x70c   : > { %v2480_v16 = vpop.eup %2479 }
 0x70d   : > { %v1791_v18 = vmul.f32 %v2480_v16, %v1783_v6 }
 0x70f   : > { %v1797_v20 = vmul.f32 %v2178_v17, %v1791_v18 }
 0x711   : > { %v1803_v21 = vadd.f32 %v2179_v19, %v1797_v20 }
 0x713   : > { %v1804_v22 = vpack.c.bf16 %v1803_v21, %v1803_v21 }
 0x715   : > { %2317 = vmatmul.mubr.msk.bf16.vlgmr.msra.gmra.mrb[24].mxu0 %vm503_vm1, %v1804_v22 }
 0x7e8   : > { %v1865_v27 = vpop.f32.mrb[24].mxu0 }
 0x7e9   : > { %v1866_v28 = vadd.f32 %v2180_v26, %v1865_v27  ;;  %v2318_v24 = vpop.f32.mrb[25].mxu0 }
 0x7ea   : > { %v1868_v29 = vpop.f32.mrb[26].mxu0 }
 0x7eb   : > { %v1871_v30 = vmax.f32 %v1866_v28, 0.0  ;;  %v2319_v31 = vpop.f32.mrb[27].mxu0 }
 0x7ed   : > { %v1872_v32 = vpack.c.bf16 %v1871_v30, %v1871_v30 }
 0x7ef   : > { %2329 = vmatmul.mubr.msk.bf16.vlgmr.msra.gmra.mrb[24].mxu1 %vm1910_vm7, %v1872_v32 }
 0x8c2   : > { %v1948_v0 = vpop.f32.mrb[24].mxu1 }
 0x8c3   : > { %v1949_v34 = vadd.f32 %v2184_v33, %v1948_v0  ;;  %v2330_v35 = vpop.f32.mrb[25].mxu1 }
 0x8c4   : > { %v1951_v36 = vpop.f32.mrb[26].mxu1 }
 0x8c5   : > { %v2331_v37 = vpop.f32.mrb[27].mxu1  ;;  %v1954_v39 = vadd.f32 %v1949_v34, %v1803_v21 }
 0x8c7   : > { %v1955_v40 = vsel %vm503_vm1, %v1954_v39, 0.0 }
 0x8c8   : > { %1956 = vadd.xlane.f32.xlu0 %v1955_v40 }
 0x955   : > { %v1957_v41 = vpop.xlane.xlu0 %1956 }
 0x956   : > { %v1958_v42 = vmul.f32 0.03125, %v1957_v41 }
 0x958   : > { %v1959_v43 = vsub.f32 %v1954_v39, %v1958_v42 }
 0x95a   : > { %v1960_v45 = vmul.f32 %v1959_v43, %v1959_v43 }
 0x95c   : > { %v1961_v46 = vsel %vm503_vm1, %v1960_v45, 0.0 }
 0x95d   : > { %1962 = vadd.xlane.f32.xlu0 %v1961_v46 }
 0x9ea   : > { %v1963_v47 = vpop.xlane.xlu0 %1962 }
 0x9eb   : > { %v1964_v48 = vmul.f32 0.03125, %v1963_v47 }
 0x9ed   : > { %v1965_v49 = vadd.f32 1e-05, %v1964_v48 }
 0x9ef   : > { %2481 = vrsqrt.f32 %v1965_v49 }
 0x9f9   : > { %v2482_v50 = vpop.eup %2481 }
 0x9fa   : > { %v1967_v52 = vmul.f32 %v2482_v50, %v1959_v43 }
 0x9fc   : > { %v1973_v38 = vmul.f32 %v2190_v51, %v1967_v52 }
 0x9fe   : > { %v1979_v54 = vadd.f32 %v2191_v53, %v1973_v38 }
 0xa00   : > { %1980 = vst.msk [vmem:[%s467_s9] sm:$0xff] %vm503_vm1, %v1979_v54 }
 0xa01   : > { %2638 = shalt.err (!%p2635_p3)
}
 0xa02   : > { %s2639_s4 = scalar_lea.hbm %s3259_s19, 128  ;;  %s2643_s24 = scalar_lea.hbm %s3349_s12, 256 }
 0xa03   : > { %p2640_p11 = scmp.ne.s32.totalorder %s3259_s19, %s2639_s4  ;;  %p2644_p12 = scmp.lt.u32.totalorder %s3259_s19, %s3349_s12 }
 0xa04   : > { %p2645_p4 = scmp.lt.u32.totalorder %s2643_s24, %s2639_s4  ;;  %p2647_p9 = scmp.lt.u32.totalorder %s2639_s4, %s3259_s19 }
 0xa05   : > { %p2641_p6 = pnand %p2640_p11, %p3350_p10 }
 0xa06   : > { %p2646_p2 = por %p2645_p4, %p2644_p12 }
 0xa07   : > { %p2642_p13 = pneg %p2641_p6 }
 0xa08   : > { %p2648_p1 = por %p2647_p9, %p2646_p2 }
 0xa0a   : > { %p2649_p0 = pnand %p2648_p1, %p2642_p13 }
 0xa0c   : > { %2652 = shalt.err (!%p2649_p0)
}
 0xa0d   : > { %2350 = dma.vmem_to_hbm [thread:$0]  (%p3350_p10), %s3261_s23, 128, %s3259_s19, %s1982_s22  }
 0xa0e PF: > { %s2008_s30 = sand.u32 1, %s2695_s13   ;;  %p3351_p7 = scmp.ne.s32.totalorder %s3342_s29, 0 }
 0xa0f   : > { %p3352_p5 = scmp.ge.s32.totalorder %s2715_s18, 2  ;;  %s2009_s11 = scalar_lea.sflag [#allocation6], %s2008_s30 }
 0xa11   : > { %p2370_p8 = pnand %p3352_p5, %p3351_p7 }
 0xa13   : > { %2690 = dma.done.wait (!%p2370_p8), %s2009_s11, 128  }
 0xa14   : > { %2692 = vsyncadd (!%p2370_p8), %s2009_s11, 4294967168  ;;  %s28_s18 = sadd.s32 1, %s2715_s18   ;;  %s3353_s13 = smov %s2699_s14 }
 0xa15   : > { %p25_p3 = scmp.ge.s32.totalorder %s28_s18, 4   ;;  %s3354_s14 = smov %s2703_s15 }
 0xa16   : > { %s3355_s15 = smov %s2977_s27  ;;  %s3356_s16 = smov %s2711_s17 }
 0xa17   : > { %s3357_s17 = smov %s3359_s7  ;;  %27 = sbr.rel (!%p25_p3) target bundleno = 14 (0xe), region = 128 }
 0xa1e   :  { %2014 = vsyncpa [#allocation5], 1 }
 0xa1f   :  { %2016 = vsyncpa [#allocation5 + $0x1], 1 }
 0xa20   :  { %2017 = vsyncpa [#allocation8], 1 }
 0xa21   :  { %2018 = vsyncpa [#allocation11], 1 }
 0xa22   :  { %2019 = vsyncpa [#allocation6], 1 }
 0xa23   :  { %2021 = vsyncpa [#allocation6 + $0x1], 1 }

// kernel: tpu_custom_call.1
= control target key start
LH: loop header
LB: loop body
LE: loop exit
PB: predicated region body
PF: predicated region fallthrough
CT: control target
= control target key end

     0   :  { %s3309_s0 = inlined_call_operand.vmem [shape: f32[2,8,32], index: 0, kind: input, shape index: {}]   ;;  %s3310_s1 = inlined_call_operand.hbm [shape: bf16[2,8,32], index: 1, kind: input, shape index: {}]   ;;  %s3311_s2 = inlined_call_operand.vmem [shape: bf16[32,32], index: 2, kind: input, shape index: {}]   ;;  %s3312_s3 = inlined_call_operand.vmem [shape: bf16[32,32], index: 3, kind: input, shape index: {}]   ;;  %s3313_s4 = inlined_call_operand.hbm [shape: bf16[32,32], index: 4, kind: input, shape index: {}]   ;;  %s3314_s5 = inlined_call_operand.hbm [shape: bf16[32,32], index: 5, kind: input, shape index: {}]   ;;  %s3315_s6 = inlined_call_operand.hbm [shape: bf16[32,64], index: 6, kind: input, shape index: {}]   ;;  %s3316_s7 = inlined_call_operand.vmem [shape: bf16[64,32], index: 7, kind: input, shape index: {}]   ;;  %s3317_s8 = inlined_call_operand.hbm [shape: f32[9,32], index: 8, kind: input, shape index: {}]   ;;  %s3318_s9 = inlined_call_operand.vmem [shape: f32[1,64], index: 9, kind: input, shape index: {}]   ;;  %s3319_s10 = inlined_call_operand.hbm [shape: f32[2,8,32], index: 10, kind: output, shape index: {}]  }
   0x1   :  { %3327 = sst [smem:[#allocation18_spill]] %s3309_s0 }
   0x2   :  { %3328 = sst [smem:[#allocation19_spill]] %s3313_s4 }
   0x3   :  { %3329 = sst [smem:[#allocation20_spill]] %s3316_s7 }
   0x4   :  { %3330 = sst [smem:[#allocation21_spill]] %s3318_s9 }
   0x5   :  { %3331 = sst [smem:[#allocation22_spill]] %s3319_s10 }
   0x6   :  { %15 = vsyncpa [#allocation5], 0 }
   0x7   :  { %17 = vsyncpa [#allocation5 + $0x1], 0 }
   0x8   :  { %18 = vsyncpa [#allocation8], 0 }
   0x9   :  { %19 = vsyncpa [#allocation11], 0 }
   0xa   :  { %20 = vsyncpa [#allocation6], 0 }
   0xb   :  { %22 = vsyncpa [#allocation6 + $0x1], 0  ;;  %s2792_s13 = smov 0   ;;  %s2794_s14 = smov 0  }
   0xc   :  { %s2796_s15 = smov 0   ;;  %s2798_s16 = smov 0  }
   0xd   :  { %s2800_s17 = smov 0   ;;  %s2802_s18 = smov 0  }
   0xe LB: > { %s3320_s19 = sadd.s32 4294967295, %s2715_s18   ;;  %p2130_p0 = scmp.ge.s32.totalorder %s2715_s18, 1  ;;  %s2715_s18 = sphi %s2802_s18, %s28_s18   ;;  %s2711_s17 = sphi %s2800_s17, %s3357_s17   ;;  %s2707_s16 = sphi %s2798_s16, %s3356_s16   ;;  %s2703_s15 = sphi %s2796_s15, %s3355_s15   ;;  %s2699_s14 = sphi %s2794_s14, %s3354_s14   ;;  %s2695_s13 = sphi %s2792_s13, %s3353_s13  }
   0xf   : > { %p2826_p1 = scmp.eq.s32.totalorder %s3320_s19, 0  ;;  %p295_p2 = scmp.lt.s32.totalorder %s2715_s18, 3 }
  0x10   : > { %s2717_s22 = smov [#allocation7]   ;;  %s2718_s25 = smov [#allocation10]  }
  0x11   : > { %s3332_s20 = scalar_select %p2826_p1, 1, 0 }
  0x12   : > { %p2831_p3 = pnand %p2130_p0, %p295_p2  ;;  %s313_s23 = sshll.u32 %s2717_s22, 4  ;;  %s2835_s23 = int_to_ptr.vmem [resolvable:$true] %s313_s23 }
  0x13   : > { %s339_s26 = sshll.u32 %s2718_s25, 4  ;;  %s2719_s27 = smov [#allocation9]   ;;  %s2846_s26 = int_to_ptr.vmem [resolvable:$true] %s339_s26 }
  0x14   : > { %s3333_s21 = scalar_select %p2831_p3, 1, 0 }
  0x15   : > { %p2352_p4 = pneg %p2831_p3  ;;  %s2848_s28 = sshll.u32 %s2719_s27, 4  ;;  %s327_s28 = int_to_ptr.vmem [resolvable:$true] %s2848_s28 }
  0x16   : > { %s3335_s4 = sld [smem:[#allocation19_spill]] }
  0x17   : > { %p2842_p6 = pnand %p2352_p4, %p2826_p1 }
  0x19   : > { %p2858_p8 = pneg %p2842_p6 }
  0x1c   : > { %s2483_s11 = scalar_lea.hbm %s3335_s4, 256 }
  0x1d   : > { %p2484_p7 = scmp.ne.s32.totalorder %s3335_s4, %s2483_s11  ;;  %p2490_p11 = scmp.lt.u32.totalorder %s2483_s11, %s3335_s4 }
  0x1f   : > { %p2486_p9 = pnand %p2858_p8, %p2484_p7 }
  0x21   : > { %p2487_p10 = pneg %p2486_p9 }
  0x23   : > { %p2492_p12 = pnand %p2490_p11, %p2487_p10 }
  0x25   : > { %2495 = shalt.err (!%p2492_p12)
}
  0x26   : > { %s2496_s29 = scalar_lea.vmem %s2835_s23, 256  ;;  %p2504_p4 = scmp.lt.s32.totalorder %s2835_s23, %s2835_s23 }
  0x27   : > { %p2497_p13 = scmp.ne.s32.totalorder %s2835_s23, %s2496_s29  ;;  %p2505_p5 = scmp.lt.s32.totalorder %s2496_s29, %s2496_s29 }
  0x29   : > { %p2499_p0 = pnand %p2497_p13, %p2858_p8  ;;  %p2506_p7 = por %p2505_p5, %p2504_p4 }
  0x2b   : > { %p2500_p2 = pneg %p2499_p0 }
  0x2d   : > { %p2507_p9 = pnand %p2506_p7, %p2500_p2 }
  0x2f   : > { %2510 = shalt.err (!%p2507_p9)
}
  0x30   : > { %s2720_s30 = smov 64   ;;  %s2721_s11 = smov 4  }
  0x31   : > { %2355 = dma.hbm_to_vmem [thread:$0]  (!%p2842_p6), %s3335_s4, 256, %s2835_s23, [#allocation8], %s2720_s30, %s2720_s30, %s2721_s11  }
  0x32   : > { %s2511_s29 = scalar_lea.hbm %s3315_s6, 256 }
  0x33   : > { %p2512_p5 = scmp.ne.s32.totalorder %s3315_s6, %s2511_s29  ;;  %p2518_p12 = scmp.lt.u32.totalorder %s2511_s29, %s3315_s6 }
  0x35   : > { %p2514_p10 = pnand %p2512_p5, %p2858_p8 }
  0x37   : > { %p2515_p11 = pneg %p2514_p10 }
  0x39   : > { %p2520_p13 = pnand %p2518_p12, %p2515_p11 }
  0x3b   : > { %2523 = shalt.err (!%p2520_p13)
}
  0x3c   : > { %s2524_s23 = scalar_lea.vmem %s2846_s26, 256  ;;  %p2532_p7 = scmp.lt.s32.totalorder %s2846_s26, %s2846_s26 }
  0x3d   : > { %p2525_p0 = scmp.ne.s32.totalorder %s2846_s26, %s2524_s23  ;;  %p2533_p9 = scmp.lt.s32.totalorder %s2524_s23, %s2524_s23 }
  0x3f   : > { %p2527_p2 = pnand %p2525_p0, %p2858_p8  ;;  %p2534_p5 = por %p2533_p9, %p2532_p7 }
  0x41   : > { %p2528_p4 = pneg %p2527_p2 }
  0x43   : > { %p2535_p10 = pnand %p2534_p5, %p2528_p4 }
  0x45   : > { %2538 = shalt.err (!%p2535_p10)
}
  0x46   : > { %2361 = dma.hbm_to_vmem [thread:$0]  (!%p2842_p6), %s3315_s6, 256, %s2846_s26, [#allocation11], %s2720_s30, %s2720_s30, %s2721_s11  }
  0x47   : > { %s2539_s12 = scalar_lea.hbm %s3314_s5, 256 }
  0x48   : > { %p2540_p11 = scmp.ne.s32.totalorder %s3314_s5, %s2539_s12  ;;  %p2546_p0 = scmp.lt.u32.totalorder %s2539_s12, %s3314_s5 }
  0x4a   : > { %p2542_p12 = pnand %p2540_p11, %p2858_p8 }
  0x4c   : > { %p2543_p13 = pneg %p2542_p12 }
  0x4e   : > { %p2548_p2 = pnand %p2546_p0, %p2543_p13 }
  0x50   : > { %2551 = shalt.err (!%p2548_p2)
}
  0x51   : > { %s2552_s23 = scalar_lea.vmem %s327_s28, 256  ;;  %p2560_p5 = scmp.lt.s32.totalorder %s327_s28, %s327_s28 }
  0x52   : > { %p2553_p4 = scmp.ne.s32.totalorder %s327_s28, %s2552_s23  ;;  %p2561_p10 = scmp.lt.s32.totalorder %s2552_s23, %s2552_s23 }
  0x54   : > { %p2555_p7 = pnand %p2553_p4, %p2858_p8  ;;  %p2562_p3 = por %p2561_p10, %p2560_p5 }
  0x56   : > { %p2556_p9 = pneg %p2555_p7 }
  0x58   : > { %p2563_p1 = pnand %p2562_p3, %p2556_p9 }
  0x5a   : > { %2566 = shalt.err (!%p2563_p1)
}
  0x5b   : > { %2358 = dma.hbm_to_vmem [thread:$0]  (!%p2842_p6), %s3314_s5, 256, %s327_s28, [#allocation8], %s2720_s30, %s2720_s30, %s2721_s11  }
  0x5c   : > { %s2722_s7 = smov [#allocation12]   ;;  %s2567_s22 = scalar_lea.hbm %s3317_s8, 256 }
  0x5d   : > { %s355_s9 = sshll.u32 %s2722_s7, 4  ;;  %p2568_p1 = scmp.ne.s32.totalorder %s3317_s8, %s2567_s22  ;;  %s356_s9 = int_to_ptr.vmem [resolvable:$true] %s355_s9 }
  0x5e   : > { %p2574_p12 = scmp.lt.u32.totalorder %s2567_s22, %s3317_s8 }
  0x5f   : > { %p2570_p3 = pnand %p2568_p1, %p2858_p8 }
  0x61   : > { %p2571_p11 = pneg %p2570_p3 }
  0x63   : > { %p2576_p13 = pnand %p2574_p12, %p2571_p11 }
  0x65   : > { %2579 = shalt.err (!%p2576_p13)
}
  0x66   : > { %s2580_s28 = scalar_lea.vmem %s356_s9, 256  ;;  %p2588_p7 = scmp.lt.s32.totalorder %s356_s9, %s356_s9 }
  0x67   : > { %p2581_p0 = scmp.ne.s32.totalorder %s356_s9, %s2580_s28  ;;  %p2589_p9 = scmp.lt.s32.totalorder %s2580_s28, %s2580_s28 }
  0x69   : > { %p2583_p2 = pnand %p2581_p0, %p2858_p8  ;;  %p2590_p5 = por %p2589_p9, %p2588_p7 }
  0x6b   : > { %p2584_p4 = pneg %p2583_p2 }
  0x6d   : > { %p2591_p10 = pnand %p2590_p5, %p2584_p4 }
  0x6f   : > { %2594 = shalt.err (!%p2591_p10)
}
  0x70   : > { %s2723_s30 = smov 128   ;;  %s2724_s19 = smov 8  }
  0x71   : > { %2364 = dma.hbm_to_vmem [thread:$0]  (!%p2842_p6), %s3317_s8, 256, %s356_s9, [#allocation11], %s2723_s30, %s2723_s30, %s2724_s19  }
  0x72   : > { %s2129_s0 = sadd.s32 4294967294, %s2715_s18   ;;  %s40_s7 = sadd.s32 1, %s2711_s17 }
  0x73   : > { %p42_p8 = scmp.ge.s32.totalorder %s40_s7, 2  ;;  %s75_s10 = sadd.s32 1, %s2703_s15 }
  0x74   : > { %p82_p1 = scmp.ne.s32.totalorder %s2703_s15, %s2699_s14  ;;  %p83_p3 = scmp.eq.s32.totalorder %s2715_s18, 0 }
  0x75   : > { %s3359_s7 = smov (%p42_p8, %s40_s7), 0  ;;  %p88_p12 = scmp.ne.s32.totalorder %s2699_s14, %s2695_s13 }
  0x76   : > { %p2956_p11 = por %p83_p3, %p82_p1  ;;  %s72_s24 = ssub.s32 %s2711_s17, %s3359_s7 }
  0x77   : > { %s3338_s9 = sadd.s32 4294967295, %s2715_s18   ;;  %p73_p13 = scmp.eq.s32.totalorder %s72_s24, 0 }
  0x78   : > { %p282_p6 = scmp.eq.s32.totalorder %s3338_s9, 1  ;;  %p3339_p0 = scmp.ne.s32.totalorder %s3332_s20, 0 }
  0x79   : > { %p288_p7 = scmp.eq.s32.totalorder %s2129_s0, 1  ;;  %p2377_p5 = scmp.lt.s32.totalorder %s2715_s18, 2 }
  0x7a   : > { %p2968_p2 = por %p3339_p0, %p88_p12  ;;  %p2972_p4 = por %p282_p6, %p82_p1 }
  0x7b   : > { %s2977_s27 = scalar_select %p73_p13, %s2703_s15, %s75_s10  }
  0x7c   : > { %s3341_s25 = scalar_select %p2972_p4, 1, 0 }
  0x7d   : > { %p2979_p9 = por %p288_p7, %p88_p12  ;;  %s382_s23 = sand.u32 1, %s2703_s15  }
  0x7e   : > { %s2137_s28 = sshll.u32 %s2711_s17, 6  ;;  %s2136_s30 = sshll.u32 %s382_s23, 2 }
  0x7f   : > { %s3342_s29 = scalar_select %p2979_p9, 1, 0 }
  0x80   : > { %s2989_s26 = scalar_lea.hbm %s3310_s1, %s2137_s28  ;;  %s386_s0 = scalar_lea.vmem [#allocation4], %s2136_s30 }
  0x81   : > { %s393_s10 = sshll.u32 %s386_s0, 4  ;;  %p2993_p10 = pnand %p2377_p5, %p2956_p11  ;;  %s2997_s10 = int_to_ptr.vmem [resolvable:$true] %s393_s10 }
  0x82   : > { %s383_s9 = scalar_lea.sflag [#allocation5], %s382_s23  ;;  %s2595_s4 = scalar_lea.hbm %s2989_s26, 64 }
  0x83   : > { %p2596_p8 = scmp.ne.s32.totalorder %s2989_s26, %s2595_s4  ;;  %p2597_p1 = pneg %p2993_p10 }
  0x84   : > { %s2600_s12 = scalar_lea.hbm %s3310_s1, 128  ;;  %p2601_p11 = scmp.lt.u32.totalorder %s2989_s26, %s3310_s1 }
  0x85   : > { %p2598_p3 = pnand %p2597_p1, %p2596_p8  ;;  %p2602_p6 = scmp.lt.u32.totalorder %s2600_s12, %s2595_s4 }
  0x86   : > { %p2604_p0 = scmp.lt.u32.totalorder %s2595_s4, %s2989_s26 }
  0x87   : > { %p2599_p12 = pneg %p2598_p3  ;;  %p2603_p13 = por %p2602_p6, %p2601_p11 }
  0x89   : > { %p2605_p7 = por %p2604_p0, %p2603_p13 }
  0x8b   : > { %p2606_p5 = pnand %p2605_p7, %p2599_p12 }
  0x8d   : > { %2609 = shalt.err (!%p2606_p5)
}
  0x8e   : > { %s2610_s23 = scalar_lea.vmem %s2997_s10, 64  ;;  %s2725_s0 = smov [#allocation4]  }
  0x8f   : > { %p2611_p8 = scmp.ne.s32.totalorder %s2997_s10, %s2610_s23  ;;  %s2615_s28 = sshll.u32 %s2725_s0, 4  ;;  %s2616_s28 = int_to_ptr.vmem [resolvable:$false] %s2615_s28 }
  0x90   : > { %s2617_s30 = scalar_lea.vmem %s2616_s28, 128  ;;  %p2618_p4 = scmp.lt.s32.totalorder %s2997_s10, %s2616_s28 }
  0x91   : > { %p2613_p3 = pnand %p2611_p8, %p2597_p1  ;;  %p2619_p11 = scmp.lt.s32.totalorder %s2617_s30, %s2610_s23 }
  0x93   : > { %p2614_p9 = pneg %p2613_p3  ;;  %p2620_p6 = por %p2619_p11, %p2618_p4 }
  0x95   : > { %p2621_p13 = pnand %p2620_p6, %p2614_p9 }
  0x97   : > { %2624 = shalt.err (!%p2621_p13)
}
  0x98   : > { %2368 = dma.hbm_to_vmem [thread:$0]  (!%p2993_p10), %s2989_s26, 64, %s2997_s10, %s383_s9  }
  0x99   : > { %p3344_p12 = scmp.ne.s32.totalorder %s3333_s21, 0 }
  0x9a   : > { %s3027_s4 = sand.u32 (!%p3344_p12), 1, %s2699_s14  }
  0x9b   : > { %402 = sbr.rel (%p3344_p12) target bundleno = 2574 (0xa0e), region = 60  ;;  %s2139_s12 = sshll.u32 (!%p3344_p12), %s3027_s4, 2 }
  0x9c   : > { %s405_s19 = scalar_lea.sflag (!%p3344_p12), [#allocation5], %s3027_s4  ;;  %s408_s11 = scalar_lea.vmem (!%p3344_p12), [#allocation4], %s2139_s12 }
  0xa2   : > { %2678 = dma.done.wait (%p2968_p2), %s405_s19, 64  }
  0xa3   : > { %2680 = vsyncadd (%p2968_p2), %s405_s19, 4294967232  ;;  %p3345_p4 = scmp.ne.s32.totalorder %s3332_s20, 0 }
  0xa5   : > { %2682 = dma.done.wait (%p3345_p4), [#allocation8], 512  }
  0xa6   : > { %2684 = vsyncadd (%p3345_p4), [#allocation8], 4294966784 }
  0xa7   : > { %2686 = dma.done.wait (%p3345_p4), [#allocation11], 512  }
  0xa8   : > { %2688 = vsyncadd (%p3345_p4), [#allocation11], 4294966784  ;;  %v2726_v0 = vmov 0.0   ;;  %vm2727_vm0 = vmmov 0   ;;  %p468_p2 = scmp.lt.s32.totalorder %s2707_s16, 1  ;;  %v2449_v1 = vld [vmem:[%s3312_s3] sm:$0xff]   ;;  %v623_v30 = vlaneseq }
  0xa9   : > { %2232 = vmatprep.subr.bf16.mxu0 %v2726_v0  ;;  %2236 = vmatprep.mubr.msk.bf16.mxu0 %vm2727_vm0, %v2726_v0  ;;  %v2450_v2 = vld [vmem:[%s3312_s3 + $0x8] sm:$0xff]   ;;  %v481_v3 = vld [vmem:[%s408_s11] sm:$0xf]  ;;  %vm503_vm1 = vcmask 261120   ;;  %s3346_s30 = sld [smem:[#allocation18_spill]]  ;;  %v2454_v9 = vld [vmem:[#allocation7 + $0x8] sm:$0xff]  }
  0xaa   : > { %2240 = vmatprep.subr.bf16.mxu1 %v2726_v0  ;;  %2244 = vmatprep.mubr.msk.bf16.mxu1 %vm2727_vm0, %v2726_v0  ;;  %s469_s21 = scalar_select %p468_p2, %s2707_s16, 1  ;;  %v2451_v4 = vld [vmem:[%s3311_s2] sm:$0xff]   ;;  %v2453_v5 = vld [vmem:[#allocation7] sm:$0xff]   ;;  %v2146_v10 = vld [vmem:[#allocation12 + $0x1] ss:$0 sm:$0xff]  ;;  %v624_v34 = vshrl.u32 %v623_v30, 7 }
  0xab   : > { %2233 = vmatpush3.bf16.msra.mxu0 %v2449_v1  ;;  %2241 = vmatpush3.bf16.msra.mxu1 %v2453_v5  ;;  %v2452_v6 = vld [vmem:[%s3311_s2 + $0x8] sm:$0xff]   ;;  %s2728_s11 = smov 104   ;;  %v2158_v16 = vld [vmem:[#allocation12] ss:$0 sm:$0xff]  ;;  %s2730_s26 = smov 112   ;;  %vm758_vm2 = vcmask 60416  }
  0xac   : > { %s2145_s24 = sshll.u32 %s469_s21, 3  ;;  %2234 = vmatprep.subr.bf16.mxu0 %v2726_v0  ;;  %2242 = vmatprep.subr.bf16.mxu1 %v2726_v0  ;;  %s2729_s21 = smov 120   ;;  %v2150_v22 = vld [vmem:[#allocation12 + $0x2] ss:$0 sm:$0xff]  ;;  %v2731_v28 = vmov 1983009808  }
  0xad   : > { %v621_v29 = vunpack.c.l.s4 %v2731_v28  ;;  %v2732_v31 = vmov 1934713408   ;;  %vm1141_vm3 = vcmask 64512   ;;  %vm1373_vm4 = vcmask 1043456   ;;  %s2733_s20 = smov 16   ;;  %s2734_s10 = smov 8  }
  0xae   : > { %v653_v32 = vunpack.c.l.s4 %v2732_v31  ;;  %vm1708_vm5 = vcmask 130048   ;;  %vm1710_vm6 = vcmask 195584   ;;  %s3347_s0 = sld [smem:[#allocation20_spill]]  ;;  %vm1910_vm7 = vcmask 523264   ;;  %s1982_s22 = scalar_lea.sflag [#allocation6], %s3027_s4 }
  0xaf   : > { %s474_s12 = scalar_lea.vmem %s3346_s30, %s2145_s24  ;;  %2235 = vmatpush3.bf16.msra.mxu0 %v2450_v2  ;;  %2243 = vmatpush3.bf16.msra.mxu1 %v2454_v9  ;;  %v622_v33 = vunpack.c.0.s8 %v621_v29  ;;  %s2735_s24 = smov 24  }
  0xb0   : > { %2248 = vmatprep.subr.bf16.mxu0 %v2726_v0  ;;  %v3068_v7 = vld [vmem:[%s474_s12] sm:$0xff]  ;;  %2256 = vmatprep.subr.bf16.mxu1 %v2726_v0  ;;  %v654_v37 = vunpack.c.0.s8 %v653_v32  ;;  %s3349_s12 = sld [smem:[#allocation22_spill]]  ;;  %p3350_p10 = scmp.ne.s32.totalorder %s3341_s25, 0 }
  0xb1   : > { %v917_v8 = vpack.c.bf16 %v3068_v7, %v3068_v7  ;;  %v3095_v38 = vsub.s32 %v622_v33, %v624_v34 }
  0xb2   : > { %2237 = vmatmul.mubr.msk.bf16.vlgmr.msra.gmra.mrb[0].mxu0 %vm503_vm1, %v481_v3  ;;  %2245 = vmatmul.mubr.msk.bf16.vlgmr.msra.gmra.mrb[0].mxu1 %vm503_vm1, %v481_v3  ;;  %v3097_v44 = vsub.s32 %v654_v37, %v624_v34 }
  0xb3   : > { %2249 = vmatpush3.bf16.msra.mxu0 %v2451_v4  ;;  %2252 = vmatprep.mubr.msk.bf16.mxu0 %vm2727_vm0, %v2726_v0 }
  0xb4   : > { %2250 = vmatprep.subr.bf16.mxu0 %v2726_v0  ;;  %2258 = vmatprep.mubr.msk.bf16.mxu1 %vm2727_vm0, %v2726_v0 }
  0xb7   : > { %2251 = vmatpush3.bf16.msra.mxu0 %v2452_v6 }
  0xb8   : > { %2262 = vmatprep.subr.bf16.mxu0 %v2726_v0 }
  0xba   : > { %2253 = vmatmul.mubr.msk.bf16.vlgmr.msra.gmra.mrb[4].mxu0 %vm503_vm1, %v917_v8 }
  0xbb   : > { %2264 = vmatprep.mubr.msk.bf16.mxu0 %vm2727_vm0, %v2726_v0 }
 0x185   : > { %v541_v11 = vpop.f32.mrb[0].mxu0  ;;  %v602_v23 = vpop.f32.mrb[0].mxu1 }
 0x186   : > { %v542_v12 = vadd.f32 %v2146_v10, %v541_v11  ;;  %v2238_v13 = vpop.f32.mrb[1].mxu0  ;;  %v3090_v24 = vadd.f32 %v2150_v22, %v602_v23  ;;  %v2246_v25 = vpop.f32.mrb[1].mxu1 }
 0x187   : > { %v544_v14 = vpop.f32.mrb[2].mxu0  ;;  %v605_v26 = vpop.f32.mrb[2].mxu1 }
 0x188   : > { %615 = vrot.lane.b32.xlu1 %v542_v12, %s2728_s11  ;;  %609 = vrot.lane.b32.xlu0 %v542_v12, %s2729_s21  ;;  %v2239_v15 = vpop.f32.mrb[3].mxu0  ;;  %v2247_v27 = vpop.f32.mrb[3].mxu1 }
 0x18c   : > { %612 = vrot.lane.b32.xlu0 %v542_v12, %s2730_s26 }
 0x18d   : > { %v977_v17 = vpop.f32.mrb[4].mxu0 }
 0x18e   : > { %v3085_v18 = vadd.f32 %v2158_v16, %v977_v17  ;;  %v2254_v19 = vpop.f32.mrb[5].mxu0 }
 0x18f   : > { %v980_v20 = vpop.f32.mrb[6].mxu0 }
 0x190   : > { %987 = vrot.lane.b32.xlu0 %v3085_v18, %s2730_s26  ;;  %984 = vrot.lane.b32.xlu1 %v3085_v18, %s2729_s21  ;;  %v2255_v21 = vpop.f32.mrb[7].mxu0 }
 0x194   : > { %990 = vrot.lane.b32.xlu1 %v3085_v18, %s2728_s11  ;;  %764 = vrot.lane.b32.xlu0 %v3090_v24, %s2729_s21 }
 0x198   : > { %767 = vrot.lane.b32.xlu1 %v3090_v24, %s2730_s26  ;;  %770 = vrot.lane.b32.xlu0 %v3090_v24, %s2728_s11 }
 0x1fa   : > { %v616_v35 = vpop.permute.xlu1 %615  ;;  %v610_v36 = vpop.permute.xlu0 %609 }
 0x1fb   : > { %v634_v39 = vcombine.low %v610_v36, %v616_v35  ;;  %v635_v40 = vcombine.high %v610_v36, %v616_v35 }
 0x1fd   : > { %v642_v45 = vrot.slane %v634_v39, %v3095_v38  ;;  %v649_v46 = vrot.slane %v635_v40, %v3095_v38 }
 0x1fe   : > { %v613_v41 = vpop.permute.xlu0 %612 }
 0x1ff   : > { %v618_v42 = vcombine.low %v542_v12, %v613_v41  ;;  %v619_v43 = vcombine.high %v542_v12, %v613_v41 }
 0x201   : > { %v626_v47 = vrot.slane %v618_v42, %v3095_v38  ;;  %v633_v48 = vrot.slane %v619_v43, %v3095_v38 }
 0x202   : > { %v985_v49 = vpop.permute.xlu1 %984  ;;  %v988_v54 = vpop.permute.xlu0 %987 }
 0x203   : > { %v650_v50 = vcombine.low %v626_v47, %v642_v45  ;;  %v651_v51 = vcombine.high %v626_v47, %v642_v45  ;;  %v666_v52 = vcombine.low %v633_v48, %v649_v46  ;;  %v667_v53 = vcombine.high %v633_v48, %v649_v46 }
 0x204   : > { %v993_v59 = vcombine.low %v3085_v18, %v988_v54  ;;  %v994_v60 = vcombine.high %v3085_v18, %v988_v54 }
 0x205   : > { %v658_v55 = vrot.slane %v650_v50, %v3097_v44  ;;  %v665_v56 = vrot.slane %v651_v51, %v3097_v44  ;;  %v674_v57 = vrot.slane %v666_v52, %v3097_v44  ;;  %v681_v58 = vrot.slane %v667_v53, %v3097_v44 }
 0x206   : > { %v991_v61 = vpop.permute.xlu1 %990  ;;  %v1001_v10 = vrot.slane %v993_v59, %v3095_v38  ;;  %v1008_v11 = vrot.slane %v994_v60, %v3095_v38 }
 0x207   : > { %v686_v62 = vcombine.low %v658_v55, %v665_v56  ;;  %v2154_v63 = vcombine.high %v658_v55, %v665_v56  ;;  %v702_v1 = vcombine.low %v674_v57, %v681_v58  ;;  %v2155_v2 = vcombine.high %v674_v57, %v681_v58 }
 0x208   : > { %v1009_v3 = vcombine.low %v985_v49, %v991_v61  ;;  %v1010_v4 = vcombine.high %v985_v49, %v991_v61 }
 0x209   : > { %v693_v5 = vrot.slane %v686_v62, %v3095_v38  ;;  %v701_v6 = vrot.slane %v2154_v63, %v3095_v38  ;;  %v709_v8 = vrot.slane %v702_v1, %v3095_v38  ;;  %v717_v9 = vrot.slane %v2155_v2, %v3095_v38 }
 0x20a   : > { %v1017_v12 = vrot.slane %v1009_v3, %v3095_v38  ;;  %v1024_v13 = vrot.slane %v1010_v4, %v3095_v38 }
 0x20b   : > { %v718_v14 = vcombine.low %v693_v5, %v701_v6  ;;  %v719_v15 = vcombine.high %v693_v5, %v701_v6  ;;  %v734_v16 = vcombine.low %v709_v8, %v717_v9  ;;  %v735_v17 = vcombine.high %v709_v8, %v717_v9 }
 0x20c   : > { %v1025_v18 = vcombine.low %v1001_v10, %v1017_v12  ;;  %v1026_v19 = vcombine.high %v1001_v10, %v1017_v12  ;;  %v1041_v20 = vcombine.low %v1008_v11, %v1024_v13  ;;  %v1042_v21 = vcombine.high %v1008_v11, %v1024_v13  ;;  %v765_v11 = vpop.permute.xlu0 %764  ;;  %v768_v12 = vpop.permute.xlu1 %767 }
 0x20d   : > { %v726_v22 = vrot.slane %v718_v14, %v3097_v44  ;;  %v733_v23 = vrot.slane %v719_v15, %v3097_v44  ;;  %v742_v25 = vrot.slane %v734_v16, %v3097_v44  ;;  %v749_v26 = vrot.slane %v735_v17, %v3097_v44 }
 0x20e   : > { %v1033_v27 = vrot.slane %v1025_v18, %v3097_v44  ;;  %v1040_v28 = vrot.slane %v1026_v19, %v3097_v44  ;;  %v1049_v29 = vrot.slane %v1041_v20, %v3097_v44  ;;  %v1056_v30 = vrot.slane %v1042_v21, %v3097_v44 }
 0x20f   : > { %v750_v31 = vcombine.low %v726_v22, %v742_v25  ;;  %v751_v32 = vcombine.high %v726_v22, %v742_v25  ;;  %v752_v33 = vcombine.low %v733_v23, %v749_v26  ;;  %v753_v34 = vcombine.high %v733_v23, %v749_v26 }
 0x210   : > { %v1061_v35 = vcombine.low %v1033_v27, %v1040_v28  ;;  %v2162_v36 = vcombine.high %v1033_v27, %v1040_v28  ;;  %v1077_v37 = vcombine.low %v1049_v29, %v1056_v30  ;;  %v2163_v39 = vcombine.high %v1049_v29, %v1056_v30  ;;  %v771_v15 = vpop.permute.xlu0 %770 }
 0x211   : > { %v754_v40 = vpack.c.bf16 %v750_v31, %v750_v31  ;;  %v755_v41 = vpack.c.bf16 %v751_v32, %v751_v32  ;;  %v756_v42 = vpack.c.bf16 %v752_v33, %v752_v33  ;;  %v757_v43 = vpack.c.bf16 %v753_v34, %v753_v34 }
 0x212   : > { %v1068_v45 = vrot.slane %v1061_v35, %v3095_v38  ;;  %v1076_v46 = vrot.slane %v2162_v36, %v3095_v38  ;;  %v1084_v47 = vrot.slane %v1077_v37, %v3095_v38  ;;  %v1092_v48 = vrot.slane %v2163_v39, %v3095_v38 }
 0x213   : > { %759 = vst.msk [vmem:[#allocation2] sm:$0xf] %vm758_vm2, %v754_v40  ;;  %760 = vst.msk [vmem:[#allocation2 + $0x4] sm:$0xf] %vm758_vm2, %v755_v41  ;;  %v773_v13 = vcombine.low %v3090_v24, %v768_v12  ;;  %v774_v14 = vcombine.high %v3090_v24, %v768_v12  ;;  %v789_v16 = vcombine.low %v765_v11, %v771_v15 }
 0x214   : > { %761 = vst.msk [vmem:[#allocation2 + $0x8] sm:$0xf] %vm758_vm2, %v756_v42  ;;  %762 = vst.msk [vmem:[#allocation2 + $0xc] sm:$0xf] %vm758_vm2, %v757_v43  ;;  %v1093_v49 = vcombine.low %v1068_v45, %v1076_v46  ;;  %v1109_v50 = vcombine.low %v1084_v47, %v1092_v48  ;;  %v1094_v57 = vcombine.high %v1068_v45, %v1076_v46 }
 0x215   : > { %v1110_v58 = vcombine.high %v1084_v47, %v1092_v48  ;;  %v790_v17 = vcombine.high %v765_v11, %v771_v15  ;;  %v781_v18 = vrot.slane %v773_v13, %v3095_v38  ;;  %v788_v19 = vrot.slane %v774_v14, %v3095_v38 }
 0x216   : > { %v1101_v51 = vrot.slane %v1093_v49, %v3097_v44  ;;  %v1117_v52 = vrot.slane %v1109_v50, %v3097_v44  ;;  %v1108_v2 = vrot.slane %v1094_v57, %v3097_v44  ;;  %v797_v20 = vrot.slane %v789_v16, %v3095_v38 }
 0x217   : > { %v1124_v3 = vrot.slane %v1110_v58, %v3097_v44  ;;  %v804_v21 = vrot.slane %v790_v17, %v3095_v38 }
 0x218   : > { %v1125_v59 = vcombine.low %v1101_v51, %v1117_v52  ;;  %v1126_v60 = vcombine.high %v1101_v51, %v1117_v52  ;;  %v805_v22 = vcombine.low %v781_v18, %v797_v20  ;;  %v806_v23 = vcombine.high %v781_v18, %v797_v20 }
 0x219   : > { %v1127_v6 = vcombine.low %v1108_v2, %v1124_v3  ;;  %v1128_v8 = vcombine.high %v1108_v2, %v1124_v3  ;;  %v821_v25 = vcombine.low %v788_v19, %v804_v21  ;;  %v822_v26 = vcombine.high %v788_v19, %v804_v21 }
 0x21a   : > { %v1133_v53 = vld [vmem:[#allocation2] sm:$0xf]  ;;  %v1134_v54 = vld [vmem:[#allocation2 + $0x4] sm:$0xf]  ;;  %v1129_v63 = vpack.c.bf16 %v1125_v59, %v1125_v59  ;;  %v1130_v1 = vpack.c.bf16 %v1126_v60, %v1126_v60  ;;  %v813_v27 = vrot.slane %v805_v22, %v3097_v44  ;;  %v820_v28 = vrot.slane %v806_v23, %v3097_v44 }
 0x21b   : > { %v1146_v55 = vsel %vm1141_vm3, %v1133_v53, 0  ;;  %v1192_v56 = vsel %vm1141_vm3, %v1134_v54, 0  ;;  %v1135_v61 = vld [vmem:[#allocation2 + $0x8] sm:$0xf]  ;;  %v1136_v62 = vld [vmem:[#allocation2 + $0xc] sm:$0xf]  ;;  %v1131_v9 = vpack.c.bf16 %v1127_v6, %v1127_v6  ;;  %v1132_v10 = vpack.c.bf16 %v1128_v8, %v1128_v8 }
 0x21c   : > { %2257 = vmatpush3.bf16.xpose.msra.mxu1 %v1146_v55  ;;  %2263 = vmatpush3.bf16.xpose.msra.mxu0 %v1192_v56  ;;  %v1238_v4 = vsel %vm1141_vm3, %v1135_v61, 0  ;;  %v1284_v5 = vsel %vm1141_vm3, %v1136_v62, 0  ;;  %v829_v24 = vrot.slane %v821_v25, %v3097_v44  ;;  %v836_v29 = vrot.slane %v822_v26, %v3097_v44 }
 0x21d   : > { %2268 = vmatprep.subr.bf16.mxu1 %v2726_v0  ;;  %2274 = vmatprep.subr.bf16.mxu0 %v2726_v0  ;;  %v841_v30 = vcombine.low %v813_v27, %v820_v28  ;;  %v2156_v31 = vcombine.high %v813_v27, %v820_v28 }
 0x21e   : > { %v857_v32 = vcombine.low %v829_v24, %v836_v29  ;;  %v2157_v33 = vcombine.high %v829_v24, %v836_v29 }
 0x21f   : > { %v848_v34 = vrot.slane %v841_v30, %v3095_v38  ;;  %v856_v35 = vrot.slane %v2156_v31, %v3095_v38 }
 0x220   : > { %v864_v36 = vrot.slane %v857_v32, %v3095_v38  ;;  %v872_v37 = vrot.slane %v2157_v33, %v3095_v38 }
 0x221   : > { %v873_v39 = vcombine.low %v848_v34, %v856_v35  ;;  %v874_v40 = vcombine.high %v848_v34, %v856_v35 }
 0x222   : > { %v889_v41 = vcombine.low %v864_v36, %v872_v37  ;;  %v890_v42 = vcombine.high %v864_v36, %v872_v37 }
 0x223   : > { %2259 = vmatmul.mubr.msk.bf16.vlgmr.msra.gmra.mrb[4].mxu1 %vm1141_vm3, %v1129_v63  ;;  %2265 = vmatmul.mubr.msk.bf16.vlgmr.msra.gmra.mrb[8].mxu0 %vm1141_vm3, %v1130_v1  ;;  %v881_v43 = vrot.slane %v873_v39, %v3097_v44  ;;  %v888_v45 = vrot.slane %v874_v40, %v3097_v44 }
 0x224   : > { %2269 = vmatpush3.bf16.xpose.msra.mxu1 %v1238_v4  ;;  %2275 = vmatpush3.bf16.xpose.msra.mxu0 %v1284_v5  ;;  %v897_v46 = vrot.slane %v889_v41, %v3097_v44  ;;  %v904_v47 = vrot.slane %v890_v42, %v3097_v44 }
 0x225   : > { %2270 = vmatprep.mubr.msk.bf16.mxu1 %vm2727_vm0, %v2726_v0  ;;  %2276 = vmatprep.mubr.msk.bf16.mxu0 %vm2727_vm0, %v2726_v0 }
 0x226   : > { %2280 = vmatprep.subr.bf16.mxu1 %v2726_v0  ;;  %2286 = vmatprep.subr.bf16.mxu0 %v2726_v0  ;;  %v905_v48 = vcombine.low %v881_v43, %v897_v46  ;;  %v906_v49 = vcombine.high %v881_v43, %v897_v46  ;;  %v907_v50 = vcombine.low %v888_v45, %v904_v47 }
 0x227   : > { %v908_v51 = vcombine.high %v888_v45, %v904_v47 }
 0x228   : > { %v909_v52 = vpack.c.bf16 %v905_v48, %v905_v48  ;;  %v910_v53 = vpack.c.bf16 %v906_v49, %v906_v49  ;;  %v911_v54 = vpack.c.bf16 %v907_v50, %v907_v50 }
 0x229   : > { %v912_v55 = vpack.c.bf16 %v908_v51, %v908_v51 }
 0x22a   : > { %913 = vst.msk [vmem:[#allocation3] sm:$0xf] %vm758_vm2, %v909_v52  ;;  %914 = vst.msk [vmem:[#allocation3 + $0x4] sm:$0xf] %vm758_vm2, %v910_v53 }
 0x22b   : > { %2271 = vmatmul.mubr.msk.bf16.vlgmr.msra.gmra.mrb[8].mxu1 %vm1141_vm3, %v1131_v9  ;;  %2277 = vmatmul.mubr.msk.bf16.vlgmr.msra.gmra.mrb[12].mxu0 %vm1141_vm3, %v1132_v10  ;;  %915 = vst.msk [vmem:[#allocation3 + $0x8] sm:$0xf] %vm758_vm2, %v911_v54  ;;  %916 = vst.msk [vmem:[#allocation3 + $0xc] sm:$0xf] %vm758_vm2, %v912_v55 }
 0x22c   : > { %2282 = vmatprep.mubr.msk.bf16.mxu1 %vm2727_vm0, %v2726_v0  ;;  %2288 = vmatprep.mubr.msk.bf16.mxu0 %vm2727_vm0, %v2726_v0 }
 0x231   : > { %v1137_v56 = vld [vmem:[#allocation3] sm:$0xf]  ;;  %v1138_v57 = vld [vmem:[#allocation3 + $0x4] sm:$0xf] }
 0x232   : > { %v1375_v58 = vsel %vm1373_vm4, %v1137_v56, 0  ;;  %v1421_v59 = vsel %vm1373_vm4, %v1138_v57, 0  ;;  %v1139_v31 = vld [vmem:[#allocation3 + $0x8] sm:$0xf]  ;;  %v1140_v35 = vld [vmem:[#allocation3 + $0xc] sm:$0xf] }
 0x233   : > { %2281 = vmatpush3.bf16.msra.mxu1 %v1375_v58  ;;  %2287 = vmatpush3.bf16.msra.mxu0 %v1421_v59  ;;  %v1467_v39 = vsel %vm1373_vm4, %v1139_v31, 0  ;;  %v1513_v40 = vsel %vm1373_vm4, %v1140_v35, 0  ;;  %v2456_v35 = vld [vmem:[#allocation9 + $0x8] sm:$0xff]  }
 0x234   : > { %2292 = vmatprep.subr.bf16.mxu1 %v2726_v0  ;;  %2298 = vmatprep.subr.bf16.mxu0 %v2726_v0 }
 0x2f6   : > { %v1182_v60 = vpop.f32.mrb[4].mxu1  ;;  %v1228_v61 = vpop.f32.mrb[8].mxu0 }
 0x2f7   : > { %v2260_v62 = vpop.f32.mrb[5].mxu1  ;;  %v2266_v63 = vpop.f32.mrb[9].mxu0  ;;  %v1326_v1 = vsel %vm1141_vm3, %v1182_v60, -inf  ;;  %v1329_v2 = vsel %vm1141_vm3, %v1228_v61, -inf }
 0x2f8   : > { %1327 = vmax.xlane.f32.xlu1 %v1326_v1  ;;  %v1185_v3 = vpop.f32.mrb[6].mxu1  ;;  %1330 = vmax.xlane.f32.xlu0 %v1329_v2  ;;  %v1231_v4 = vpop.f32.mrb[10].mxu0 }
 0x2f9   : > { %v2261_v5 = vpop.f32.mrb[7].mxu1  ;;  %v2267_v6 = vpop.f32.mrb[11].mxu0 }
 0x2fe   : > { %v1274_v8 = vpop.f32.mrb[8].mxu1  ;;  %v1320_v9 = vpop.f32.mrb[12].mxu0 }
 0x2ff   : > { %v2272_v10 = vpop.f32.mrb[9].mxu1  ;;  %v2278_v11 = vpop.f32.mrb[13].mxu0  ;;  %v1332_v12 = vsel %vm1141_vm3, %v1274_v8, -inf  ;;  %v1335_v13 = vsel %vm1141_vm3, %v1320_v9, -inf }
 0x300   : > { %v1277_v14 = vpop.f32.mrb[10].mxu1  ;;  %1333 = vmax.xlane.f32.xlu0 %v1332_v12  ;;  %1336 = vmax.xlane.f32.xlu1 %v1335_v13  ;;  %v1323_v15 = vpop.f32.mrb[14].mxu0 }
 0x301   : > { %v2273_v16 = vpop.f32.mrb[11].mxu1  ;;  %v2279_v17 = vpop.f32.mrb[15].mxu0 }
 0x385   : > { %v1328_v18 = vpop.xlane.xlu1 %1327  ;;  %v1331_v19 = vpop.xlane.xlu0 %1330 }
 0x386   : > { %v1338_v20 = vsub.f32 %v1182_v60, %v1328_v18  ;;  %v1339_v21 = vsub.f32 %v1228_v61, %v1331_v19 }
 0x388   : > { %v1342_v22 = vmul.f32 1.442695, %v1338_v20  ;;  %v1344_v23 = vmul.f32 1.442695, %v1339_v21 }
 0x38a   : > { %2463 = vpow2.f32 %v1342_v22 }
 0x38b   : > { %2465 = vpow2.f32 %v1344_v23 }
 0x38d   : > { %v1334_v25 = vpop.xlane.xlu0 %1333  ;;  %v1337_v26 = vpop.xlane.xlu1 %1336 }
 0x38e   : > { %v1340_v27 = vsub.f32 %v1274_v8, %v1334_v25  ;;  %v1341_v28 = vsub.f32 %v1320_v9, %v1337_v26 }
 0x390   : > { %v1346_v24 = vmul.f32 1.442695, %v1340_v27  ;;  %v1348_v29 = vmul.f32 1.442695, %v1341_v28  ;;  %v2455_v27 = vld [vmem:[#allocation9] sm:$0xff]  }
 0x392   : > { %2467 = vpow2.f32 %v1346_v24 }
 0x393   : > { %2469 = vpow2.f32 %v1348_v29 }
 0x394   : > { %v2464_v30 = vpop.eup %2463 }
 0x395   : > { %v2466_v32 = vpop.eup %2465  ;;  %v1350_v33 = vsel %vm1141_vm3, %v2464_v30, 0.0  ;;  %v1366_v34 = vpack.c.bf16 %v2464_v30, %v2464_v30 }
 0x396   : > { %1351 = vadd.xlane.f32.xlu0 %v1350_v33  ;;  %v1353_v36 = vsel %vm1141_vm3, %v2466_v32, 0.0  ;;  %v1367_v37 = vpack.c.bf16 %v2466_v32, %v2466_v32 }
 0x397   : > { %1354 = vadd.xlane.f32.xlu1 %v1353_v36  ;;  %2283 = vmatmul.mubr.msk.bf16.vlgmr.msra.gmra.mrb[12].mxu1 %vm1141_vm3, %v1366_v34 }
 0x398   : > { %2289 = vmatmul.mubr.msk.bf16.vlgmr.msra.gmra.mrb[16].mxu0 %vm1141_vm3, %v1367_v37  ;;  %2293 = vmatpush3.bf16.msra.mxu1 %v1467_v39 }
 0x399   : > { %2299 = vmatpush3.bf16.msra.mxu0 %v1513_v40  ;;  %2294 = vmatprep.mubr.msk.bf16.mxu1 %vm2727_vm0, %v2726_v0 }
 0x39a   : > { %2300 = vmatprep.mubr.msk.bf16.mxu0 %vm2727_vm0, %v2726_v0  ;;  %2304 = vmatprep.subr.bf16.mxu1 %v2726_v0 }
 0x39b   : > { %2312 = vmatprep.subr.bf16.mxu0 %v2726_v0 }
 0x39c   : > { %v2468_v41 = vpop.eup %2467 }
 0x39d   : > { %v2470_v42 = vpop.eup %2469  ;;  %v1356_v43 = vsel %vm1141_vm3, %v2468_v41, 0.0  ;;  %v1368_v45 = vpack.c.bf16 %v2468_v41, %v2468_v41 }
 0x39e   : > { %1357 = vadd.xlane.f32.xlu0 %v1356_v43  ;;  %v1359_v46 = vsel %vm1141_vm3, %v2470_v42, 0.0  ;;  %v1369_v47 = vpack.c.bf16 %v2470_v42, %v2470_v42 }
 0x39f   : > { %1360 = vadd.xlane.f32.xlu1 %v1359_v46  ;;  %2295 = vmatmul.mubr.msk.bf16.vlgmr.msra.gmra.mrb[16].mxu1 %vm1141_vm3, %v1368_v45 }
 0x3a0   : > { %2301 = vmatmul.mubr.msk.bf16.vlgmr.msra.gmra.mrb[20].mxu0 %vm1141_vm3, %v1369_v47  ;;  %2308 = vmatprep.mubr.msk.bf16.mxu1 %vm2727_vm0, %v2726_v0 }
 0x3a1   : > { %2316 = vmatprep.mubr.msk.bf16.mxu0 %vm2727_vm0, %v2726_v0  ;;  %2305 = vmatpush3.bf16.msra.mxu1 %v2455_v27 }
 0x3a2   : > { %2306 = vmatprep.subr.bf16.mxu1 %v2726_v0 }
 0x3a5   : > { %2307 = vmatpush3.bf16.msra.mxu1 %v2456_v35 }
 0x3a6   : > { %2320 = vmatprep.subr.bf16.mxu1 %v2726_v0 }
 0x423   : > { %v1352_v48 = vpop.xlane.xlu0 %1351 }
 0x424   : > { %v1355_v49 = vpop.xlane.xlu1 %1354  ;;  %2471 = vrcp.f32 %v1352_v48 }
 0x425   : > { %2473 = vrcp.f32 %v1355_v49 }
 0x42b   : > { %v1358_v50 = vpop.xlane.xlu0 %1357 }
 0x42c   : > { %v1361_v51 = vpop.xlane.xlu1 %1360  ;;  %2475 = vrcp.f32 %v1358_v50 }
 0x42d   : > { %2477 = vrcp.f32 %v1361_v51 }
 0x42e   : > { %v2472_v60 = vpop.eup %2471 }
 0x42f   : > { %v2474_v61 = vpop.eup %2473 }
 0x436   : > { %v2476_v62 = vpop.eup %2475 }
 0x437   : > { %v2478_v1 = vpop.eup %2477 }
 0x46a   : > { %v1411_v52 = vpop.f32.mrb[12].mxu1 }
 0x46b   : > { %v1457_v53 = vpop.f32.mrb[16].mxu0  ;;  %v2284_v54 = vpop.f32.mrb[13].mxu1  ;;  %v1555_v2 = vmul.f32 %v2472_v60, %v1411_v52 }
 0x46c   : > { %v2290_v55 = vpop.f32.mrb[17].mxu0  ;;  %v1414_v56 = vpop.f32.mrb[14].mxu1  ;;  %v1556_v6 = vmul.f32 %v2474_v61, %v1457_v53 }
 0x46d   : > { %v1460_v57 = vpop.f32.mrb[18].mxu0  ;;  %v2285_v58 = vpop.f32.mrb[15].mxu1 }
 0x46e   : > { %v2291_v59 = vpop.f32.mrb[19].mxu0 }
 0x46f   : > { %v2174_v59 = vld [vmem:[#allocation12 + $0x3] ss:$0 sm:$0xff] }
 0x472   : > { %v1503_v63 = vpop.f32.mrb[16].mxu1 }
 0x473   : > { %v1557_v3 = vmul.f32 %v2476_v62, %v1503_v63  ;;  %v1549_v4 = vpop.f32.mrb[20].mxu0  ;;  %v2296_v5 = vpop.f32.mrb[17].mxu1 }
 0x474   : > { %v1558_v8 = vmul.f32 %v2478_v1, %v1549_v4  ;;  %v2302_v9 = vpop.f32.mrb[21].mxu0  ;;  %v1506_v10 = vpop.f32.mrb[18].mxu1 }
 0x475   : > { %v1559_v11 = vcombine.low %v1555_v2, %v1557_v3  ;;  %v1560_v12 = vcombine.high %v1555_v2, %v1557_v3  ;;  %v1552_v13 = vpop.f32.mrb[22].mxu0  ;;  %v2297_v14 = vpop.f32.mrb[19].mxu1  ;;  %v2457_v10 = vld [vmem:[#allocation10] sm:$0xff]  }
 0x476   : > { %v1575_v15 = vcombine.low %v1556_v6, %v1558_v8  ;;  %v1576_v16 = vcombine.high %v1556_v6, %v1558_v8  ;;  %v2303_v17 = vpop.f32.mrb[23].mxu0  ;;  %2313 = vmatpush3.bf16.msra.mxu0 %v2457_v10 }
 0x477   : > { %v1567_v18 = vrot.slane %v1559_v11, %v3095_v38  ;;  %v1574_v19 = vrot.slane %v1560_v12, %v3095_v38  ;;  %v2458_v11 = vld [vmem:[#allocation10 + $0x8] sm:$0xff]   ;;  %2314 = vmatprep.subr.bf16.mxu0 %v2726_v0  ;;  %v2460_v12 = vld [vmem:[%s3347_s0 + $0x8] sm:$0xff]   ;;  %v2178_v17 = vld [vmem:[#allocation12 + $0x4] ss:$0 sm:$0xff] }
 0x478   : > { %v1583_v20 = vrot.slane %v1575_v15, %v3095_v38  ;;  %v1590_v21 = vrot.slane %v1576_v16, %v3095_v38 }
 0x47a   : > { %v1591_v22 = vcombine.low %v1567_v18, %v1583_v20  ;;  %v1592_v23 = vcombine.high %v1567_v18, %v1583_v20  ;;  %v1607_v25 = vcombine.low %v1574_v19, %v1590_v21  ;;  %v1608_v26 = vcombine.high %v1574_v19, %v1590_v21  ;;  %2315 = vmatpush3.bf16.msra.mxu0 %v2458_v11  ;;  %v2179_v19 = vld [vmem:[#allocation12 + $0x5] ss:$0 sm:$0xff] }
 0x47c   : > { %v1599_v28 = vrot.slane %v1591_v22, %v3097_v44  ;;  %v1606_v24 = vrot.slane %v1592_v23, %v3097_v44  ;;  %v1615_v29 = vrot.slane %v1607_v25, %v3097_v44  ;;  %v1622_v30 = vrot.slane %v1608_v26, %v3097_v44  ;;  %v2461_v23 = vld [vmem:[%s3347_s0 + $0x10] sm:$0xff]   ;;  %v2462_v25 = vld [vmem:[%s3347_s0 + $0x18] sm:$0xff]  }
 0x47e   : > { %v1627_v31 = vcombine.low %v1599_v28, %v1606_v24  ;;  %v2172_v32 = vcombine.high %v1599_v28, %v1606_v24  ;;  %v1643_v33 = vcombine.low %v1615_v29, %v1622_v30  ;;  %v2173_v34 = vcombine.high %v1615_v29, %v1622_v30 }
 0x480   : > { %v1634_v36 = vrot.slane %v1627_v31, %v3095_v38  ;;  %v1642_v37 = vrot.slane %v2172_v32, %v3095_v38  ;;  %v1650_v39 = vrot.slane %v1643_v33, %v3095_v38  ;;  %v1658_v40 = vrot.slane %v2173_v34, %v3095_v38  ;;  %v2184_v33 = vld [vmem:[#allocation12 + $0x8] ss:$0 sm:$0xff] }
 0x482   : > { %v1660_v41 = vcombine.high %v1634_v36, %v1642_v37  ;;  %v1676_v42 = vcombine.high %v1650_v39, %v1658_v40  ;;  %v1659_v43 = vcombine.low %v1634_v36, %v1642_v37  ;;  %v1675_v45 = vcombine.low %v1650_v39, %v1658_v40 }
 0x484   : > { %v1674_v46 = vrot.slane %v1660_v41, %v3097_v44  ;;  %v1690_v47 = vrot.slane %v1676_v42, %v3097_v44  ;;  %v1667_v48 = vrot.slane %v1659_v43, %v3097_v44  ;;  %v1683_v49 = vrot.slane %v1675_v45, %v3097_v44 }
 0x486   : > { %v1693_v50 = vcombine.low %v1674_v46, %v1690_v47  ;;  %v1692_v51 = vcombine.high %v1667_v48, %v1683_v49  ;;  %v1694_v52 = vcombine.high %v1674_v46, %v1690_v47  ;;  %v1691_v53 = vcombine.low %v1667_v48, %v1683_v49 }
 0x488   : > { %1700 = vrot.lane.b32.xlu1 %v1693_v50, %s2733_s20  ;;  %1696 = vrot.lane.b32.xlu0 %v1692_v51, %s2734_s10  ;;  %s3348_s20 = sld [smem:[#allocation21_spill]]  ;;  %s2144_s10 = sshll.u32 %s3027_s4, 3  ;;  %v2190_v51 = vld [vmem:[#allocation12 + $0x6] ss:$0 sm:$0xff] }
 0x489   : > { %s467_s9 = scalar_lea.vmem [#allocation13], %s2144_s10 }
 0x48a   : > { %s1996_s23 = sshll.u32 %s467_s9, 4  ;;  %s3261_s23 = int_to_ptr.vmem [resolvable:$true] %s1996_s23 }
 0x48b   : > { %s2625_s11 = scalar_lea.vmem %s3261_s23, 128 }
 0x48c   : > { %1704 = vrot.lane.b32.xlu1 %v1694_v52, %s2735_s24  ;;  %s2193_s24 = sshll.u32 %s2707_s16, 7  ;;  %p2626_p9 = scmp.ne.s32.totalorder %s3261_s23, %s2625_s11 }
 0x48d   : > { %s3259_s19 = scalar_lea.hbm %s3349_s12, %s2193_s24  ;;  %s2736_s16 = smov [#allocation13]  }
 0x48e   : > { %v2180_v26 = vld [vmem:[%s3348_s20] ss:$0 sm:$0xff]  ;;  %p2627_p1 = pnand %p2626_p9, %p3350_p10  ;;  %s2629_s21 = sshll.u32 %s2736_s16, 4  ;;  %s2630_s21 = int_to_ptr.vmem [resolvable:$false] %s2629_s21 }
 0x48f   : > { %s2631_s26 = scalar_lea.vmem %s2630_s21, 256  ;;  %p2632_p7 = scmp.lt.s32.totalorder %s3261_s23, %s2630_s21 }
 0x490   : > { %p2628_p0 = pneg %p2627_p1  ;;  %p2633_p5 = scmp.lt.s32.totalorder %s2631_s26, %s2625_s11 }
 0x492   : > { %p2634_p8 = por %p2633_p5, %p2632_p7 }
 0x494   : > { %p2635_p3 = pnand %p2634_p8, %p2628_p0 }
 0x4fa   : > { %v1701_v38 = vpop.permute.xlu1 %1700  ;;  %v1697_v54 = vpop.permute.xlu0 %1696 }
 0x4fb   : > { %v1707_v55 = vsel %vm1141_vm3, %v1691_v53, %v1697_v54  ;;  %v2191_v53 = vld [vmem:[#allocation12 + $0x7] ss:$0 sm:$0xff] }
 0x4fc   : > { %v1709_v57 = vsel %vm1708_vm5, %v1707_v55, %v1701_v38 }
 0x4fe   : > { %v1705_v56 = vpop.permute.xlu1 %1704 }
 0x4ff   : > { %v1711_v58 = vsel %vm1710_vm6, %v1709_v57, %v1705_v56 }
 0x500   : > { %v1712_v44 = vpack.c.bf16 %v1711_v58, %v1711_v58 }
 0x502   : > { %2309 = vmatmul.mubr.msk.bf16.vlgmr.msra.gmra.mrb[20].mxu1 %vm503_vm1, %v1712_v44 }
 0x503   : > { %2328 = vmatprep.mubr.msk.bf16.mxu1 %vm2727_vm0, %v2726_v0 }
 0x5d5   : > { %v1771_v60 = vpop.f32.mrb[20].mxu1 }
 0x5d6   : > { %v1772_v61 = vadd.f32 %v2174_v59, %v1771_v60  ;;  %v2310_v62 = vpop.f32.mrb[21].mxu1 }
 0x5d7   : > { %v1774_v63 = vpop.f32.mrb[22].mxu1 }
 0x5d8   : > { %v2311_v1 = vpop.f32.mrb[23].mxu1  ;;  %v1777_v2 = vadd.f32 %v1772_v61, %v3068_v7  ;;  %v2459_v7 = vld [vmem:[%s3347_s0] sm:$0xff]  }
 0x5d9   : > { %2321 = vmatpush3.bf16.msra.mxu1 %v2459_v7 }
 0x5da   : > { %v1778_v3 = vsel %vm503_vm1, %v1777_v2, 0.0  ;;  %2322 = vmatprep.subr.bf16.mxu1 %v2726_v0 }
 0x5db   : > { %1779 = vadd.xlane.f32.xlu0 %v1778_v3 }
 0x5dd   : > { %2323 = vmatpush3.bf16.msra.mxu1 %v2460_v12 }
 0x5de   : > { %2324 = vmatprep.subr.bf16.mxu1 %v2726_v0 }
 0x5e1   : > { %2325 = vmatpush3.bf16.msra.mxu1 %v2461_v23 }
 0x5e2   : > { %2326 = vmatprep.subr.bf16.mxu1 %v2726_v0 }
 0x5e5   : > { %2327 = vmatpush3.bf16.msra.mxu1 %v2462_v25 }
 0x668   : > { %v1780_v4 = vpop.xlane.xlu0 %1779 }
 0x669   : > { %v1782_v5 = vmul.f32 0.03125, %v1780_v4 }
 0x66b   : > { %v1783_v6 = vsub.f32 %v1777_v2, %v1782_v5 }
 0x66d   : > { %v1784_v8 = vmul.f32 %v1783_v6, %v1783_v6 }
 0x66f   : > { %v1785_v9 = vsel %vm503_vm1, %v1784_v8, 0.0 }
 0x670   : > { %1786 = vadd.xlane.f32.xlu1 %v1785_v9 }
 0x6fd   : > { %v1787_v13 = vpop.xlane.xlu1 %1786 }
 0x6fe   : > { %v1788_v14 = vmul.f32 0.03125, %v1787_v13 }
 0x700   : > { %v1789_v15 = vadd.f32 1e-05, %v1788_v14 }
 0x702   : > { %2479 = vrsqrt.f32 %v1789_v15 }
 0x70c   : > { %v2480_v16 = vpop.eup %2479 }
 0x70d   : > { %v1791_v18 = vmul.f32 %v2480_v16, %v1783_v6 }
 0x70f   : > { %v1797_v20 = vmul.f32 %v2178_v17, %v1791_v18 }
 0x711   : > { %v1803_v21 = vadd.f32 %v2179_v19, %v1797_v20 }
 0x713   : > { %v1804_v22 = vpack.c.bf16 %v1803_v21, %v1803_v21 }
 0x715   : > { %2317 = vmatmul.mubr.msk.bf16.vlgmr.msra.gmra.mrb[24].mxu0 %vm503_vm1, %v1804_v22 }
 0x7e8   : > { %v1865_v27 = vpop.f32.mrb[24].mxu0 }
 0x7e9   : > { %v1866_v28 = vadd.f32 %v2180_v26, %v1865_v27  ;;  %v2318_v24 = vpop.f32.mrb[25].mxu0 }
 0x7ea   : > { %v1868_v29 = vpop.f32.mrb[26].mxu0 }
 0x7eb   : > { %v1871_v30 = vmax.f32 %v1866_v28, 0.0  ;;  %v2319_v31 = vpop.f32.mrb[27].mxu0 }
 0x7ed   : > { %v1872_v32 = vpack.c.bf16 %v1871_v30, %v1871_v30 }
 0x7ef   : > { %2329 = vmatmul.mubr.msk.bf16.vlgmr.msra.gmra.mrb[24].mxu1 %vm1910_vm7, %v1872_v32 }
 0x8c2   : > { %v1948_v0 = vpop.f32.mrb[24].mxu1 }
 0x8c3   : > { %v1949_v34 = vadd.f32 %v2184_v33, %v1948_v0  ;;  %v2330_v35 = vpop.f32.mrb[25].mxu1 }
 0x8c4   : > { %v1951_v36 = vpop.f32.mrb[26].mxu1 }
 0x8c5   : > { %v2331_v37 = vpop.f32.mrb[27].mxu1  ;;  %v1954_v39 = vadd.f32 %v1949_v34, %v1803_v21 }
 0x8c7   : > { %v1955_v40 = vsel %vm503_vm1, %v1954_v39, 0.0 }
 0x8c8   : > { %1956 = vadd.xlane.f32.xlu0 %v1955_v40 }
 0x955   : > { %v1957_v41 = vpop.xlane.xlu0 %1956 }
 0x956   : > { %v1958_v42 = vmul.f32 0.03125, %v1957_v41 }
 0x958   : > { %v1959_v43 = vsub.f32 %v1954_v39, %v1958_v42 }
 0x95a   : > { %v1960_v45 = vmul.f32 %v1959_v43, %v1959_v43 }
 0x95c   : > { %v1961_v46 = vsel %vm503_vm1, %v1960_v45, 0.0 }
 0x95d   : > { %1962 = vadd.xlane.f32.xlu0 %v1961_v46 }
 0x9ea   : > { %v1963_v47 = vpop.xlane.xlu0 %1962 }
 0x9eb   : > { %v1964_v48 = vmul.f32 0.03125, %v1963_v47 }
 0x9ed   : > { %v1965_v49 = vadd.f32 1e-05, %v1964_v48 }
 0x9ef   : > { %2481 = vrsqrt.f32 %v1965_v49 }
 0x9f9   : > { %v2482_v50 = vpop.eup %2481 }
 0x9fa   : > { %v1967_v52 = vmul.f32 %v2482_v50, %v1959_v43 }
 0x9fc   : > { %v1973_v38 = vmul.f32 %v2190_v51, %v1967_v52 }
 0x9fe   : > { %v1979_v54 = vadd.f32 %v2191_v53, %v1973_v38 }
 0xa00   : > { %1980 = vst.msk [vmem:[%s467_s9] sm:$0xff] %vm503_vm1, %v1979_v54 }
 0xa01   : > { %2638 = shalt.err (!%p2635_p3)
}
 0xa02   : > { %s2639_s4 = scalar_lea.hbm %s3259_s19, 128  ;;  %s2643_s24 = scalar_lea.hbm %s3349_s12, 256 }
 0xa03   : > { %p2640_p11 = scmp.ne.s32.totalorder %s3259_s19, %s2639_s4  ;;  %p2644_p12 = scmp.lt.u32.totalorder %s3259_s19, %s3349_s12 }
 0xa04   : > { %p2645_p4 = scmp.lt.u32.totalorder %s2643_s24, %s2639_s4  ;;  %p2647_p9 = scmp.lt.u32.totalorder %s2639_s4, %s3259_s19 }
 0xa05   : > { %p2641_p6 = pnand %p2640_p11, %p3350_p10 }
 0xa06   : > { %p2646_p2 = por %p2645_p4, %p2644_p12 }
 0xa07   : > { %p2642_p13 = pneg %p2641_p6 }
 0xa08   : > { %p2648_p1 = por %p2647_p9, %p2646_p2 }
 0xa0a   : > { %p2649_p0 = pnand %p2648_p1, %p2642_p13 }
 0xa0c   : > { %2652 = shalt.err (!%p2649_p0)
}
 0xa0d   : > { %2350 = dma.vmem_to_hbm [thread:$0]  (%p3350_p10), %s3261_s23, 128, %s3259_s19, %s1982_s22  }
 0xa0e PF: > { %s2008_s30 = sand.u32 1, %s2695_s13   ;;  %p3351_p7 = scmp.ne.s32.totalorder %s3342_s29, 0 }
 0xa0f   : > { %p3352_p5 = scmp.ge.s32.totalorder %s2715_s18, 2  ;;  %s2009_s11 = scalar_lea.sflag [#allocation6], %s2008_s30 }
 0xa11   : > { %p2370_p8 = pnand %p3352_p5, %p3351_p7 }
 0xa13   : > { %2690 = dma.done.wait (!%p2370_p8), %s2009_s11, 128  }
 0xa14   : > { %2692 = vsyncadd (!%p2370_p8), %s2009_s11, 4294967168  ;;  %s28_s18 = sadd.s32 1, %s2715_s18   ;;  %s3353_s13 = smov %s2699_s14 }
 0xa15   : > { %p25_p3 = scmp.ge.s32.totalorder %s28_s18, 4   ;;  %s3354_s14 = smov %s2703_s15 }
 0xa16   : > { %s3355_s15 = smov %s2977_s27  ;;  %s3356_s16 = smov %s2711_s17 }
 0xa17   : > { %s3357_s17 = smov %s3359_s7  ;;  %27 = sbr.rel (!%p25_p3) target bundleno = 14 (0xe), region = 128 }
 0xa1e   :  { %2014 = vsyncpa [#allocation5], 1 }
 0xa1f   :  { %2016 = vsyncpa [#allocation5 + $0x1], 1 }
 0xa20   :  { %2017 = vsyncpa [#allocation8], 1 }
 0xa21   :  { %2018 = vsyncpa [#allocation11], 1 }
 0xa22   :  { %2019 = vsyncpa [#allocation6], 1 }
 0xa23   :  { %2021 = vsyncpa [#allocation6 + $0x1], 1 }

</bundles_post_ra>
